<compile_context>
chip_gen: v6e
topology: v6e:2x2x1
jax: 0.10.0
libtpu: 0.0.40
codegen_flags: <defaults>
</compile_context>

<pallas_src>
import functools

import jax
import jax.numpy as jnp
from jax.experimental import pallas as pl
from jax.experimental.pallas import tpu as pltpu

ACTIONS = list(range(0, 2001, 10))  # 201 actions
NUM_ACTIONS = len(ACTIONS)
LANE = 128


def _round_up(x, m):
    return ((x + m - 1) // m) * m


def _vmem_limit(block_bytes):
    """VMEM budget: >= what the blocks need, <= 3/4 of this chip's VMEM
    (48 MiB on v7x, ~96 MiB on v5e/v6e), never below 16 MiB."""
    need = 2 * block_bytes + (4 << 20)            # double buffering + slack
    cap = 64 << 20
    try:
        info_fn = getattr(pltpu, "get_tpu_info", None)
        if info_fn is not None:
            cap = int(getattr(info_fn(), "vmem_capacity_bytes", cap) or cap)
    except Exception:
        pass
    return int(min(max(need, 16 << 20), cap * 3 // 4))


def _pick_tb(batch, bytes_per_sample, budget=6 << 20):
    """Batch tile: fits `budget` of conv1-patch bytes, is a multiple of 8
    (legal ragged blocks), and for batch >= 16 yields >= 2 grid steps so the
    'parallel' grid axis can be sharded over v7x's two TensorCores."""
    if batch <= 8:
        return batch                              # single full block (always legal)
    cap = max(1, budget // max(bytes_per_sample, 1))
    tb = max(8, (min(cap, batch // 2) // 8) * 8)
    return min(tb, batch)


# ----------------------------------------------------------------------------
# Fused kernel: conv1 matmul -> conv2 -> conv3 -> fc1 -> fc2 (all in VMEM)
# ----------------------------------------------------------------------------
def _dqn_fused_kernel(p1_ref, w1_ref, b1_ref, w2_ref, b2_ref, w3_ref, b3_ref,
                      wf1_ref, bf1_ref, wf2_ref, bf2_ref, o_ref,
                      *, s1, ow1, oh2, ow2, oh3, ow3):
    """One batch tile of the whole network.  Matmul inputs are bf16 with f32
    MXU accumulation; bias + ReLU in f32.  Spatial loops are unrolled: for the
    small spatial extents here every window is a handful of lane-concats of
    VMEM-resident values (no big HBM blocks, unlike the old head kernel)."""
    f32, bf16 = jnp.float32, jnp.bfloat16
    tb = o_ref.shape[0]

    # ---- conv1: one (tb*S1, K1) x (K1, 32) matmul over every output position
    y1 = jnp.dot(p1_ref[...], w1_ref[...], preferred_element_type=f32)
    y1 = jnp.maximum(y1 + b1_ref[...], 0.0)
    c1 = y1.shape[-1]
    # Row-only split of the batch dim; layout-trivial when S1 % 8 == 0
    # (holds for 36x36 -> S1=64 and 84x84 -> S1=400 inputs).
    y1 = y1.reshape(tb, s1, c1)

    # ---- conv2 (4x4, stride 2): per-output-position window built by
    #      lane-concatenating 16 channel slices; feature order (di, dj, c)
    #      matches the prepared weight matrix.
    y2 = {}
    for p in range(oh2):
        for q in range(ow2):
            win = jnp.concatenate(
                [y1[:, (2 * p + di) * ow1 + (2 * q + dj), :]
                 for di in range(4) for dj in range(4)], axis=-1)   # (tb, 512)
            acc = jnp.dot(win.astype(bf16), w2_ref[...],
                          preferred_element_type=f32)
            y2[(p, q)] = jnp.maximum(acc + b2_ref[...], 0.0)        # (tb, 64)

    # ---- conv3 (3x3, stride 1) + fc1 (accumulated per conv3 position) + fc2
    h1 = jnp.zeros((tb, wf1_ref.shape[2]), f32)
    for r in range(oh3):
        for t in range(ow3):
            win = jnp.concatenate(
                [y2[(r + di, t + dj)] for di in range(3) for dj in range(3)],
                axis=-1)                                            # (tb, 576)
            y3 = jnp.dot(win.astype(bf16), w3_ref[...],
                         preferred_element_type=f32)
            y3 = jnp.maximum(y3 + b3_ref[...], 0.0)                 # (tb, 64)
            h1 = h1 + jnp.dot(y3.astype(bf16), wf1_ref[r * ow3 + t],
                              preferred_element_type=f32)
    h1 = jnp.maximum(h1 + bf1_ref[...], 0.0)                        # (tb, 512)
    logits = jnp.dot(h1.astype(bf16), wf2_ref[...], preferred_element_type=f32)
    o_ref[...] = (logits + bf2_ref[...]).astype(o_ref.dtype)        # (tb, 256)


def dqn_fused_pallas(p1, pp, *, batch, oh1, ow1):
    """p1: (B*S1, K1) bf16 conv1 patches.  Returns (B, 256) f32 padded logits."""
    s1 = oh1 * ow1
    k1 = p1.shape[1]
    oh2, ow2 = (oh1 - 4) // 2 + 1, (ow1 - 4) // 2 + 1
    oh3, ow3 = oh2 - 2, ow2 - 2
    assert oh3 >= 1 and ow3 >= 1, "input spatially too small for the conv stack"
    assert pp["wf1"].shape[0] == oh3 * ow3
    na = pp["wf2"].shape[1]

    tb = _pick_tb(batch, s1 * k1 * 2)
    grid = (pl.cdiv(batch, tb),)

    weight_keys = ("w1", "b1", "w2", "b2", "w3", "b3", "wf1", "bf1", "wf2", "bf2")
    wbytes = sum(pp[k].size * pp[k].dtype.itemsize for k in weight_keys)
    block_bytes = tb * s1 * k1 * 2 + wbytes + tb * na * 4
    flops = 2 * batch * (s1 * k1 * 32
                         + oh2 * ow2 * (16 * 32) * 64
                         + oh3 * ow3 * (9 * 64) * 64
                         + oh3 * ow3 * 64 * 512
                         + 512 * na)
    bytes_accessed = p1.size * p1.dtype.itemsize + wbytes + batch * na * 4

    def wspec(k):
        nd = pp[k].ndim
        return pl.BlockSpec(pp[k].shape, lambda i, _nd=nd: (0,) * _nd)

    out = pl.pallas_call(
        functools.partial(_dqn_fused_kernel, s1=s1, ow1=ow1,
                          oh2=oh2, ow2=ow2, oh3=oh3, ow3=ow3),
        out_shape=jax.ShapeDtypeStruct((batch, na), jnp.float32),
        grid=grid,
        in_specs=[pl.BlockSpec((tb * s1, k1), lambda i: (i, 0))]
                 + [wspec(k) for k in weight_keys],
        out_specs=pl.BlockSpec((tb, na), lambda i: (i, 0)),
        compiler_params=pltpu.CompilerParams(
            dimension_semantics=("parallel",),
            vmem_limit_bytes=_vmem_limit(block_bytes),
        ),
        cost_estimate=pl.CostEstimate(flops=int(flops), transcendentals=0,
                                      bytes_accessed=int(bytes_accessed)),
    )(p1, *[pp[k] for k in weight_keys])
    return out


# ----------------------------------------------------------------------------
# XLA-side glue: conv1 patch gather only (static slices, single copy)
# ----------------------------------------------------------------------------
def _conv1_patches(x_nhwc, kh, kw, stride):
    """NHWC -> (B*oh*ow, kh*kw*C) patch matrix, features ordered (kh, kw, C).
    With C=4 the raw input is too lane-sparse to gather inside the kernel, so
    this one gather stays in XLA and feeds a lane-dense 256-wide matrix."""
    b, h, w, c = x_nhwc.shape
    oh = (h - kh) // stride + 1
    ow = (w - kw) // stride + 1
    cols = []
    for i in range(kh):
        for j in range(kw):
            cols.append(x_nhwc[:, i: i + stride * (oh - 1) + 1: stride,
                                  j: j + stride * (ow - 1) + 1: stride, :])
    col = jnp.stack(cols, axis=3)                    # (B, oh, ow, kh*kw, C)
    return col.reshape(b * oh * ow, kh * kw * c), oh, ow


def dqn_forward(pp, x):
    """x: (B, C, H, W) float32 -> (B, NUM_ACTIONS) float32."""
    b = x.shape[0]
    # One small pass over the raw input (NCHW -> NHWC + bf16); XLA fuses it
    # with the conv1 patch gather below.
    # TODO(synk): hoist this conversion out of the per-call path if the caller
    # can provide NHWC bf16 frames directly.
    x = jnp.transpose(x, (0, 2, 3, 1)).astype(jnp.bfloat16)
    p1, oh1, ow1 = _conv1_patches(x, 8, 8, 4)
    logits = dqn_fused_pallas(p1, pp, batch=b, oh1=oh1, ow1=ow1)
    return logits[:, :NUM_ACTIONS]


# ----------------------------------------------------------------------------
# Parameters: PyTorch-style init, then one-time TPU-friendly preparation
# ----------------------------------------------------------------------------
def init_dqn_params(key, c, h, w):
    size = lambda x, k, s: (x - k) // s + 1
    oh3 = size(size(size(h, 8, 4), 4, 2), 3, 1)
    ow3 = size(size(size(w, 8, 4), 4, 2), 3, 1)
    linear_input_size = 64 * oh3 * ow3

    def uniform(k, shape, fan_in):
        bound = 1.0 / jnp.sqrt(jnp.float32(fan_in))
        return jax.random.uniform(k, shape, jnp.float32, -bound, bound)

    keys = jax.random.split(key, 10)
    return {
        "conv1_w": uniform(keys[0], (32, c, 8, 8), c * 8 * 8),
        "conv1_b": uniform(keys[1], (32,), c * 8 * 8),
        "conv2_w": uniform(keys[2], (64, 32, 4, 4), 32 * 4 * 4),
        "conv2_b": uniform(keys[3], (64,), 32 * 4 * 4),
        "conv3_w": uniform(keys[4], (64, 64, 3, 3), 64 * 3 * 3),
        "conv3_b": uniform(keys[5], (64,), 64 * 3 * 3),
        "fc1_w": uniform(keys[6], (512, linear_input_size), linear_input_size),
        "fc1_b": uniform(keys[7], (512,), linear_input_size),
        "fc2_w": uniform(keys[8], (NUM_ACTIONS, 512), 512),
        "fc2_b": uniform(keys[9], (NUM_ACTIONS,), 512),
    }


def prepare_params(params, c, h, w):
    """One-time layout work: (kh,kw,cin)-ordered bf16 matmul weights at native
    channel widths (no 128-padding), f32 (1, N) biases, fc1 regrouped per conv3
    output position, fc2 padded 201 -> 256 for lane-dense output stores."""
    size = lambda x, k, s: (x - k) // s + 1
    oh3 = size(size(size(h, 8, 4), 4, 2), 3, 1)
    ow3 = size(size(size(w, 8, 4), 4, 2), 3, 1)
    s3 = oh3 * ow3

    def conv_w(wk):  # (cout, cin, kh, kw) -> (kh*kw*cin, cout) bf16
        cout, cin, kh, kw = wk.shape
        return (jnp.transpose(wk, (2, 3, 1, 0))
                .reshape(kh * kw * cin, cout).astype(jnp.bfloat16))

    def bias_row(bv, n=None):
        n = bv.shape[0] if n is None else n
        return (jnp.pad(bv, (0, n - bv.shape[0]))
                .reshape(1, n).astype(jnp.float32))

    # fc1: PyTorch .view flatten is (c, h, w)-ordered; regroup per spatial pos.
    fc1 = params["fc1_w"].reshape(512, 64, oh3, ow3)
    fc1 = jnp.transpose(fc1, (2, 3, 1, 0)).reshape(s3, 64, 512).astype(jnp.bfloat16)

    na_pad = _round_up(NUM_ACTIONS, LANE)            # 201 -> 256 (zero columns)
    fc2 = jnp.pad(params["fc2_w"].T,
                  ((0, 0), (0, na_pad - NUM_ACTIONS))).astype(jnp.bfloat16)

    return {
        "w1": conv_w(params["conv1_w"]), "b1": bias_row(params["conv1_b"]),
        "w2": conv_w(params["conv2_w"]), "b2": bias_row(params["conv2_b"]),
        "w3": conv_w(params["conv3_w"]), "b3": bias_row(params["conv3_b"]),
        "wf1": fc1, "bf1": params["fc1_b"].reshape(1, 512).astype(jnp.float32),
        "wf2": fc2, "bf2": bias_row(params["fc2_b"], na_pad),
    }


# ----------------------------------------------------------------------------
# Float32 XLA reference (matches the PyTorch module) for validation
# ----------------------------------------------------------------------------
def dqn_reference(params, x):
    hi = jax.lax.Precision.HIGHEST

    def conv(v, wk, bk, stride):
        y = jax.lax.conv_general_dilated(
            v, wk, (stride, stride), "VALID",
            dimension_numbers=("NCHW", "OIHW", "NCHW"), precision=hi)
        return jax.nn.relu(y + bk[None, :, None, None])

    y = conv(x, params["conv1_w"], params["conv1_b"], 4)
    y = conv(y, params["conv2_w"], params["conv2_b"], 2)
    y = conv(y, params["conv3_w"], params["conv3_b"], 1)
    y = y.reshape(y.shape[0], -1)
    y = jax.nn.relu(jnp.dot(y, params["fc1_w"].T, precision=hi) + params["fc1_b"])
    return jnp.dot(y, params["fc2_w"].T, precision=hi) + params["fc2_b"]


if __name__ == "__main__":
    # Smallest spatial size the conv stack admits (8/4, 4/2, 3/1 -> H,W >= 36).
    B, C, H, W = 2, 4, 36, 36
    key = jax.random.PRNGKey(0)
    pkey, xkey = jax.random.split(key)
    params = init_dqn_params(pkey, C, H, W)
    prepped = prepare_params(params, C, H, W)
    x = jax.random.normal(xkey, (B, C, H, W), jnp.float32)

    fwd = jax.jit(dqn_forward)
    out = jax.block_until_ready(fwd(prepped, x))
    assert out.shape == (B, NUM_ACTIONS), out.shape
    assert out.dtype == jnp.float32
    assert bool(jnp.all(jnp.isfinite(out)))

    # bf16 kernel boundary vs f32 reference -> scale-aware absolute tolerance
    # (per review's correctness note).
    ref = dqn_reference(params, x)
    max_err = float(jnp.max(jnp.abs(out - ref)))
    tol = 3e-2 * (1.0 + float(jnp.max(jnp.abs(ref))))
    assert max_err <= tol, (max_err, tol)

    print("KERNEL_OK")
</pallas_src>

<mosaic_0001>
module attributes {stable_mosaic.version = 11 : i64} {
  func.func @_dqn_fused_kernel(%arg0: i32, %arg1: memref<128x256xbf16, #tpu.memory_space<vmem>>, %arg2: memref<256x32xbf16, #tpu.memory_space<vmem>>, %arg3: memref<1x32xf32, #tpu.memory_space<vmem>>, %arg4: memref<512x64xbf16, #tpu.memory_space<vmem>>, %arg5: memref<1x64xf32, #tpu.memory_space<vmem>>, %arg6: memref<576x64xbf16, #tpu.memory_space<vmem>>, %arg7: memref<1x64xf32, #tpu.memory_space<vmem>>, %arg8: memref<1x64x512xbf16, #tpu.memory_space<vmem>>, %arg9: memref<1x512xf32, #tpu.memory_space<vmem>>, %arg10: memref<512x256xbf16, #tpu.memory_space<vmem>>, %arg11: memref<1x256xf32, #tpu.memory_space<vmem>>, %arg12: memref<2x256xf32, #tpu.memory_space<vmem>>) attributes {dimension_semantics = [#tpu.dimension_semantics<parallel>], iteration_bounds = array<i64: 1>, scalar_prefetch = 0 : i64, scratch_operands = 0 : i64, tpu.core_type = #tpu.core_type<tc>, window_params = [{transform_indices = @transform_0, window_bounds = array<i64: 128, 256>}, {pipeline_mode = #tpu.pipeline_mode<synchronous>, transform_indices = @transform_1, window_bounds = array<i64: 256, 32>}, {pipeline_mode = #tpu.pipeline_mode<synchronous>, transform_indices = @transform_2, window_bounds = array<i64: 1, 32>}, {pipeline_mode = #tpu.pipeline_mode<synchronous>, transform_indices = @transform_3, window_bounds = array<i64: 512, 64>}, {pipeline_mode = #tpu.pipeline_mode<synchronous>, transform_indices = @transform_4, window_bounds = array<i64: 1, 64>}, {pipeline_mode = #tpu.pipeline_mode<synchronous>, transform_indices = @transform_5, window_bounds = array<i64: 576, 64>}, {pipeline_mode = #tpu.pipeline_mode<synchronous>, transform_indices = @transform_6, window_bounds = array<i64: 1, 64>}, {pipeline_mode = #tpu.pipeline_mode<synchronous>, transform_indices = @transform_7, window_bounds = array<i64: 1, 64, 512>}, {pipeline_mode = #tpu.pipeline_mode<synchronous>, transform_indices = @transform_8, window_bounds = array<i64: 1, 512>}, {pipeline_mode = #tpu.pipeline_mode<synchronous>, transform_indices = @transform_9, window_bounds = array<i64: 512, 256>}, {pipeline_mode = #tpu.pipeline_mode<synchronous>, transform_indices = @transform_10, window_bounds = array<i64: 1, 256>}, {transform_indices = @transform_11, window_bounds = array<i64: 2, 256>}]} {
    %c0 = arith.constant 0 : index
    %c0_0 = arith.constant 0 : index
    %0 = vector.load %arg1[%c0, %c0_0] : memref<128x256xbf16, #tpu.memory_space<vmem>>, vector<128x256xbf16>
    %c0_1 = arith.constant 0 : index
    %c0_2 = arith.constant 0 : index
    %1 = vector.load %arg2[%c0_1, %c0_2] : memref<256x32xbf16, #tpu.memory_space<vmem>>, vector<256x32xbf16>
    %cst = arith.constant dense<0.000000e+00> : vector<128x32xf32>
    %2 = tpu.matmul %0, %1, %cst {dimension_numbers = #tpu.dot_dimension_numbers<[1], [0], [0], [1], [0, 0, 1, 1], [], []>} : vector<128x256xbf16>, vector<256x32xbf16>, vector<128x32xf32> -> vector<128x32xf32>
    %c0_3 = arith.constant 0 : index
    %c0_4 = arith.constant 0 : index
    %3 = vector.load %arg3[%c0_3, %c0_4] : memref<1x32xf32, #tpu.memory_space<vmem>>, vector<1x32xf32>
    %4 = vector.broadcast %3 : vector<1x32xf32> to vector<128x32xf32>
    %5 = arith.addf %2, %4 : vector<128x32xf32>
    %cst_5 = arith.constant 0.000000e+00 : f32
    %6 = vector.broadcast %cst_5 : f32 to vector<128x32xf32>
    %7 = arith.maximumf %5, %6 : vector<128x32xf32>
    %8 = vector.shape_cast %7 : vector<128x32xf32> to vector<2x64x32xf32>
    %9 = vector.extract_strided_slice %8 {offsets = [0, 0, 0], sizes = [2, 1, 32], strides = [1, 1, 1]} : vector<2x64x32xf32> to vector<2x1x32xf32>
    %10 = vector.shape_cast %9 : vector<2x1x32xf32> to vector<2x32xf32>
    %11 = vector.extract_strided_slice %8 {offsets = [0, 1, 0], sizes = [2, 1, 32], strides = [1, 1, 1]} : vector<2x64x32xf32> to vector<2x1x32xf32>
    %12 = vector.shape_cast %11 : vector<2x1x32xf32> to vector<2x32xf32>
    %13 = vector.extract_strided_slice %8 {offsets = [0, 2, 0], sizes = [2, 1, 32], strides = [1, 1, 1]} : vector<2x64x32xf32> to vector<2x1x32xf32>
    %14 = vector.shape_cast %13 : vector<2x1x32xf32> to vector<2x32xf32>
    %15 = vector.extract_strided_slice %8 {offsets = [0, 3, 0], sizes = [2, 1, 32], strides = [1, 1, 1]} : vector<2x64x32xf32> to vector<2x1x32xf32>
    %16 = vector.shape_cast %15 : vector<2x1x32xf32> to vector<2x32xf32>
    %17 = vector.extract_strided_slice %8 {offsets = [0, 8, 0], sizes = [2, 1, 32], strides = [1, 1, 1]} : vector<2x64x32xf32> to vector<2x1x32xf32>
    %18 = vector.shape_cast %17 : vector<2x1x32xf32> to vector<2x32xf32>
    %19 = vector.extract_strided_slice %8 {offsets = [0, 9, 0], sizes = [2, 1, 32], strides = [1, 1, 1]} : vector<2x64x32xf32> to vector<2x1x32xf32>
    %20 = vector.shape_cast %19 : vector<2x1x32xf32> to vector<2x32xf32>
    %21 = vector.extract_strided_slice %8 {offsets = [0, 10, 0], sizes = [2, 1, 32], strides = [1, 1, 1]} : vector<2x64x32xf32> to vector<2x1x32xf32>
    %22 = vector.shape_cast %21 : vector<2x1x32xf32> to vector<2x32xf32>
    %23 = vector.extract_strided_slice %8 {offsets = [0, 11, 0], sizes = [2, 1, 32], strides = [1, 1, 1]} : vector<2x64x32xf32> to vector<2x1x32xf32>
    %24 = vector.shape_cast %23 : vector<2x1x32xf32> to vector<2x32xf32>
    %25 = vector.extract_strided_slice %8 {offsets = [0, 16, 0], sizes = [2, 1, 32], strides = [1, 1, 1]} : vector<2x64x32xf32> to vector<2x1x32xf32>
    %26 = vector.shape_cast %25 : vector<2x1x32xf32> to vector<2x32xf32>
    %27 = vector.extract_strided_slice %8 {offsets = [0, 17, 0], sizes = [2, 1, 32], strides = [1, 1, 1]} : vector<2x64x32xf32> to vector<2x1x32xf32>
    %28 = vector.shape_cast %27 : vector<2x1x32xf32> to vector<2x32xf32>
    %29 = vector.extract_strided_slice %8 {offsets = [0, 18, 0], sizes = [2, 1, 32], strides = [1, 1, 1]} : vector<2x64x32xf32> to vector<2x1x32xf32>
    %30 = vector.shape_cast %29 : vector<2x1x32xf32> to vector<2x32xf32>
    %31 = vector.extract_strided_slice %8 {offsets = [0, 19, 0], sizes = [2, 1, 32], strides = [1, 1, 1]} : vector<2x64x32xf32> to vector<2x1x32xf32>
    %32 = vector.shape_cast %31 : vector<2x1x32xf32> to vector<2x32xf32>
    %33 = vector.extract_strided_slice %8 {offsets = [0, 24, 0], sizes = [2, 1, 32], strides = [1, 1, 1]} : vector<2x64x32xf32> to vector<2x1x32xf32>
    %34 = vector.shape_cast %33 : vector<2x1x32xf32> to vector<2x32xf32>
    %35 = vector.extract_strided_slice %8 {offsets = [0, 25, 0], sizes = [2, 1, 32], strides = [1, 1, 1]} : vector<2x64x32xf32> to vector<2x1x32xf32>
    %36 = vector.shape_cast %35 : vector<2x1x32xf32> to vector<2x32xf32>
    %37 = vector.extract_strided_slice %8 {offsets = [0, 26, 0], sizes = [2, 1, 32], strides = [1, 1, 1]} : vector<2x64x32xf32> to vector<2x1x32xf32>
    %38 = vector.shape_cast %37 : vector<2x1x32xf32> to vector<2x32xf32>
    %39 = vector.extract_strided_slice %8 {offsets = [0, 27, 0], sizes = [2, 1, 32], strides = [1, 1, 1]} : vector<2x64x32xf32> to vector<2x1x32xf32>
    %40 = vector.shape_cast %39 : vector<2x1x32xf32> to vector<2x32xf32>
    %41 = tpu.concatenate %10, %12, %14, %16, %18, %20, %22, %24, %26, %28, %30, %32, %34, %36, %38, %40 in 1 : vector<2x32xf32>, vector<2x32xf32>, vector<2x32xf32>, vector<2x32xf32>, vector<2x32xf32>, vector<2x32xf32>, vector<2x32xf32>, vector<2x32xf32>, vector<2x32xf32>, vector<2x32xf32>, vector<2x32xf32>, vector<2x32xf32>, vector<2x32xf32>, vector<2x32xf32>, vector<2x32xf32>, vector<2x32xf32> -> vector<2x512xf32>
    %42 = arith.truncf %41 : vector<2x512xf32> to vector<2x512xbf16>
    %c0_6 = arith.constant 0 : index
    %c0_7 = arith.constant 0 : index
    %43 = vector.load %arg4[%c0_6, %c0_7] : memref<512x64xbf16, #tpu.memory_space<vmem>>, vector<512x64xbf16>
    %cst_8 = arith.constant dense<0.000000e+00> : vector<2x64xf32>
    %44 = tpu.matmul %42, %43, %cst_8 {dimension_numbers = #tpu.dot_dimension_numbers<[1], [0], [0], [1], [0, 0, 1, 1], [], []>} : vector<2x512xbf16>, vector<512x64xbf16>, vector<2x64xf32> -> vector<2x64xf32>
    %c0_9 = arith.constant 0 : index
    %c0_10 = arith.constant 0 : index
    %45 = vector.load %arg5[%c0_9, %c0_10] : memref<1x64xf32, #tpu.memory_space<vmem>>, vector<1x64xf32>
    %46 = vector.broadcast %45 : vector<1x64xf32> to vector<2x64xf32>
    %47 = arith.addf %44, %46 : vector<2x64xf32>
    %cst_11 = arith.constant 0.000000e+00 : f32
    %48 = vector.broadcast %cst_11 : f32 to vector<2x64xf32>
    %49 = arith.maximumf %47, %48 : vector<2x64xf32>
    %50 = vector.extract_strided_slice %8 {offsets = [0, 2, 0], sizes = [2, 1, 32], strides = [1, 1, 1]} : vector<2x64x32xf32> to vector<2x1x32xf32>
    %51 = vector.shape_cast %50 : vector<2x1x32xf32> to vector<2x32xf32>
    %52 = vector.extract_strided_slice %8 {offsets = [0, 3, 0], sizes = [2, 1, 32], strides = [1, 1, 1]} : vector<2x64x32xf32> to vector<2x1x32xf32>
    %53 = vector.shape_cast %52 : vector<2x1x32xf32> to vector<2x32xf32>
    %54 = vector.extract_strided_slice %8 {offsets = [0, 4, 0], sizes = [2, 1, 32], strides = [1, 1, 1]} : vector<2x64x32xf32> to vector<2x1x32xf32>
    %55 = vector.shape_cast %54 : vector<2x1x32xf32> to vector<2x32xf32>
    %56 = vector.extract_strided_slice %8 {offsets = [0, 5, 0], sizes = [2, 1, 32], strides = [1, 1, 1]} : vector<2x64x32xf32> to vector<2x1x32xf32>
    %57 = vector.shape_cast %56 : vector<2x1x32xf32> to vector<2x32xf32>
    %58 = vector.extract_strided_slice %8 {offsets = [0, 10, 0], sizes = [2, 1, 32], strides = [1, 1, 1]} : vector<2x64x32xf32> to vector<2x1x32xf32>
    %59 = vector.shape_cast %58 : vector<2x1x32xf32> to vector<2x32xf32>
    %60 = vector.extract_strided_slice %8 {offsets = [0, 11, 0], sizes = [2, 1, 32], strides = [1, 1, 1]} : vector<2x64x32xf32> to vector<2x1x32xf32>
    %61 = vector.shape_cast %60 : vector<2x1x32xf32> to vector<2x32xf32>
    %62 = vector.extract_strided_slice %8 {offsets = [0, 12, 0], sizes = [2, 1, 32], strides = [1, 1, 1]} : vector<2x64x32xf32> to vector<2x1x32xf32>
    %63 = vector.shape_cast %62 : vector<2x1x32xf32> to vector<2x32xf32>
    %64 = vector.extract_strided_slice %8 {offsets = [0, 13, 0], sizes = [2, 1, 32], strides = [1, 1, 1]} : vector<2x64x32xf32> to vector<2x1x32xf32>
    %65 = vector.shape_cast %64 : vector<2x1x32xf32> to vector<2x32xf32>
    %66 = vector.extract_strided_slice %8 {offsets = [0, 18, 0], sizes = [2, 1, 32], strides = [1, 1, 1]} : vector<2x64x32xf32> to vector<2x1x32xf32>
    %67 = vector.shape_cast %66 : vector<2x1x32xf32> to vector<2x32xf32>
    %68 = vector.extract_strided_slice %8 {offsets = [0, 19, 0], sizes = [2, 1, 32], strides = [1, 1, 1]} : vector<2x64x32xf32> to vector<2x1x32xf32>
    %69 = vector.shape_cast %68 : vector<2x1x32xf32> to vector<2x32xf32>
    %70 = vector.extract_strided_slice %8 {offsets = [0, 20, 0], sizes = [2, 1, 32], strides = [1, 1, 1]} : vector<2x64x32xf32> to vector<2x1x32xf32>
    %71 = vector.shape_cast %70 : vector<2x1x32xf32> to vector<2x32xf32>
    %72 = vector.extract_strided_slice %8 {offsets = [0, 21, 0], sizes = [2, 1, 32], strides = [1, 1, 1]} : vector<2x64x32xf32> to vector<2x1x32xf32>
    %73 = vector.shape_cast %72 : vector<2x1x32xf32> to vector<2x32xf32>
    %74 = vector.extract_strided_slice %8 {offsets = [0, 26, 0], sizes = [2, 1, 32], strides = [1, 1, 1]} : vector<2x64x32xf32> to vector<2x1x32xf32>
    %75 = vector.shape_cast %74 : vector<2x1x32xf32> to vector<2x32xf32>
    %76 = vector.extract_strided_slice %8 {offsets = [0, 27, 0], sizes = [2, 1, 32], strides = [1, 1, 1]} : vector<2x64x32xf32> to vector<2x1x32xf32>
    %77 = vector.shape_cast %76 : vector<2x1x32xf32> to vector<2x32xf32>
    %78 = vector.extract_strided_slice %8 {offsets = [0, 28, 0], sizes = [2, 1, 32], strides = [1, 1, 1]} : vector<2x64x32xf32> to vector<2x1x32xf32>
    %79 = vector.shape_cast %78 : vector<2x1x32xf32> to vector<2x32xf32>
    %80 = vector.extract_strided_slice %8 {offsets = [0, 29, 0], sizes = [2, 1, 32], strides = [1, 1, 1]} : vector<2x64x32xf32> to vector<2x1x32xf32>
    %81 = vector.shape_cast %80 : vector<2x1x32xf32> to vector<2x32xf32>
    %82 = tpu.concatenate %51, %53, %55, %57, %59, %61, %63, %65, %67, %69, %71, %73, %75, %77, %79, %81 in 1 : vector<2x32xf32>, vector<2x32xf32>, vector<2x32xf32>, vector<2x32xf32>, vector<2x32xf32>, vector<2x32xf32>, vector<2x32xf32>, vector<2x32xf32>, vector<2x32xf32>, vector<2x32xf32>, vector<2x32xf32>, vector<2x32xf32>, vector<2x32xf32>, vector<2x32xf32>, vector<2x32xf32>, vector<2x32xf32> -> vector<2x512xf32>
    %83 = arith.truncf %82 : vector<2x512xf32> to vector<2x512xbf16>
    %c0_12 = arith.constant 0 : index
    %c0_13 = arith.constant 0 : index
    %84 = vector.load %arg4[%c0_12, %c0_13] : memref<512x64xbf16, #tpu.memory_space<vmem>>, vector<512x64xbf16>
    %cst_14 = arith.constant dense<0.000000e+00> : vector<2x64xf32>
    %85 = tpu.matmul %83, %84, %cst_14 {dimension_numbers = #tpu.dot_dimension_numbers<[1], [0], [0], [1], [0, 0, 1, 1], [], []>} : vector<2x512xbf16>, vector<512x64xbf16>, vector<2x64xf32> -> vector<2x64xf32>
    %c0_15 = arith.constant 0 : index
    %c0_16 = arith.constant 0 : index
    %86 = vector.load %arg5[%c0_15, %c0_16] : memref<1x64xf32, #tpu.memory_space<vmem>>, vector<1x64xf32>
    %87 = vector.broadcast %86 : vector<1x64xf32> to vector<2x64xf32>
    %88 = arith.addf %85, %87 : vector<2x64xf32>
    %cst_17 = arith.constant 0.000000e+00 : f32
    %89 = vector.broadcast %cst_17 : f32 to vector<2x64xf32>
    %90 = arith.maximumf %88, %89 : vector<2x64xf32>
    %91 = vector.extract_strided_slice %8 {offsets = [0, 4, 0], sizes = [2, 1, 32], strides = [1, 1, 1]} : vector<2x64x32xf32> to vector<2x1x32xf32>
    %92 = vector.shape_cast %91 : vector<2x1x32xf32> to vector<2x32xf32>
    %93 = vector.extract_strided_slice %8 {offsets = [0, 5, 0], sizes = [2, 1, 32], strides = [1, 1, 1]} : vector<2x64x32xf32> to vector<2x1x32xf32>
    %94 = vector.shape_cast %93 : vector<2x1x32xf32> to vector<2x32xf32>
    %95 = vector.extract_strided_slice %8 {offsets = [0, 6, 0], sizes = [2, 1, 32], strides = [1, 1, 1]} : vector<2x64x32xf32> to vector<2x1x32xf32>
    %96 = vector.shape_cast %95 : vector<2x1x32xf32> to vector<2x32xf32>
    %97 = vector.extract_strided_slice %8 {offsets = [0, 7, 0], sizes = [2, 1, 32], strides = [1, 1, 1]} : vector<2x64x32xf32> to vector<2x1x32xf32>
    %98 = vector.shape_cast %97 : vector<2x1x32xf32> to vector<2x32xf32>
    %99 = vector.extract_strided_slice %8 {offsets = [0, 12, 0], sizes = [2, 1, 32], strides = [1, 1, 1]} : vector<2x64x32xf32> to vector<2x1x32xf32>
    %100 = vector.shape_cast %99 : vector<2x1x32xf32> to vector<2x32xf32>
    %101 = vector.extract_strided_slice %8 {offsets = [0, 13, 0], sizes = [2, 1, 32], strides = [1, 1, 1]} : vector<2x64x32xf32> to vector<2x1x32xf32>
    %102 = vector.shape_cast %101 : vector<2x1x32xf32> to vector<2x32xf32>
    %103 = vector.extract_strided_slice %8 {offsets = [0, 14, 0], sizes = [2, 1, 32], strides = [1, 1, 1]} : vector<2x64x32xf32> to vector<2x1x32xf32>
    %104 = vector.shape_cast %103 : vector<2x1x32xf32> to vector<2x32xf32>
    %105 = vector.extract_strided_slice %8 {offsets = [0, 15, 0], sizes = [2, 1, 32], strides = [1, 1, 1]} : vector<2x64x32xf32> to vector<2x1x32xf32>
    %106 = vector.shape_cast %105 : vector<2x1x32xf32> to vector<2x32xf32>
    %107 = vector.extract_strided_slice %8 {offsets = [0, 20, 0], sizes = [2, 1, 32], strides = [1, 1, 1]} : vector<2x64x32xf32> to vector<2x1x32xf32>
    %108 = vector.shape_cast %107 : vector<2x1x32xf32> to vector<2x32xf32>
    %109 = vector.extract_strided_slice %8 {offsets = [0, 21, 0], sizes = [2, 1, 32], strides = [1, 1, 1]} : vector<2x64x32xf32> to vector<2x1x32xf32>
    %110 = vector.shape_cast %109 : vector<2x1x32xf32> to vector<2x32xf32>
    %111 = vector.extract_strided_slice %8 {offsets = [0, 22, 0], sizes = [2, 1, 32], strides = [1, 1, 1]} : vector<2x64x32xf32> to vector<2x1x32xf32>
    %112 = vector.shape_cast %111 : vector<2x1x32xf32> to vector<2x32xf32>
    %113 = vector.extract_strided_slice %8 {offsets = [0, 23, 0], sizes = [2, 1, 32], strides = [1, 1, 1]} : vector<2x64x32xf32> to vector<2x1x32xf32>
    %114 = vector.shape_cast %113 : vector<2x1x32xf32> to vector<2x32xf32>
    %115 = vector.extract_strided_slice %8 {offsets = [0, 28, 0], sizes = [2, 1, 32], strides = [1, 1, 1]} : vector<2x64x32xf32> to vector<2x1x32xf32>
    %116 = vector.shape_cast %115 : vector<2x1x32xf32> to vector<2x32xf32>
    %117 = vector.extract_strided_slice %8 {offsets = [0, 29, 0], sizes = [2, 1, 32], strides = [1, 1, 1]} : vector<2x64x32xf32> to vector<2x1x32xf32>
    %118 = vector.shape_cast %117 : vector<2x1x32xf32> to vector<2x32xf32>
    %119 = vector.extract_strided_slice %8 {offsets = [0, 30, 0], sizes = [2, 1, 32], strides = [1, 1, 1]} : vector<2x64x32xf32> to vector<2x1x32xf32>
    %120 = vector.shape_cast %119 : vector<2x1x32xf32> to vector<2x32xf32>
    %121 = vector.extract_strided_slice %8 {offsets = [0, 31, 0], sizes = [2, 1, 32], strides = [1, 1, 1]} : vector<2x64x32xf32> to vector<2x1x32xf32>
    %122 = vector.shape_cast %121 : vector<2x1x32xf32> to vector<2x32xf32>
    %123 = tpu.concatenate %92, %94, %96, %98, %100, %102, %104, %106, %108, %110, %112, %114, %116, %118, %120, %122 in 1 : vector<2x32xf32>, vector<2x32xf32>, vector<2x32xf32>, vector<2x32xf32>, vector<2x32xf32>, vector<2x32xf32>, vector<2x32xf32>, vector<2x32xf32>, vector<2x32xf32>, vector<2x32xf32>, vector<2x32xf32>, vector<2x32xf32>, vector<2x32xf32>, vector<2x32xf32>, vector<2x32xf32>, vector<2x32xf32> -> vector<2x512xf32>
    %124 = arith.truncf %123 : vector<2x512xf32> to vector<2x512xbf16>
    %c0_18 = arith.constant 0 : index
    %c0_19 = arith.constant 0 : index
    %125 = vector.load %arg4[%c0_18, %c0_19] : memref<512x64xbf16, #tpu.memory_space<vmem>>, vector<512x64xbf16>
    %cst_20 = arith.constant dense<0.000000e+00> : vector<2x64xf32>
    %126 = tpu.matmul %124, %125, %cst_20 {dimension_numbers = #tpu.dot_dimension_numbers<[1], [0], [0], [1], [0, 0, 1, 1], [], []>} : vector<2x512xbf16>, vector<512x64xbf16>, vector<2x64xf32> -> vector<2x64xf32>
    %c0_21 = arith.constant 0 : index
    %c0_22 = arith.constant 0 : index
    %127 = vector.load %arg5[%c0_21, %c0_22] : memref<1x64xf32, #tpu.memory_space<vmem>>, vector<1x64xf32>
    %128 = vector.broadcast %127 : vector<1x64xf32> to vector<2x64xf32>
    %129 = arith.addf %126, %128 : vector<2x64xf32>
    %cst_23 = arith.constant 0.000000e+00 : f32
    %130 = vector.broadcast %cst_23 : f32 to vector<2x64xf32>
    %131 = arith.maximumf %129, %130 : vector<2x64xf32>
    %132 = vector.extract_strided_slice %8 {offsets = [0, 16, 0], sizes = [2, 1, 32], strides = [1, 1, 1]} : vector<2x64x32xf32> to vector<2x1x32xf32>
    %133 = vector.shape_cast %132 : vector<2x1x32xf32> to vector<2x32xf32>
    %134 = vector.extract_strided_slice %8 {offsets = [0, 17, 0], sizes = [2, 1, 32], strides = [1, 1, 1]} : vector<2x64x32xf32> to vector<2x1x32xf32>
    %135 = vector.shape_cast %134 : vector<2x1x32xf32> to vector<2x32xf32>
    %136 = vector.extract_strided_slice %8 {offsets = [0, 18, 0], sizes = [2, 1, 32], strides = [1, 1, 1]} : vector<2x64x32xf32> to vector<2x1x32xf32>
    %137 = vector.shape_cast %136 : vector<2x1x32xf32> to vector<2x32xf32>
    %138 = vector.extract_strided_slice %8 {offsets = [0, 19, 0], sizes = [2, 1, 32], strides = [1, 1, 1]} : vector<2x64x32xf32> to vector<2x1x32xf32>
    %139 = vector.shape_cast %138 : vector<2x1x32xf32> to vector<2x32xf32>
    %140 = vector.extract_strided_slice %8 {offsets = [0, 24, 0], sizes = [2, 1, 32], strides = [1, 1, 1]} : vector<2x64x32xf32> to vector<2x1x32xf32>
    %141 = vector.shape_cast %140 : vector<2x1x32xf32> to vector<2x32xf32>
    %142 = vector.extract_strided_slice %8 {offsets = [0, 25, 0], sizes = [2, 1, 32], strides = [1, 1, 1]} : vector<2x64x32xf32> to vector<2x1x32xf32>
    %143 = vector.shape_cast %142 : vector<2x1x32xf32> to vector<2x32xf32>
    %144 = vector.extract_strided_slice %8 {offsets = [0, 26, 0], sizes = [2, 1, 32], strides = [1, 1, 1]} : vector<2x64x32xf32> to vector<2x1x32xf32>
    %145 = vector.shape_cast %144 : vector<2x1x32xf32> to vector<2x32xf32>
    %146 = vector.extract_strided_slice %8 {offsets = [0, 27, 0], sizes = [2, 1, 32], strides = [1, 1, 1]} : vector<2x64x32xf32> to vector<2x1x32xf32>
    %147 = vector.shape_cast %146 : vector<2x1x32xf32> to vector<2x32xf32>
    %148 = vector.extract_strided_slice %8 {offsets = [0, 32, 0], sizes = [2, 1, 32], strides = [1, 1, 1]} : vector<2x64x32xf32> to vector<2x1x32xf32>
    %149 = vector.shape_cast %148 : vector<2x1x32xf32> to vector<2x32xf32>
    %150 = vector.extract_strided_slice %8 {offsets = [0, 33, 0], sizes = [2, 1, 32], strides = [1, 1, 1]} : vector<2x64x32xf32> to vector<2x1x32xf32>
    %151 = vector.shape_cast %150 : vector<2x1x32xf32> to vector<2x32xf32>
    %152 = vector.extract_strided_slice %8 {offsets = [0, 34, 0], sizes = [2, 1, 32], strides = [1, 1, 1]} : vector<2x64x32xf32> to vector<2x1x32xf32>
    %153 = vector.shape_cast %152 : vector<2x1x32xf32> to vector<2x32xf32>
    %154 = vector.extract_strided_slice %8 {offsets = [0, 35, 0], sizes = [2, 1, 32], strides = [1, 1, 1]} : vector<2x64x32xf32> to vector<2x1x32xf32>
    %155 = vector.shape_cast %154 : vector<2x1x32xf32> to vector<2x32xf32>
    %156 = vector.extract_strided_slice %8 {offsets = [0, 40, 0], sizes = [2, 1, 32], strides = [1, 1, 1]} : vector<2x64x32xf32> to vector<2x1x32xf32>
    %157 = vector.shape_cast %156 : vector<2x1x32xf32> to vector<2x32xf32>
    %158 = vector.extract_strided_slice %8 {offsets = [0, 41, 0], sizes = [2, 1, 32], strides = [1, 1, 1]} : vector<2x64x32xf32> to vector<2x1x32xf32>
    %159 = vector.shape_cast %158 : vector<2x1x32xf32> to vector<2x32xf32>
    %160 = vector.extract_strided_slice %8 {offsets = [0, 42, 0], sizes = [2, 1, 32], strides = [1, 1, 1]} : vector<2x64x32xf32> to vector<2x1x32xf32>
    %161 = vector.shape_cast %160 : vector<2x1x32xf32> to vector<2x32xf32>
    %162 = vector.extract_strided_slice %8 {offsets = [0, 43, 0], sizes = [2, 1, 32], strides = [1, 1, 1]} : vector<2x64x32xf32> to vector<2x1x32xf32>
    %163 = vector.shape_cast %162 : vector<2x1x32xf32> to vector<2x32xf32>
    %164 = tpu.concatenate %133, %135, %137, %139, %141, %143, %145, %147, %149, %151, %153, %155, %157, %159, %161, %163 in 1 : vector<2x32xf32>, vector<2x32xf32>, vector<2x32xf32>, vector<2x32xf32>, vector<2x32xf32>, vector<2x32xf32>, vector<2x32xf32>, vector<2x32xf32>, vector<2x32xf32>, vector<2x32xf32>, vector<2x32xf32>, vector<2x32xf32>, vector<2x32xf32>, vector<2x32xf32>, vector<2x32xf32>, vector<2x32xf32> -> vector<2x512xf32>
    %165 = arith.truncf %164 : vector<2x512xf32> to vector<2x512xbf16>
    %c0_24 = arith.constant 0 : index
    %c0_25 = arith.constant 0 : index
    %166 = vector.load %arg4[%c0_24, %c0_25] : memref<512x64xbf16, #tpu.memory_space<vmem>>, vector<512x64xbf16>
    %cst_26 = arith.constant dense<0.000000e+00> : vector<2x64xf32>
    %167 = tpu.matmul %165, %166, %cst_26 {dimension_numbers = #tpu.dot_dimension_numbers<[1], [0], [0], [1], [0, 0, 1, 1], [], []>} : vector<2x512xbf16>, vector<512x64xbf16>, vector<2x64xf32> -> vector<2x64xf32>
    %c0_27 = arith.constant 0 : index
    %c0_28 = arith.constant 0 : index
    %168 = vector.load %arg5[%c0_27, %c0_28] : memref<1x64xf32, #tpu.memory_space<vmem>>, vector<1x64xf32>
    %169 = vector.broadcast %168 : vector<1x64xf32> to vector<2x64xf32>
    %170 = arith.addf %167, %169 : vector<2x64xf32>
    %cst_29 = arith.constant 0.000000e+00 : f32
    %171 = vector.broadcast %cst_29 : f32 to vector<2x64xf32>
    %172 = arith.maximumf %170, %171 : vector<2x64xf32>
    %173 = vector.extract_strided_slice %8 {offsets = [0, 18, 0], sizes = [2, 1, 32], strides = [1, 1, 1]} : vector<2x64x32xf32> to vector<2x1x32xf32>
    %174 = vector.shape_cast %173 : vector<2x1x32xf32> to vector<2x32xf32>
    %175 = vector.extract_strided_slice %8 {offsets = [0, 19, 0], sizes = [2, 1, 32], strides = [1, 1, 1]} : vector<2x64x32xf32> to vector<2x1x32xf32>
    %176 = vector.shape_cast %175 : vector<2x1x32xf32> to vector<2x32xf32>
    %177 = vector.extract_strided_slice %8 {offsets = [0, 20, 0], sizes = [2, 1, 32], strides = [1, 1, 1]} : vector<2x64x32xf32> to vector<2x1x32xf32>
    %178 = vector.shape_cast %177 : vector<2x1x32xf32> to vector<2x32xf32>
    %179 = vector.extract_strided_slice %8 {offsets = [0, 21, 0], sizes = [2, 1, 32], strides = [1, 1, 1]} : vector<2x64x32xf32> to vector<2x1x32xf32>
    %180 = vector.shape_cast %179 : vector<2x1x32xf32> to vector<2x32xf32>
    %181 = vector.extract_strided_slice %8 {offsets = [0, 26, 0], sizes = [2, 1, 32], strides = [1, 1, 1]} : vector<2x64x32xf32> to vector<2x1x32xf32>
    %182 = vector.shape_cast %181 : vector<2x1x32xf32> to vector<2x32xf32>
    %183 = vector.extract_strided_slice %8 {offsets = [0, 27, 0], sizes = [2, 1, 32], strides = [1, 1, 1]} : vector<2x64x32xf32> to vector<2x1x32xf32>
    %184 = vector.shape_cast %183 : vector<2x1x32xf32> to vector<2x32xf32>
    %185 = vector.extract_strided_slice %8 {offsets = [0, 28, 0], sizes = [2, 1, 32], strides = [1, 1, 1]} : vector<2x64x32xf32> to vector<2x1x32xf32>
    %186 = vector.shape_cast %185 : vector<2x1x32xf32> to vector<2x32xf32>
    %187 = vector.extract_strided_slice %8 {offsets = [0, 29, 0], sizes = [2, 1, 32], strides = [1, 1, 1]} : vector<2x64x32xf32> to vector<2x1x32xf32>
    %188 = vector.shape_cast %187 : vector<2x1x32xf32> to vector<2x32xf32>
    %189 = vector.extract_strided_slice %8 {offsets = [0, 34, 0], sizes = [2, 1, 32], strides = [1, 1, 1]} : vector<2x64x32xf32> to vector<2x1x32xf32>
    %190 = vector.shape_cast %189 : vector<2x1x32xf32> to vector<2x32xf32>
    %191 = vector.extract_strided_slice %8 {offsets = [0, 35, 0], sizes = [2, 1, 32], strides = [1, 1, 1]} : vector<2x64x32xf32> to vector<2x1x32xf32>
    %192 = vector.shape_cast %191 : vector<2x1x32xf32> to vector<2x32xf32>
    %193 = vector.extract_strided_slice %8 {offsets = [0, 36, 0], sizes = [2, 1, 32], strides = [1, 1, 1]} : vector<2x64x32xf32> to vector<2x1x32xf32>
    %194 = vector.shape_cast %193 : vector<2x1x32xf32> to vector<2x32xf32>
    %195 = vector.extract_strided_slice %8 {offsets = [0, 37, 0], sizes = [2, 1, 32], strides = [1, 1, 1]} : vector<2x64x32xf32> to vector<2x1x32xf32>
    %196 = vector.shape_cast %195 : vector<2x1x32xf32> to vector<2x32xf32>
    %197 = vector.extract_strided_slice %8 {offsets = [0, 42, 0], sizes = [2, 1, 32], strides = [1, 1, 1]} : vector<2x64x32xf32> to vector<2x1x32xf32>
    %198 = vector.shape_cast %197 : vector<2x1x32xf32> to vector<2x32xf32>
    %199 = vector.extract_strided_slice %8 {offsets = [0, 43, 0], sizes = [2, 1, 32], strides = [1, 1, 1]} : vector<2x64x32xf32> to vector<2x1x32xf32>
    %200 = vector.shape_cast %199 : vector<2x1x32xf32> to vector<2x32xf32>
    %201 = vector.extract_strided_slice %8 {offsets = [0, 44, 0], sizes = [2, 1, 32], strides = [1, 1, 1]} : vector<2x64x32xf32> to vector<2x1x32xf32>
    %202 = vector.shape_cast %201 : vector<2x1x32xf32> to vector<2x32xf32>
    %203 = vector.extract_strided_slice %8 {offsets = [0, 45, 0], sizes = [2, 1, 32], strides = [1, 1, 1]} : vector<2x64x32xf32> to vector<2x1x32xf32>
    %204 = vector.shape_cast %203 : vector<2x1x32xf32> to vector<2x32xf32>
    %205 = tpu.concatenate %174, %176, %178, %180, %182, %184, %186, %188, %190, %192, %194, %196, %198, %200, %202, %204 in 1 : vector<2x32xf32>, vector<2x32xf32>, vector<2x32xf32>, vector<2x32xf32>, vector<2x32xf32>, vector<2x32xf32>, vector<2x32xf32>, vector<2x32xf32>, vector<2x32xf32>, vector<2x32xf32>, vector<2x32xf32>, vector<2x32xf32>, vector<2x32xf32>, vector<2x32xf32>, vector<2x32xf32>, vector<2x32xf32> -> vector<2x512xf32>
    %206 = arith.truncf %205 : vector<2x512xf32> to vector<2x512xbf16>
    %c0_30 = arith.constant 0 : index
    %c0_31 = arith.constant 0 : index
    %207 = vector.load %arg4[%c0_30, %c0_31] : memref<512x64xbf16, #tpu.memory_space<vmem>>, vector<512x64xbf16>
    %cst_32 = arith.constant dense<0.000000e+00> : vector<2x64xf32>
    %208 = tpu.matmul %206, %207, %cst_32 {dimension_numbers = #tpu.dot_dimension_numbers<[1], [0], [0], [1], [0, 0, 1, 1], [], []>} : vector<2x512xbf16>, vector<512x64xbf16>, vector<2x64xf32> -> vector<2x64xf32>
    %c0_33 = arith.constant 0 : index
    %c0_34 = arith.constant 0 : index
    %209 = vector.load %arg5[%c0_33, %c0_34] : memref<1x64xf32, #tpu.memory_space<vmem>>, vector<1x64xf32>
    %210 = vector.broadcast %209 : vector<1x64xf32> to vector<2x64xf32>
    %211 = arith.addf %208, %210 : vector<2x64xf32>
    %cst_35 = arith.constant 0.000000e+00 : f32
    %212 = vector.broadcast %cst_35 : f32 to vector<2x64xf32>
    %213 = arith.maximumf %211, %212 : vector<2x64xf32>
    %214 = vector.extract_strided_slice %8 {offsets = [0, 20, 0], sizes = [2, 1, 32], strides = [1, 1, 1]} : vector<2x64x32xf32> to vector<2x1x32xf32>
    %215 = vector.shape_cast %214 : vector<2x1x32xf32> to vector<2x32xf32>
    %216 = vector.extract_strided_slice %8 {offsets = [0, 21, 0], sizes = [2, 1, 32], strides = [1, 1, 1]} : vector<2x64x32xf32> to vector<2x1x32xf32>
    %217 = vector.shape_cast %216 : vector<2x1x32xf32> to vector<2x32xf32>
    %218 = vector.extract_strided_slice %8 {offsets = [0, 22, 0], sizes = [2, 1, 32], strides = [1, 1, 1]} : vector<2x64x32xf32> to vector<2x1x32xf32>
    %219 = vector.shape_cast %218 : vector<2x1x32xf32> to vector<2x32xf32>
    %220 = vector.extract_strided_slice %8 {offsets = [0, 23, 0], sizes = [2, 1, 32], strides = [1, 1, 1]} : vector<2x64x32xf32> to vector<2x1x32xf32>
    %221 = vector.shape_cast %220 : vector<2x1x32xf32> to vector<2x32xf32>
    %222 = vector.extract_strided_slice %8 {offsets = [0, 28, 0], sizes = [2, 1, 32], strides = [1, 1, 1]} : vector<2x64x32xf32> to vector<2x1x32xf32>
    %223 = vector.shape_cast %222 : vector<2x1x32xf32> to vector<2x32xf32>
    %224 = vector.extract_strided_slice %8 {offsets = [0, 29, 0], sizes = [2, 1, 32], strides = [1, 1, 1]} : vector<2x64x32xf32> to vector<2x1x32xf32>
    %225 = vector.shape_cast %224 : vector<2x1x32xf32> to vector<2x32xf32>
    %226 = vector.extract_strided_slice %8 {offsets = [0, 30, 0], sizes = [2, 1, 32], strides = [1, 1, 1]} : vector<2x64x32xf32> to vector<2x1x32xf32>
    %227 = vector.shape_cast %226 : vector<2x1x32xf32> to vector<2x32xf32>
    %228 = vector.extract_strided_slice %8 {offsets = [0, 31, 0], sizes = [2, 1, 32], strides = [1, 1, 1]} : vector<2x64x32xf32> to vector<2x1x32xf32>
    %229 = vector.shape_cast %228 : vector<2x1x32xf32> to vector<2x32xf32>
    %230 = vector.extract_strided_slice %8 {offsets = [0, 36, 0], sizes = [2, 1, 32], strides = [1, 1, 1]} : vector<2x64x32xf32> to vector<2x1x32xf32>
    %231 = vector.shape_cast %230 : vector<2x1x32xf32> to vector<2x32xf32>
    %232 = vector.extract_strided_slice %8 {offsets = [0, 37, 0], sizes = [2, 1, 32], strides = [1, 1, 1]} : vector<2x64x32xf32> to vector<2x1x32xf32>
    %233 = vector.shape_cast %232 : vector<2x1x32xf32> to vector<2x32xf32>
    %234 = vector.extract_strided_slice %8 {offsets = [0, 38, 0], sizes = [2, 1, 32], strides = [1, 1, 1]} : vector<2x64x32xf32> to vector<2x1x32xf32>
    %235 = vector.shape_cast %234 : vector<2x1x32xf32> to vector<2x32xf32>
    %236 = vector.extract_strided_slice %8 {offsets = [0, 39, 0], sizes = [2, 1, 32], strides = [1, 1, 1]} : vector<2x64x32xf32> to vector<2x1x32xf32>
    %237 = vector.shape_cast %236 : vector<2x1x32xf32> to vector<2x32xf32>
    %238 = vector.extract_strided_slice %8 {offsets = [0, 44, 0], sizes = [2, 1, 32], strides = [1, 1, 1]} : vector<2x64x32xf32> to vector<2x1x32xf32>
    %239 = vector.shape_cast %238 : vector<2x1x32xf32> to vector<2x32xf32>
    %240 = vector.extract_strided_slice %8 {offsets = [0, 45, 0], sizes = [2, 1, 32], strides = [1, 1, 1]} : vector<2x64x32xf32> to vector<2x1x32xf32>
    %241 = vector.shape_cast %240 : vector<2x1x32xf32> to vector<2x32xf32>
    %242 = vector.extract_strided_slice %8 {offsets = [0, 46, 0], sizes = [2, 1, 32], strides = [1, 1, 1]} : vector<2x64x32xf32> to vector<2x1x32xf32>
    %243 = vector.shape_cast %242 : vector<2x1x32xf32> to vector<2x32xf32>
    %244 = vector.extract_strided_slice %8 {offsets = [0, 47, 0], sizes = [2, 1, 32], strides = [1, 1, 1]} : vector<2x64x32xf32> to vector<2x1x32xf32>
    %245 = vector.shape_cast %244 : vector<2x1x32xf32> to vector<2x32xf32>
    %246 = tpu.concatenate %215, %217, %219, %221, %223, %225, %227, %229, %231, %233, %235, %237, %239, %241, %243, %245 in 1 : vector<2x32xf32>, vector<2x32xf32>, vector<2x32xf32>, vector<2x32xf32>, vector<2x32xf32>, vector<2x32xf32>, vector<2x32xf32>, vector<2x32xf32>, vector<2x32xf32>, vector<2x32xf32>, vector<2x32xf32>, vector<2x32xf32>, vector<2x32xf32>, vector<2x32xf32>, vector<2x32xf32>, vector<2x32xf32> -> vector<2x512xf32>
    %247 = arith.truncf %246 : vector<2x512xf32> to vector<2x512xbf16>
    %c0_36 = arith.constant 0 : index
    %c0_37 = arith.constant 0 : index
    %248 = vector.load %arg4[%c0_36, %c0_37] : memref<512x64xbf16, #tpu.memory_space<vmem>>, vector<512x64xbf16>
    %cst_38 = arith.constant dense<0.000000e+00> : vector<2x64xf32>
    %249 = tpu.matmul %247, %248, %cst_38 {dimension_numbers = #tpu.dot_dimension_numbers<[1], [0], [0], [1], [0, 0, 1, 1], [], []>} : vector<2x512xbf16>, vector<512x64xbf16>, vector<2x64xf32> -> vector<2x64xf32>
    %c0_39 = arith.constant 0 : index
    %c0_40 = arith.constant 0 : index
    %250 = vector.load %arg5[%c0_39, %c0_40] : memref<1x64xf32, #tpu.memory_space<vmem>>, vector<1x64xf32>
    %251 = vector.broadcast %250 : vector<1x64xf32> to vector<2x64xf32>
    %252 = arith.addf %249, %251 : vector<2x64xf32>
    %cst_41 = arith.constant 0.000000e+00 : f32
    %253 = vector.broadcast %cst_41 : f32 to vector<2x64xf32>
    %254 = arith.maximumf %252, %253 : vector<2x64xf32>
    %255 = vector.extract_strided_slice %8 {offsets = [0, 32, 0], sizes = [2, 1, 32], strides = [1, 1, 1]} : vector<2x64x32xf32> to vector<2x1x32xf32>
    %256 = vector.shape_cast %255 : vector<2x1x32xf32> to vector<2x32xf32>
    %257 = vector.extract_strided_slice %8 {offsets = [0, 33, 0], sizes = [2, 1, 32], strides = [1, 1, 1]} : vector<2x64x32xf32> to vector<2x1x32xf32>
    %258 = vector.shape_cast %257 : vector<2x1x32xf32> to vector<2x32xf32>
    %259 = vector.extract_strided_slice %8 {offsets = [0, 34, 0], sizes = [2, 1, 32], strides = [1, 1, 1]} : vector<2x64x32xf32> to vector<2x1x32xf32>
    %260 = vector.shape_cast %259 : vector<2x1x32xf32> to vector<2x32xf32>
    %261 = vector.extract_strided_slice %8 {offsets = [0, 35, 0], sizes = [2, 1, 32], strides = [1, 1, 1]} : vector<2x64x32xf32> to vector<2x1x32xf32>
    %262 = vector.shape_cast %261 : vector<2x1x32xf32> to vector<2x32xf32>
    %263 = vector.extract_strided_slice %8 {offsets = [0, 40, 0], sizes = [2, 1, 32], strides = [1, 1, 1]} : vector<2x64x32xf32> to vector<2x1x32xf32>
    %264 = vector.shape_cast %263 : vector<2x1x32xf32> to vector<2x32xf32>
    %265 = vector.extract_strided_slice %8 {offsets = [0, 41, 0], sizes = [2, 1, 32], strides = [1, 1, 1]} : vector<2x64x32xf32> to vector<2x1x32xf32>
    %266 = vector.shape_cast %265 : vector<2x1x32xf32> to vector<2x32xf32>
    %267 = vector.extract_strided_slice %8 {offsets = [0, 42, 0], sizes = [2, 1, 32], strides = [1, 1, 1]} : vector<2x64x32xf32> to vector<2x1x32xf32>
    %268 = vector.shape_cast %267 : vector<2x1x32xf32> to vector<2x32xf32>
    %269 = vector.extract_strided_slice %8 {offsets = [0, 43, 0], sizes = [2, 1, 32], strides = [1, 1, 1]} : vector<2x64x32xf32> to vector<2x1x32xf32>
    %270 = vector.shape_cast %269 : vector<2x1x32xf32> to vector<2x32xf32>
    %271 = vector.extract_strided_slice %8 {offsets = [0, 48, 0], sizes = [2, 1, 32], strides = [1, 1, 1]} : vector<2x64x32xf32> to vector<2x1x32xf32>
    %272 = vector.shape_cast %271 : vector<2x1x32xf32> to vector<2x32xf32>
    %273 = vector.extract_strided_slice %8 {offsets = [0, 49, 0], sizes = [2, 1, 32], strides = [1, 1, 1]} : vector<2x64x32xf32> to vector<2x1x32xf32>
    %274 = vector.shape_cast %273 : vector<2x1x32xf32> to vector<2x32xf32>
    %275 = vector.extract_strided_slice %8 {offsets = [0, 50, 0], sizes = [2, 1, 32], strides = [1, 1, 1]} : vector<2x64x32xf32> to vector<2x1x32xf32>
    %276 = vector.shape_cast %275 : vector<2x1x32xf32> to vector<2x32xf32>
    %277 = vector.extract_strided_slice %8 {offsets = [0, 51, 0], sizes = [2, 1, 32], strides = [1, 1, 1]} : vector<2x64x32xf32> to vector<2x1x32xf32>
    %278 = vector.shape_cast %277 : vector<2x1x32xf32> to vector<2x32xf32>
    %279 = vector.extract_strided_slice %8 {offsets = [0, 56, 0], sizes = [2, 1, 32], strides = [1, 1, 1]} : vector<2x64x32xf32> to vector<2x1x32xf32>
    %280 = vector.shape_cast %279 : vector<2x1x32xf32> to vector<2x32xf32>
    %281 = vector.extract_strided_slice %8 {offsets = [0, 57, 0], sizes = [2, 1, 32], strides = [1, 1, 1]} : vector<2x64x32xf32> to vector<2x1x32xf32>
    %282 = vector.shape_cast %281 : vector<2x1x32xf32> to vector<2x32xf32>
    %283 = vector.extract_strided_slice %8 {offsets = [0, 58, 0], sizes = [2, 1, 32], strides = [1, 1, 1]} : vector<2x64x32xf32> to vector<2x1x32xf32>
    %284 = vector.shape_cast %283 : vector<2x1x32xf32> to vector<2x32xf32>
    %285 = vector.extract_strided_slice %8 {offsets = [0, 59, 0], sizes = [2, 1, 32], strides = [1, 1, 1]} : vector<2x64x32xf32> to vector<2x1x32xf32>
    %286 = vector.shape_cast %285 : vector<2x1x32xf32> to vector<2x32xf32>
    %287 = tpu.concatenate %256, %258, %260, %262, %264, %266, %268, %270, %272, %274, %276, %278, %280, %282, %284, %286 in 1 : vector<2x32xf32>, vector<2x32xf32>, vector<2x32xf32>, vector<2x32xf32>, vector<2x32xf32>, vector<2x32xf32>, vector<2x32xf32>, vector<2x32xf32>, vector<2x32xf32>, vector<2x32xf32>, vector<2x32xf32>, vector<2x32xf32>, vector<2x32xf32>, vector<2x32xf32>, vector<2x32xf32>, vector<2x32xf32> -> vector<2x512xf32>
    %288 = arith.truncf %287 : vector<2x512xf32> to vector<2x512xbf16>
    %c0_42 = arith.constant 0 : index
    %c0_43 = arith.constant 0 : index
    %289 = vector.load %arg4[%c0_42, %c0_43] : memref<512x64xbf16, #tpu.memory_space<vmem>>, vector<512x64xbf16>
    %cst_44 = arith.constant dense<0.000000e+00> : vector<2x64xf32>
    %290 = tpu.matmul %288, %289, %cst_44 {dimension_numbers = #tpu.dot_dimension_numbers<[1], [0], [0], [1], [0, 0, 1, 1], [], []>} : vector<2x512xbf16>, vector<512x64xbf16>, vector<2x64xf32> -> vector<2x64xf32>
    %c0_45 = arith.constant 0 : index
    %c0_46 = arith.constant 0 : index
    %291 = vector.load %arg5[%c0_45, %c0_46] : memref<1x64xf32, #tpu.memory_space<vmem>>, vector<1x64xf32>
    %292 = vector.broadcast %291 : vector<1x64xf32> to vector<2x64xf32>
    %293 = arith.addf %290, %292 : vector<2x64xf32>
    %cst_47 = arith.constant 0.000000e+00 : f32
    %294 = vector.broadcast %cst_47 : f32 to vector<2x64xf32>
    %295 = arith.maximumf %293, %294 : vector<2x64xf32>
    %296 = vector.extract_strided_slice %8 {offsets = [0, 34, 0], sizes = [2, 1, 32], strides = [1, 1, 1]} : vector<2x64x32xf32> to vector<2x1x32xf32>
    %297 = vector.shape_cast %296 : vector<2x1x32xf32> to vector<2x32xf32>
    %298 = vector.extract_strided_slice %8 {offsets = [0, 35, 0], sizes = [2, 1, 32], strides = [1, 1, 1]} : vector<2x64x32xf32> to vector<2x1x32xf32>
    %299 = vector.shape_cast %298 : vector<2x1x32xf32> to vector<2x32xf32>
    %300 = vector.extract_strided_slice %8 {offsets = [0, 36, 0], sizes = [2, 1, 32], strides = [1, 1, 1]} : vector<2x64x32xf32> to vector<2x1x32xf32>
    %301 = vector.shape_cast %300 : vector<2x1x32xf32> to vector<2x32xf32>
    %302 = vector.extract_strided_slice %8 {offsets = [0, 37, 0], sizes = [2, 1, 32], strides = [1, 1, 1]} : vector<2x64x32xf32> to vector<2x1x32xf32>
    %303 = vector.shape_cast %302 : vector<2x1x32xf32> to vector<2x32xf32>
    %304 = vector.extract_strided_slice %8 {offsets = [0, 42, 0], sizes = [2, 1, 32], strides = [1, 1, 1]} : vector<2x64x32xf32> to vector<2x1x32xf32>
    %305 = vector.shape_cast %304 : vector<2x1x32xf32> to vector<2x32xf32>
    %306 = vector.extract_strided_slice %8 {offsets = [0, 43, 0], sizes = [2, 1, 32], strides = [1, 1, 1]} : vector<2x64x32xf32> to vector<2x1x32xf32>
    %307 = vector.shape_cast %306 : vector<2x1x32xf32> to vector<2x32xf32>
    %308 = vector.extract_strided_slice %8 {offsets = [0, 44, 0], sizes = [2, 1, 32], strides = [1, 1, 1]} : vector<2x64x32xf32> to vector<2x1x32xf32>
    %309 = vector.shape_cast %308 : vector<2x1x32xf32> to vector<2x32xf32>
    %310 = vector.extract_strided_slice %8 {offsets = [0, 45, 0], sizes = [2, 1, 32], strides = [1, 1, 1]} : vector<2x64x32xf32> to vector<2x1x32xf32>
    %311 = vector.shape_cast %310 : vector<2x1x32xf32> to vector<2x32xf32>
    %312 = vector.extract_strided_slice %8 {offsets = [0, 50, 0], sizes = [2, 1, 32], strides = [1, 1, 1]} : vector<2x64x32xf32> to vector<2x1x32xf32>
    %313 = vector.shape_cast %312 : vector<2x1x32xf32> to vector<2x32xf32>
    %314 = vector.extract_strided_slice %8 {offsets = [0, 51, 0], sizes = [2, 1, 32], strides = [1, 1, 1]} : vector<2x64x32xf32> to vector<2x1x32xf32>
    %315 = vector.shape_cast %314 : vector<2x1x32xf32> to vector<2x32xf32>
    %316 = vector.extract_strided_slice %8 {offsets = [0, 52, 0], sizes = [2, 1, 32], strides = [1, 1, 1]} : vector<2x64x32xf32> to vector<2x1x32xf32>
    %317 = vector.shape_cast %316 : vector<2x1x32xf32> to vector<2x32xf32>
    %318 = vector.extract_strided_slice %8 {offsets = [0, 53, 0], sizes = [2, 1, 32], strides = [1, 1, 1]} : vector<2x64x32xf32> to vector<2x1x32xf32>
    %319 = vector.shape_cast %318 : vector<2x1x32xf32> to vector<2x32xf32>
    %320 = vector.extract_strided_slice %8 {offsets = [0, 58, 0], sizes = [2, 1, 32], strides = [1, 1, 1]} : vector<2x64x32xf32> to vector<2x1x32xf32>
    %321 = vector.shape_cast %320 : vector<2x1x32xf32> to vector<2x32xf32>
    %322 = vector.extract_strided_slice %8 {offsets = [0, 59, 0], sizes = [2, 1, 32], strides = [1, 1, 1]} : vector<2x64x32xf32> to vector<2x1x32xf32>
    %323 = vector.shape_cast %322 : vector<2x1x32xf32> to vector<2x32xf32>
    %324 = vector.extract_strided_slice %8 {offsets = [0, 60, 0], sizes = [2, 1, 32], strides = [1, 1, 1]} : vector<2x64x32xf32> to vector<2x1x32xf32>
    %325 = vector.shape_cast %324 : vector<2x1x32xf32> to vector<2x32xf32>
    %326 = vector.extract_strided_slice %8 {offsets = [0, 61, 0], sizes = [2, 1, 32], strides = [1, 1, 1]} : vector<2x64x32xf32> to vector<2x1x32xf32>
    %327 = vector.shape_cast %326 : vector<2x1x32xf32> to vector<2x32xf32>
    %328 = tpu.concatenate %297, %299, %301, %303, %305, %307, %309, %311, %313, %315, %317, %319, %321, %323, %325, %327 in 1 : vector<2x32xf32>, vector<2x32xf32>, vector<2x32xf32>, vector<2x32xf32>, vector<2x32xf32>, vector<2x32xf32>, vector<2x32xf32>, vector<2x32xf32>, vector<2x32xf32>, vector<2x32xf32>, vector<2x32xf32>, vector<2x32xf32>, vector<2x32xf32>, vector<2x32xf32>, vector<2x32xf32>, vector<2x32xf32> -> vector<2x512xf32>
    %329 = arith.truncf %328 : vector<2x512xf32> to vector<2x512xbf16>
    %c0_48 = arith.constant 0 : index
    %c0_49 = arith.constant 0 : index
    %330 = vector.load %arg4[%c0_48, %c0_49] : memref<512x64xbf16, #tpu.memory_space<vmem>>, vector<512x64xbf16>
    %cst_50 = arith.constant dense<0.000000e+00> : vector<2x64xf32>
    %331 = tpu.matmul %329, %330, %cst_50 {dimension_numbers = #tpu.dot_dimension_numbers<[1], [0], [0], [1], [0, 0, 1, 1], [], []>} : vector<2x512xbf16>, vector<512x64xbf16>, vector<2x64xf32> -> vector<2x64xf32>
    %c0_51 = arith.constant 0 : index
    %c0_52 = arith.constant 0 : index
    %332 = vector.load %arg5[%c0_51, %c0_52] : memref<1x64xf32, #tpu.memory_space<vmem>>, vector<1x64xf32>
    %333 = vector.broadcast %332 : vector<1x64xf32> to vector<2x64xf32>
    %334 = arith.addf %331, %333 : vector<2x64xf32>
    %cst_53 = arith.constant 0.000000e+00 : f32
    %335 = vector.broadcast %cst_53 : f32 to vector<2x64xf32>
    %336 = arith.maximumf %334, %335 : vector<2x64xf32>
    %337 = vector.extract_strided_slice %8 {offsets = [0, 36, 0], sizes = [2, 1, 32], strides = [1, 1, 1]} : vector<2x64x32xf32> to vector<2x1x32xf32>
    %338 = vector.shape_cast %337 : vector<2x1x32xf32> to vector<2x32xf32>
    %339 = vector.extract_strided_slice %8 {offsets = [0, 37, 0], sizes = [2, 1, 32], strides = [1, 1, 1]} : vector<2x64x32xf32> to vector<2x1x32xf32>
    %340 = vector.shape_cast %339 : vector<2x1x32xf32> to vector<2x32xf32>
    %341 = vector.extract_strided_slice %8 {offsets = [0, 38, 0], sizes = [2, 1, 32], strides = [1, 1, 1]} : vector<2x64x32xf32> to vector<2x1x32xf32>
    %342 = vector.shape_cast %341 : vector<2x1x32xf32> to vector<2x32xf32>
    %343 = vector.extract_strided_slice %8 {offsets = [0, 39, 0], sizes = [2, 1, 32], strides = [1, 1, 1]} : vector<2x64x32xf32> to vector<2x1x32xf32>
    %344 = vector.shape_cast %343 : vector<2x1x32xf32> to vector<2x32xf32>
    %345 = vector.extract_strided_slice %8 {offsets = [0, 44, 0], sizes = [2, 1, 32], strides = [1, 1, 1]} : vector<2x64x32xf32> to vector<2x1x32xf32>
    %346 = vector.shape_cast %345 : vector<2x1x32xf32> to vector<2x32xf32>
    %347 = vector.extract_strided_slice %8 {offsets = [0, 45, 0], sizes = [2, 1, 32], strides = [1, 1, 1]} : vector<2x64x32xf32> to vector<2x1x32xf32>
    %348 = vector.shape_cast %347 : vector<2x1x32xf32> to vector<2x32xf32>
    %349 = vector.extract_strided_slice %8 {offsets = [0, 46, 0], sizes = [2, 1, 32], strides = [1, 1, 1]} : vector<2x64x32xf32> to vector<2x1x32xf32>
    %350 = vector.shape_cast %349 : vector<2x1x32xf32> to vector<2x32xf32>
    %351 = vector.extract_strided_slice %8 {offsets = [0, 47, 0], sizes = [2, 1, 32], strides = [1, 1, 1]} : vector<2x64x32xf32> to vector<2x1x32xf32>
    %352 = vector.shape_cast %351 : vector<2x1x32xf32> to vector<2x32xf32>
    %353 = vector.extract_strided_slice %8 {offsets = [0, 52, 0], sizes = [2, 1, 32], strides = [1, 1, 1]} : vector<2x64x32xf32> to vector<2x1x32xf32>
    %354 = vector.shape_cast %353 : vector<2x1x32xf32> to vector<2x32xf32>
    %355 = vector.extract_strided_slice %8 {offsets = [0, 53, 0], sizes = [2, 1, 32], strides = [1, 1, 1]} : vector<2x64x32xf32> to vector<2x1x32xf32>
    %356 = vector.shape_cast %355 : vector<2x1x32xf32> to vector<2x32xf32>
    %357 = vector.extract_strided_slice %8 {offsets = [0, 54, 0], sizes = [2, 1, 32], strides = [1, 1, 1]} : vector<2x64x32xf32> to vector<2x1x32xf32>
    %358 = vector.shape_cast %357 : vector<2x1x32xf32> to vector<2x32xf32>
    %359 = vector.extract_strided_slice %8 {offsets = [0, 55, 0], sizes = [2, 1, 32], strides = [1, 1, 1]} : vector<2x64x32xf32> to vector<2x1x32xf32>
    %360 = vector.shape_cast %359 : vector<2x1x32xf32> to vector<2x32xf32>
    %361 = vector.extract_strided_slice %8 {offsets = [0, 60, 0], sizes = [2, 1, 32], strides = [1, 1, 1]} : vector<2x64x32xf32> to vector<2x1x32xf32>
    %362 = vector.shape_cast %361 : vector<2x1x32xf32> to vector<2x32xf32>
    %363 = vector.extract_strided_slice %8 {offsets = [0, 61, 0], sizes = [2, 1, 32], strides = [1, 1, 1]} : vector<2x64x32xf32> to vector<2x1x32xf32>
    %364 = vector.shape_cast %363 : vector<2x1x32xf32> to vector<2x32xf32>
    %365 = vector.extract_strided_slice %8 {offsets = [0, 62, 0], sizes = [2, 1, 32], strides = [1, 1, 1]} : vector<2x64x32xf32> to vector<2x1x32xf32>
    %366 = vector.shape_cast %365 : vector<2x1x32xf32> to vector<2x32xf32>
    %367 = vector.extract_strided_slice %8 {offsets = [0, 63, 0], sizes = [2, 1, 32], strides = [1, 1, 1]} : vector<2x64x32xf32> to vector<2x1x32xf32>
    %368 = vector.shape_cast %367 : vector<2x1x32xf32> to vector<2x32xf32>
    %369 = tpu.concatenate %338, %340, %342, %344, %346, %348, %350, %352, %354, %356, %358, %360, %362, %364, %366, %368 in 1 : vector<2x32xf32>, vector<2x32xf32>, vector<2x32xf32>, vector<2x32xf32>, vector<2x32xf32>, vector<2x32xf32>, vector<2x32xf32>, vector<2x32xf32>, vector<2x32xf32>, vector<2x32xf32>, vector<2x32xf32>, vector<2x32xf32>, vector<2x32xf32>, vector<2x32xf32>, vector<2x32xf32>, vector<2x32xf32> -> vector<2x512xf32>
    %370 = arith.truncf %369 : vector<2x512xf32> to vector<2x512xbf16>
    %c0_54 = arith.constant 0 : index
    %c0_55 = arith.constant 0 : index
    %371 = vector.load %arg4[%c0_54, %c0_55] : memref<512x64xbf16, #tpu.memory_space<vmem>>, vector<512x64xbf16>
    %cst_56 = arith.constant dense<0.000000e+00> : vector<2x64xf32>
    %372 = tpu.matmul %370, %371, %cst_56 {dimension_numbers = #tpu.dot_dimension_numbers<[1], [0], [0], [1], [0, 0, 1, 1], [], []>} : vector<2x512xbf16>, vector<512x64xbf16>, vector<2x64xf32> -> vector<2x64xf32>
    %c0_57 = arith.constant 0 : index
    %c0_58 = arith.constant 0 : index
    %373 = vector.load %arg5[%c0_57, %c0_58] : memref<1x64xf32, #tpu.memory_space<vmem>>, vector<1x64xf32>
    %374 = vector.broadcast %373 : vector<1x64xf32> to vector<2x64xf32>
    %375 = arith.addf %372, %374 : vector<2x64xf32>
    %cst_59 = arith.constant 0.000000e+00 : f32
    %376 = vector.broadcast %cst_59 : f32 to vector<2x64xf32>
    %377 = arith.maximumf %375, %376 : vector<2x64xf32>
    %cst_60 = arith.constant 0.000000e+00 : f32
    %378 = vector.broadcast %cst_60 : f32 to vector<2x512xf32>
    %379 = tpu.concatenate %49, %90, %131, %172, %213, %254, %295, %336, %377 in 1 : vector<2x64xf32>, vector<2x64xf32>, vector<2x64xf32>, vector<2x64xf32>, vector<2x64xf32>, vector<2x64xf32>, vector<2x64xf32>, vector<2x64xf32>, vector<2x64xf32> -> vector<2x576xf32>
    %380 = arith.truncf %379 : vector<2x576xf32> to vector<2x576xbf16>
    %c0_61 = arith.constant 0 : index
    %c0_62 = arith.constant 0 : index
    %381 = vector.load %arg6[%c0_61, %c0_62] : memref<576x64xbf16, #tpu.memory_space<vmem>>, vector<576x64xbf16>
    %cst_63 = arith.constant dense<0.000000e+00> : vector<2x64xf32>
    %382 = tpu.matmul %380, %381, %cst_63 {dimension_numbers = #tpu.dot_dimension_numbers<[1], [0], [0], [1], [0, 0, 1, 1], [], []>} : vector<2x576xbf16>, vector<576x64xbf16>, vector<2x64xf32> -> vector<2x64xf32>
    %c0_64 = arith.constant 0 : index
    %c0_65 = arith.constant 0 : index
    %383 = vector.load %arg7[%c0_64, %c0_65] : memref<1x64xf32, #tpu.memory_space<vmem>>, vector<1x64xf32>
    %384 = vector.broadcast %383 : vector<1x64xf32> to vector<2x64xf32>
    %385 = arith.addf %382, %384 : vector<2x64xf32>
    %cst_66 = arith.constant 0.000000e+00 : f32
    %386 = vector.broadcast %cst_66 : f32 to vector<2x64xf32>
    %387 = arith.maximumf %385, %386 : vector<2x64xf32>
    %388 = arith.truncf %387 : vector<2x64xf32> to vector<2x64xbf16>
    %c0_67 = arith.constant 0 : index
    %c0_68 = arith.constant 0 : index
    %c0_69 = arith.constant 0 : index
    %389 = vector.load %arg8[%c0_67, %c0_68, %c0_69] : memref<1x64x512xbf16, #tpu.memory_space<vmem>>, vector<1x64x512xbf16>
    %390 = vector.shape_cast %389 : vector<1x64x512xbf16> to vector<64x512xbf16>
    %cst_70 = arith.constant dense<0.000000e+00> : vector<2x512xf32>
    %391 = tpu.matmul %388, %390, %cst_70 {dimension_numbers = #tpu.dot_dimension_numbers<[1], [0], [0], [1], [0, 0, 1, 1], [], []>} : vector<2x64xbf16>, vector<64x512xbf16>, vector<2x512xf32> -> vector<2x512xf32>
    %392 = arith.addf %378, %391 : vector<2x512xf32>
    %c0_71 = arith.constant 0 : index
    %c0_72 = arith.constant 0 : index
    %393 = vector.load %arg9[%c0_71, %c0_72] : memref<1x512xf32, #tpu.memory_space<vmem>>, vector<1x512xf32>
    %394 = vector.broadcast %393 : vector<1x512xf32> to vector<2x512xf32>
    %395 = arith.addf %392, %394 : vector<2x512xf32>
    %cst_73 = arith.constant 0.000000e+00 : f32
    %396 = vector.broadcast %cst_73 : f32 to vector<2x512xf32>
    %397 = arith.maximumf %395, %396 : vector<2x512xf32>
    %398 = arith.truncf %397 : vector<2x512xf32> to vector<2x512xbf16>
    %c0_74 = arith.constant 0 : index
    %c0_75 = arith.constant 0 : index
    %399 = vector.load %arg10[%c0_74, %c0_75] : memref<512x256xbf16, #tpu.memory_space<vmem>>, vector<512x256xbf16>
    %cst_76 = arith.constant dense<0.000000e+00> : vector<2x256xf32>
    %400 = tpu.matmul %398, %399, %cst_76 {dimension_numbers = #tpu.dot_dimension_numbers<[1], [0], [0], [1], [0, 0, 1, 1], [], []>} : vector<2x512xbf16>, vector<512x256xbf16>, vector<2x256xf32> -> vector<2x256xf32>
    %c0_77 = arith.constant 0 : index
    %c0_78 = arith.constant 0 : index
    %401 = vector.load %arg11[%c0_77, %c0_78] : memref<1x256xf32, #tpu.memory_space<vmem>>, vector<1x256xf32>
    %402 = vector.broadcast %401 : vector<1x256xf32> to vector<2x256xf32>
    %403 = arith.addf %400, %402 : vector<2x256xf32>
    %c0_79 = arith.constant 0 : index
    %c0_80 = arith.constant 0 : index
    %404 = vector.load %arg12[%c0_79, %c0_80] : memref<2x256xf32, #tpu.memory_space<vmem>>, vector<2x256xf32>
    tpu.vector_store %arg12[%c0_79, %c0_80], %403 {strides = array<i32>} : memref<2x256xf32, #tpu.memory_space<vmem>>, vector<2x256xf32>,
    return
  }
  func.func @transform_0(%arg0: i32) -> (i32, i32) {
    %c0_i32 = arith.constant 0 : i32
    %c0_i32_0 = arith.constant 0 : i32
    return %arg0, %c0_i32 : i32, i32
  }
  func.func @transform_1(%arg0: i32) -> (i32, i32) {
    %c0_i32 = arith.constant 0 : i32
    %c0_i32_0 = arith.constant 0 : i32
    %c0_i32_1 = arith.constant 0 : i32
    return %c0_i32, %c0_i32_0 : i32, i32
  }
  func.func @transform_2(%arg0: i32) -> (i32, i32) {
    %c0_i32 = arith.constant 0 : i32
    %c0_i32_0 = arith.constant 0 : i32
    %c0_i32_1 = arith.constant 0 : i32
    return %c0_i32, %c0_i32_0 : i32, i32
  }
  func.func @transform_3(%arg0: i32) -> (i32, i32) {
    %c0_i32 = arith.constant 0 : i32
    %c0_i32_0 = arith.constant 0 : i32
    %c0_i32_1 = arith.constant 0 : i32
    return %c0_i32, %c0_i32_0 : i32, i32
  }
  func.func @transform_4(%arg0: i32) -> (i32, i32) {
    %c0_i32 = arith.constant 0 : i32
    %c0_i32_0 = arith.constant 0 : i32
    %c0_i32_1 = arith.constant 0 : i32
    return %c0_i32, %c0_i32_0 : i32, i32
  }
  func.func @transform_5(%arg0: i32) -> (i32, i32) {
    %c0_i32 = arith.constant 0 : i32
    %c0_i32_0 = arith.constant 0 : i32
    %c0_i32_1 = arith.constant 0 : i32
    return %c0_i32, %c0_i32_0 : i32, i32
  }
  func.func @transform_6(%arg0: i32) -> (i32, i32) {
    %c0_i32 = arith.constant 0 : i32
    %c0_i32_0 = arith.constant 0 : i32
    %c0_i32_1 = arith.constant 0 : i32
    return %c0_i32, %c0_i32_0 : i32, i32
  }
  func.func @transform_7(%arg0: i32) -> (i32, i32, i32) {
    %c0_i32 = arith.constant 0 : i32
    %c0_i32_0 = arith.constant 0 : i32
    %c0_i32_1 = arith.constant 0 : i32
    %c0_i32_2 = arith.constant 0 : i32
    return %c0_i32, %c0_i32_0, %c0_i32_1 : i32, i32, i32
  }
  func.func @transform_8(%arg0: i32) -> (i32, i32) {
    %c0_i32 = arith.constant 0 : i32
    %c0_i32_0 = arith.constant 0 : i32
    %c0_i32_1 = arith.constant 0 : i32
    return %c0_i32, %c0_i32_0 : i32, i32
  }
  func.func @transform_9(%arg0: i32) -> (i32, i32) {
    %c0_i32 = arith.constant 0 : i32
    %c0_i32_0 = arith.constant 0 : i32
    %c0_i32_1 = arith.constant 0 : i32
    return %c0_i32, %c0_i32_0 : i32, i32
  }
  func.func @transform_10(%arg0: i32) -> (i32, i32) {
    %c0_i32 = arith.constant 0 : i32
    %c0_i32_0 = arith.constant 0 : i32
    %c0_i32_1 = arith.constant 0 : i32
    return %c0_i32, %c0_i32_0 : i32, i32
  }
  func.func @transform_11(%arg0: i32) -> (i32, i32) {
    %c0_i32 = arith.constant 0 : i32
    %c0_i32_0 = arith.constant 0 : i32
    return %arg0, %c0_i32 : i32, i32
  }
}

</mosaic_0001>

<bundles_post_ra>
// kernel: dqn_forward.1
= control target key start
LH: loop header
LB: loop body
LE: loop exit
PB: predicated region body
PF: predicated region fallthrough
CT: control target
= control target key end

     0   :  { %s6233_s0 = inlined_call_operand.vmem [shape: bf16[128,256], index: 0, kind: input, shape index: {}]   ;;  %s6234_s1 = inlined_call_operand.vmem [shape: bf16[256,32], index: 1, kind: input, shape index: {}]   ;;  %s6235_s2 = inlined_call_operand.vmem [shape: f32[1,32], index: 2, kind: input, shape index: {}]   ;;  %s6236_s3 = inlined_call_operand.vmem [shape: bf16[512,64], index: 3, kind: input, shape index: {}]   ;;  %s6237_s4 = inlined_call_operand.vmem [shape: f32[1,64], index: 4, kind: input, shape index: {}]   ;;  %s6238_s5 = inlined_call_operand.vmem [shape: bf16[576,64], index: 5, kind: input, shape index: {}]   ;;  %s6239_s6 = inlined_call_operand.vmem [shape: f32[1,64], index: 6, kind: input, shape index: {}]   ;;  %s6240_s7 = inlined_call_operand.vmem [shape: bf16[1,64,512], index: 7, kind: input, shape index: {}]   ;;  %s6241_s8 = inlined_call_operand.vmem [shape: f32[1,512], index: 8, kind: input, shape index: {}]   ;;  %s6242_s9 = inlined_call_operand.vmem [shape: bf16[512,256], index: 9, kind: input, shape index: {}]   ;;  %s6243_s10 = inlined_call_operand.vmem [shape: f32[1,256], index: 10, kind: input, shape index: {}]   ;;  %s6244_s11 = inlined_call_operand.hbm [shape: f32[2,256], index: 11, kind: output, shape index: {}]  }
   0x1   :  { %v3991_v0 = vld [vmem:[%s6234_s1 + $0x78] sm:$0xff]   ;;  %v3993_v2 = vld [vmem:[%s6234_s1 + $0x70] sm:$0xff]   ;;  %v3995_v4 = vld [vmem:[%s6234_s1 + $0x68] sm:$0xff]  }
   0x2   :  { %v3992_v1 = vld [vmem:[%s6234_s1 + $0x38] sm:$0xff]   ;;  %3273 = vmatprep.subr.bf16.mxu0 %v3991_v0  ;;  %v3994_v3 = vld [vmem:[%s6234_s1 + $0x30] sm:$0xff]   ;;  %v3996_v5 = vld [vmem:[%s6234_s1 + $0x28] sm:$0xff]  }
   0x3   :  { %3274 = vmatpush3.bf16.msra.mxu0 %v3992_v1  ;;  %v3997_v6 = vld [vmem:[%s6234_s1 + $0x60] sm:$0xff]   ;;  %v3999_v8 = vld [vmem:[%s6234_s1 + $0x58] sm:$0xff]   ;;  %v4001_v10 = vld [vmem:[%s6234_s1 + $0x50] sm:$0xff]  }
   0x4   :  { %3275 = vmatprep.subr.bf16.mxu0 %v3993_v2  ;;  %v3998_v7 = vld [vmem:[%s6234_s1 + $0x20] sm:$0xff]   ;;  %v4000_v9 = vld [vmem:[%s6234_s1 + $0x18] sm:$0xff]   ;;  %v4002_v12 = vld [vmem:[%s6234_s1 + $0x10] sm:$0xff]  }
   0x5   :  { %v4009_v11 = vld [vmem:[%s6233_s0 + $0x4] ss:$8 sps:$4 sm:$0xff]   ;;  %v4007_v17 = vld [vmem:[%s6233_s0] ss:$8 sps:$4 sm:$0xff]   ;;  %v4010_v18 = vld [vmem:[%s6233_s0 + $0x14] ss:$8 sps:$4 sm:$0xff]  }
   0x6   :  { %303 = vmatprep.mubr.bf16.mxu0 %v4009_v11  ;;  %v4003_v13 = vld [vmem:[%s6234_s1 + $0x48] sm:$0xff]   ;;  %v4005_v15 = vld [vmem:[%s6234_s1 + $0x40] sm:$0xff]   ;;  %v4012_v19 = vld [vmem:[%s6233_s0 + $0x10] ss:$8 sps:$4 sm:$0xff]  }
   0x7   :  { %3276 = vmatpush3.bf16.msra.mxu0 %v3994_v3  ;;  %v4004_v14 = vld [vmem:[%s6234_s1 + $0x8] sm:$0xff]   ;;  %v4006_v16 = vld [vmem:[%s6234_s1] sm:$0xff]   ;;  %v4016_v22 = vld [vmem:[%s6233_s0 + $0x34] ss:$8 sps:$4 sm:$0xff]  }
   0x8   :  { %3277 = vmatprep.subr.bf16.mxu0 %v3995_v4  ;;  %v4013_v20 = vld [vmem:[%s6233_s0 + $0x24] ss:$8 sps:$4 sm:$0xff]   ;;  %v4015_v21 = vld [vmem:[%s6233_s0 + $0x20] ss:$8 sps:$4 sm:$0xff]   ;;  %v4018_v23 = vld [vmem:[%s6233_s0 + $0x30] ss:$8 sps:$4 sm:$0xff]  }
   0x9   :  { %v4019_v24 = vld [vmem:[%s6233_s0 + $0x44] ss:$8 sps:$4 sm:$0xff]   ;;  %v4021_v25 = vld [vmem:[%s6233_s0 + $0x40] ss:$8 sps:$4 sm:$0xff]   ;;  %v4022_v26 = vld [vmem:[%s6233_s0 + $0x54] ss:$8 sps:$4 sm:$0xff]  }
   0xa   :  { %v4024_v27 = vld [vmem:[%s6233_s0 + $0x50] ss:$8 sps:$4 sm:$0xff]   ;;  %v4025_v28 = vld [vmem:[%s6233_s0 + $0x64] ss:$8 sps:$4 sm:$0xff]   ;;  %v4027_v29 = vld [vmem:[%s6233_s0 + $0x60] ss:$8 sps:$4 sm:$0xff]  }
   0xb   :  { %3278 = vmatpush3.bf16.msra.mxu0 %v3996_v5  ;;  %v4028_v30 = vld [vmem:[%s6233_s0 + $0x74] ss:$8 sps:$4 sm:$0xff]   ;;  %v4030_v31 = vld [vmem:[%s6233_s0 + $0x70] ss:$8 sps:$4 sm:$0xff]  }
   0xc   :  { %3279 = vmatprep.subr.bf16.mxu0 %v3997_v6 }
   0xf   :  { %3280 = vmatpush3.bf16.msra.mxu0 %v3998_v7 }
  0x10   :  { %3281 = vmatprep.subr.bf16.mxu0 %v3999_v8 }
  0x13   :  { %3282 = vmatpush3.bf16.msra.mxu0 %v4000_v9 }
  0x14   :  { %3283 = vmatprep.subr.bf16.mxu0 %v4001_v10 }
  0x17   :  { %3284 = vmatpush3.bf16.msra.mxu0 %v4002_v12 }
  0x18   :  { %3285 = vmatprep.subr.bf16.mxu0 %v4003_v13 }
  0x1b   :  { %3286 = vmatpush3.bf16.msra.mxu0 %v4004_v14 }
  0x1c   :  { %3287 = vmatprep.subr.bf16.mxu0 %v4005_v15 }
  0x1f   :  { %3288 = vmatpush3.bf16.msra.mxu0 %v4006_v16 }
  0x22   :  { %304 = vmatmul.mubr.bf16.vlgmr.msra.gmra.mxu0 %v4007_v17 }
  0x23   :  { %311 = vmatprep.mubr.bf16.mxu0 %v4010_v18 }
  0x2a   :  { %312 = vmatmul.mubr.bf16.gmra.mxu0 %v4012_v19 }
  0x2b   :  { %319 = vmatprep.mubr.bf16.mxu0 %v4013_v20 }
  0x32   :  { %320 = vmatmul.mubr.bf16.gmra.mxu0 %v4015_v21 }
  0x33   :  { %327 = vmatprep.mubr.bf16.mxu0 %v4016_v22 }
  0x3a   :  { %328 = vmatmul.mubr.bf16.gmra.mxu0 %v4018_v23 }
  0x3b   :  { %335 = vmatprep.mubr.bf16.mxu0 %v4019_v24 }
  0x42   :  { %336 = vmatmul.mubr.bf16.gmra.mxu0 %v4021_v25 }
  0x43   :  { %343 = vmatprep.mubr.bf16.mxu0 %v4022_v26 }
  0x4a   :  { %344 = vmatmul.mubr.bf16.gmra.mxu0 %v4024_v27 }
  0x4b   :  { %351 = vmatprep.mubr.bf16.mxu0 %v4025_v28 }
  0x52   :  { %352 = vmatmul.mubr.bf16.gmra.mxu0 %v4027_v29 }
  0x53   :  { %359 = vmatprep.mubr.bf16.mxu0 %v4028_v30 }
  0x5a   :  { %360 = vmatmul.mubr.bf16.gmra.mxu0 %v4030_v31 }
  0x5b   :  { %16 = vsyncpa [#allocation3], 0  ;;  %v4424_v32 = vld [vmem:[%s6236_s3 + $0x78] sm:$0xff]   ;;  %v4434_v34 = vld [vmem:[%s6236_s3 + $0x70] sm:$0xff]   ;;  %vm387_vm0 = vcmask 1041409   ;;  %vm836_vm1 = vcmask 1043459  }
  0x5c   :  { %6269 = vst [vmem:[#allocation5_spill] sm:$0xff] %v4424_v32  ;;  %v4429_v33 = vld [vmem:[%s6236_s3 + $0x38] sm:$0xff]   ;;  %6271 = vst [vmem:[#allocation7_spill] sm:$0xff] %v4434_v34  ;;  %3337 = vmatprep.subr.bf16.mxu1 %v4424_v32  ;;  %3381 = vmatprep.subr.bf16.mxu0 %v4424_v32  ;;  %v4442_v35 = vld [vmem:[%s6236_s3 + $0x30] sm:$0xff]   ;;  %vm1002_vm2 = vcmask 1045509   ;;  %s4258_s16 = smov 32  }
  0x5d   :  { %6270 = vst [vmem:[#allocation6_spill] sm:$0xff] %v4429_v33  ;;  %3338 = vmatpush3.bf16.msra.mxu1 %v4429_v33  ;;  %6272 = vst [vmem:[#allocation8_spill] sm:$0xff] %v4442_v35  ;;  %3382 = vmatpush3.bf16.msra.mxu0 %v4429_v33  ;;  %v4449_v36 = vld [vmem:[%s6236_s3 + $0x68] sm:$0xff]   ;;  %v4463_v39 = vld [vmem:[%s6236_s3 + $0x60] sm:$0xff]   ;;  %s4259_s17 = smov 96   ;;  %s4260_s18 = smov 64  }
  0x5e   :  { %3339 = vmatprep.subr.bf16.mxu1 %v4434_v34  ;;  %6273 = vst [vmem:[#allocation9_spill] sm:$0xff] %v4449_v36  ;;  %3383 = vmatprep.subr.bf16.mxu0 %v4434_v34  ;;  %v4456_v37 = vld [vmem:[%s6236_s3 + $0x28] sm:$0xff]   ;;  %6275 = vst [vmem:[#allocation11_spill] sm:$0xff] %v4463_v39  ;;  %v4470_v41 = vld [vmem:[%s6236_s3 + $0x20] sm:$0xff]   ;;  %vm473_vm3 = vcmask 261120   ;;  %vm475_vm4 = vcmask 523264  }
  0x5f   :  { %6274 = vst [vmem:[#allocation10_spill] sm:$0xff] %v4456_v37  ;;  %6276 = vst [vmem:[#allocation12_spill] sm:$0xff] %v4470_v41  ;;  %v4477_v43 = vld [vmem:[%s6236_s3 + $0x58] sm:$0xff]   ;;  %v4491_v47 = vld [vmem:[%s6236_s3 + $0x50] sm:$0xff]   ;;  %vm477_vm5 = vcmask 785408   ;;  %vm4262_vm6 = vmmov 0  }
  0x60   :  { %6277 = vst [vmem:[#allocation13_spill] sm:$0xff] %v4477_v43  ;;  %v4484_v45 = vld [vmem:[%s6236_s3 + $0x18] sm:$0xff]   ;;  %6279 = vst [vmem:[#allocation15_spill] sm:$0xff] %v4491_v47  ;;  %v4498_v49 = vld [vmem:[%s6236_s3 + $0x10] sm:$0xff]   ;;  %s4264_s24 = smov [#allocation2]  }
  0x61   :  { %3340 = vmatpush3.bf16.msra.mxu1 %v4442_v35  ;;  %3384 = vmatpush3.bf16.msra.mxu0 %v4442_v35  ;;  %6278 = vst [vmem:[#allocation14_spill] sm:$0xff] %v4484_v45  ;;  %6280 = vst [vmem:[#allocation16_spill] sm:$0xff] %v4498_v49  ;;  %v4508_v59 = vld [vmem:[%s6235_s2] ss:$0 sm:$0xff]  ;;  %v4524_v16 = vld [vmem:[%s6236_s3 + $0x48] sm:$0xff]   ;;  %s3078_s25 = sshll.u32 %s4264_s24, 4  ;;  %s3079_s25 = int_to_ptr.vmem [resolvable:$true] %s3078_s25 }
  0x62   :  { %3341 = vmatprep.subr.bf16.mxu1 %v4449_v36  ;;  %3385 = vmatprep.subr.bf16.mxu0 %v4449_v36  ;;  %6281 = vst [vmem:[#allocation17_spill] sm:$0xff] %v4524_v16  ;;  %v4529_v17 = vld [vmem:[%s6236_s3 + $0x8] sm:$0xff]   ;;  %p4241_p1 = scmp.lt.s32.totalorder %s3079_s25, %s3079_s25 }
  0x63   :  { %6282 = vst [vmem:[#allocation18_spill] sm:$0xff] %v4529_v17 }
  0x65   :  { %3342 = vmatpush3.bf16.msra.mxu1 %v4456_v37  ;;  %3386 = vmatpush3.bf16.msra.mxu0 %v4456_v37 }
  0x66   :  { %3343 = vmatprep.subr.bf16.mxu1 %v4463_v39  ;;  %3387 = vmatprep.subr.bf16.mxu0 %v4463_v39 }
  0x69   :  { %3344 = vmatpush3.bf16.msra.mxu1 %v4470_v41  ;;  %3388 = vmatpush3.bf16.msra.mxu0 %v4470_v41 }
  0x6a   :  { %3345 = vmatprep.subr.bf16.mxu1 %v4477_v43  ;;  %3389 = vmatprep.subr.bf16.mxu0 %v4477_v43 }
  0x6d   :  { %3346 = vmatpush3.bf16.msra.mxu1 %v4484_v45  ;;  %3390 = vmatpush3.bf16.msra.mxu0 %v4484_v45 }
  0x6e   :  { %3347 = vmatprep.subr.bf16.mxu1 %v4491_v47  ;;  %3391 = vmatprep.subr.bf16.mxu0 %v4491_v47 }
  0x71   :  { %3348 = vmatpush3.bf16.msra.mxu1 %v4498_v49  ;;  %3392 = vmatpush3.bf16.msra.mxu0 %v4498_v49 }
  0x72   :  { %3349 = vmatprep.subr.bf16.mxu1 %v4524_v16  ;;  %3393 = vmatprep.subr.bf16.mxu0 %v4524_v16 }
  0x75   :  { %3350 = vmatpush3.bf16.msra.mxu1 %v4529_v17  ;;  %3394 = vmatpush3.bf16.msra.mxu0 %v4529_v17 }
  0xe2   :  { %v3289_v38 = vpop.f32.mrf.mxu0 }
  0xe4   :  { %v3290_v40 = vpop.f32.mrf.mxu0 }
  0xe5   :  { %v3291_v57 = vadd.f32 %v3290_v40, %v3289_v38 }
  0xe6   :  { %v3292_v42 = vpop.f32.mrf.mxu0 }
  0xe7   :  { %v306_v0 = vadd.f32 %v3291_v57, %v4508_v59 }
  0xe8   :  { %v3293_v44 = vpop.f32.mrf.mxu0 }
  0xe9   :  { %v3294_v61 = vadd.f32 %v3293_v44, %v3292_v42  ;;  %v4513_v6 = vmax.f32 %v306_v0, 0.0  ;;  %v4569_v44 = vld [vmem:[%s6236_s3 + $0x40] sm:$0xff]  }
  0xea   :  { %v3295_v46 = vpop.f32.mrf.mxu0  ;;  %6283 = vst [vmem:[#allocation19_spill] sm:$0xff] %v4569_v44  ;;  %3351 = vmatprep.subr.bf16.mxu1 %v4569_v44  ;;  %3395 = vmatprep.subr.bf16.mxu0 %v4569_v44 }
  0xeb   :  { %v309_v3 = vadd.f32 %v3294_v61, %v4508_v59  ;;  %v4532_v19 = vrot.slane %v4513_v6, 1  ;;  %v4535_v20 = vrot.slane %v4513_v6, 3  ;;  %v4538_v21 = vrot.slane %v4513_v6, 2 }
  0xec   :  { %v3296_v48 = vpop.f32.mrf.mxu0 }
  0xed   :  { %v3297_v63 = vadd.f32 %v3296_v48, %v3295_v46  ;;  %v4516_v11 = vmax.f32 %v309_v3, 0.0  ;;  %v4574_v46 = vld [vmem:[%s6236_s3] sm:$0xff]  }
  0xee   :  { %v3298_v50 = vpop.f32.mrf.mxu0  ;;  %6284 = vst [vmem:[#allocation20_spill] sm:$0xff] %v4574_v46  ;;  %3352 = vmatpush3.bf16.msra.mxu1 %v4574_v46  ;;  %3396 = vmatpush3.bf16.msra.mxu0 %v4574_v46 }
  0xef   :  { %v314_v5 = vadd.f32 %v3297_v63, %v4508_v59  ;;  %v4549_v29 = vrot.slane %v4516_v11, 1  ;;  %v4552_v30 = vrot.slane %v4516_v11, 3  ;;  %v4558_v38 = vrot.slane %v4516_v11, 2  ;;  %3425 = vmatprep.subr.bf16.mxu0 %v4424_v32 }
  0xf0   :  { %v3299_v51 = vpop.f32.mrf.mxu0 }
  0xf1   :  { %v3300_v2 = vadd.f32 %v3299_v51, %v3298_v50  ;;  %v4518_v14 = vmax.f32 %v314_v5, 0.0 }
  0xf2   :  { %v3301_v52 = vpop.f32.mrf.mxu0 }
  0xf3   :  { %v317_v8 = vadd.f32 %v3300_v2, %v4508_v59  ;;  %v4561_v40 = vrot.slane %v4518_v14, 1  ;;  %v4564_v42 = vrot.slane %v4518_v14, 2 }
  0xf4   :  { %v3302_v53 = vpop.f32.mrf.mxu0 }
  0xf5   :  { %v3303_v9 = vadd.f32 %v3302_v53, %v3301_v52  ;;  %v4540_v22 = vmax.f32 %v317_v8, 0.0  ;;  %v4581_v52 = vrot.slane %v4518_v14, 3 }
  0xf6   :  { %v3304_v54 = vpop.f32.mrf.mxu0 }
  0xf7   :  { %v322_v23 = vadd.f32 %v3303_v9, %v4508_v59  ;;  %v4591_v57 = vrot.slane %v4540_v22, 1 }
  0xf8   :  { %v3305_v55 = vpop.f32.mrf.mxu0 }
  0xf9   :  { %v3306_v12 = vadd.f32 %v3305_v55, %v3304_v54  ;;  %v4586_v54 = vmax.f32 %v322_v23, 0.0 }
  0xfa   :  { %v3307_v56 = vpop.f32.mrf.mxu0 }
  0xfb   :  { %v325_v26 = vadd.f32 %v3306_v12, %v4508_v59 }
  0xfc   :  { %v3308_v58 = vpop.f32.mrf.mxu0 }
  0xfd   :  { %v3309_v60 = vadd.f32 %v3308_v58, %v3307_v56  ;;  %v4595_v58 = vmax.f32 %v325_v26, 0.0 }
  0xfe   :  { %v3310_v62 = vpop.f32.mrf.mxu0 }
  0xff   :  { %v330_v48 = vadd.f32 %v3309_v60, %v4508_v59 }
 0x100   :  { %v3311_v1 = vpop.f32.mrf.mxu0 }
 0x101   :  { %v3312_v27 = vadd.f32 %v3311_v1, %v3310_v62 }
 0x102   :  { %v3313_v4 = vpop.f32.mrf.mxu0 }
 0x103   :  { %v333_v60 = vadd.f32 %v3312_v27, %v4508_v59  ;;  %v4644_v27 = vrot.slane %v4540_v22, 2 }
 0x104   :  { %v3314_v7 = vpop.f32.mrf.mxu0 }
 0x105   :  { %v3315_v10 = vadd.f32 %v3314_v7, %v3313_v4  ;;  %v4616_v4 = vmax.f32 %v330_v48, 0.0  ;;  %v4640_v23 = vmax.f32 %v333_v60, 0.0 }
 0x106   :  { %v3316_v13 = vpop.f32.mrf.mxu0 }
 0x107   :  { %v338_v15 = vadd.f32 %v3315_v10, %v4508_v59  ;;  %v4706_v47 = vrot.slane %v4640_v23, 2  ;;  %v4709_v45 = vrot.slane %v4640_v23, 3 }
 0x108   :  { %v3317_v18 = vpop.f32.mrf.mxu0 }
 0x109   :  { %v4543_v24 = vmax.f32 %v338_v15, 0.0  ;;  %v3318_v25 = vadd.f32 %v3317_v18, %v3316_v13  ;;  %v4638_v18 = vld [vmem:[%s6236_s3 + $0xf8] sm:$0xff]  }
 0x10a   :  { %v3319_v28 = vpop.f32.mrf.mxu0  ;;  %6286 = vst [vmem:[#allocation22_spill] sm:$0xff] %v4638_v18  ;;  %3359 = vmatprep.subr.bf16.mxu1 %v4638_v18 }
 0x10b   :  { %v341_v31 = vadd.f32 %v3318_v25, %v4508_v59  ;;  %v4578_v51 = vrot.slane %v4543_v24, 2  ;;  %v4584_v53 = vrot.slane %v4543_v24, 7  ;;  %v391_v62 = vsel %vm387_vm0, %v4543_v24, %v4532_v19 }
 0x10c   :  { %v3320_v50 = vpop.f32.mrf.mxu0  ;;  %v4602_v63 = vrot.slane %v4543_v24, 1  ;;  %v839_v49 = vsel %vm836_vm1, %v4543_v24, %v4532_v19 }
 0x10d   :  { %v4588_v55 = vmax.f32 %v341_v31, 0.0  ;;  %v3321_v56 = vadd.f32 %v3320_v50, %v3319_v28  ;;  %v403_v8 = vsel %vm387_vm0, %v4578_v51, %v4535_v20  ;;  %v4624_v9 = vsel %vm387_vm0, %v4584_v53, %v4513_v6 }
 0x10e   :  { %v3322_v61 = vpop.f32.mrf.mxu0  ;;  %6285 = vst [vmem:[#allocation21_spill] sm:$0xff] %v4624_v9  ;;  %v4647_v28 = vrot.slane %v4540_v22, 3  ;;  %v397_v48 = vsel %vm387_vm0, %v4602_v63, %v4538_v21  ;;  %v4654_v50 = vrot.slane %v4586_v54, 1  ;;  %v4752_v9 = vsel %vm1002_vm2, %v4602_v63, %v4538_v21 }
 0x10f   :  { %v346_v0 = vadd.f32 %v3321_v56, %v4508_v59  ;;  %v413_v1 = vsel %vm387_vm0, %v4588_v55, %v4549_v29  ;;  %v4610_v2 = vrot.slane %v4588_v55, 2  ;;  %v4613_v3 = vrot.slane %v4588_v55, 1 }
 0x110   :  { %v3323_v5 = vpop.f32.mrf.mxu0  ;;  %v3801_v7 = vpack.i.bf16 %v391_v62, %v413_v1  ;;  %v4657_v56 = vrot.slane %v4586_v54, 2  ;;  %v4662_v62 = vrot.slane %v4595_v58, 1  ;;  %v4668_v1 = vrot.slane %v4586_v54, 3 }
 0x111   :  { %v4627_v10 = vmax.f32 %v346_v0, 0.0  ;;  %v3324_v12 = vadd.f32 %v3323_v5, %v3322_v61  ;;  %v425_v13 = vsel %vm387_vm0, %v4610_v2, %v4552_v30  ;;  %v419_v15 = vsel %vm387_vm0, %v4613_v3, %v4558_v38 }
 0x112   :  { %v3325_v25 = vpop.f32.mrf.mxu0  ;;  %3802 = vrot.lane.b32.xlu0 %v3801_v7, %s4258_s16  ;;  %v3811_v26 = vpack.i.bf16 %v403_v8, %v425_v13  ;;  %v3806_v61 = vpack.i.bf16 %v397_v48, %v419_v15  ;;  %v4665_v0 = vrot.slane %v4595_v58, 2  ;;  %v4676_v8 = vrot.slane %v4595_v58, 3 }
 0x113   :  { %v349_v31 = vadd.f32 %v3324_v12, %v4508_v59  ;;  %v4673_v7 = vrot.slane %v4627_v10, 1  ;;  %v4679_v12 = vrot.slane %v4616_v4, 1  ;;  %v435_v15 = vsel %vm387_vm0, %v4627_v10, %v4561_v40 }
 0x114   :  { %v3326_v60 = vpop.f32.mrf.mxu0  ;;  %3812 = vrot.lane.b32.xlu1 %v3811_v26, %s4259_s17  ;;  %v4686_v26 = vrot.slane %v4640_v23, 1  ;;  %v4692_v48 = vrot.slane %v4616_v4, 3  ;;  %v853_v36 = vsel %vm836_vm1, %v4588_v55, %v4549_v29  ;;  %v4747_v35 = vsel %vm1002_vm2, %v4588_v55, %v4549_v29 }
 0x115   :  { %v4670_v5 = vmax.f32 %v349_v31, 0.0  ;;  %v4689_v31 = vrot.slane %v4616_v4, 2  ;;  %v441_v43 = vsel %vm387_vm0, %v4673_v7, %v4564_v42  ;;  %v3831_v33 = vpack.i.bf16 %v839_v49, %v853_v36 }
 0x116   :  { %v3328_v13 = vpop.f32.mrf.mxu0  ;;  %3807 = vrot.lane.b32.xlu0 %v3806_v61, %s4260_s18  ;;  %v4699_v61 = vrot.slane %v4627_v10, 2  ;;  %v867_v36 = vsel %vm836_vm1, %v4627_v10, %v4561_v40 }
 0x117   :  { %v457_v32 = vsel %vm387_vm0, %v4670_v5, %v4591_v57  ;;  %v462_v46 = vrot.slane %v4670_v5, 1  ;;  %v468_v44 = vrot.slane %v4670_v5, 2 }
 0x118   :  { %v3329_v17 = vpop.f32.mrf.mxu0  ;;  %v3816_v16 = vpack.i.bf16 %v435_v15, %v457_v32  ;;  %v3327_v15 = vadd.f32 %v3326_v60, %v3325_v25  ;;  %v843_v25 = vsel %vm836_vm1, %v4602_v63, %v4538_v21  ;;  %v861_v60 = vsel %vm836_vm1, %v4610_v2, %v4552_v30 }
 0x119   :  { %v3330_v18 = vadd.f32 %v3329_v17, %v3328_v13  ;;  %v463_v41 = vsel %vm387_vm0, %v462_v46, %v4644_v27  ;;  %v469_v32 = vsel %vm387_vm0, %v468_v44, %v4647_v28  ;;  %v4725_v17 = vsel %vm1002_vm2, %v4543_v24, %v4532_v19 }
 0x11a   :  { %v3331_v39 = vpop.f32.mrf.mxu0  ;;  %3817 = vrot.lane.b32.xlu1 %v3816_v16, %s4258_s16  ;;  %v3821_v37 = vpack.i.bf16 %v441_v43, %v463_v41  ;;  %v447_v13 = vsel %vm387_vm0, %v4699_v61, %v4581_v52  ;;  %v857_v41 = vsel %vm836_vm1, %v4613_v3, %v4558_v38  ;;  %v847_v43 = vsel %vm836_vm1, %v4578_v51, %v4535_v20 }
 0x11b   :  { %v357_v16 = vadd.f32 %v3330_v18, %v4508_v59  ;;  %v3826_v24 = vpack.i.bf16 %v447_v13, %v469_v32  ;;  %v354_v18 = vadd.f32 %v3327_v15, %v4508_v59  ;;  %v3836_v13 = vpack.i.bf16 %v843_v25, %v857_v41 }
 0x11c   :  { %v3332_v19 = vpop.f32.mrf.mxu0  ;;  %3822 = vrot.lane.b32.xlu0 %v3821_v37, %s4260_s18  ;;  %v4757_v37 = vsel %vm1002_vm2, %v4578_v51, %v4535_v20  ;;  %v3841_v49 = vpack.i.bf16 %v847_v43, %v861_v60  ;;  %v881_v20 = vsel %vm836_vm1, %v4670_v5, %v4591_v57  ;;  %v885_v21 = vsel %vm836_vm1, %v462_v46, %v4644_v27 }
 0x11d   :  { %v3333_v34 = vadd.f32 %v3332_v19, %v3331_v39  ;;  %v4767_v39 = vsel %vm1002_vm2, %v4613_v3, %v4558_v38  ;;  %v3861_v29 = vpack.i.bf16 %v4725_v17, %v4747_v35  ;;  %v4776_v51 = vmax.f32 %v357_v16, 0.0 }
 0x11e   :  { %v3334_v32 = vpop.f32.mrf.mxu0  ;;  %3827 = vrot.lane.b32.xlu1 %v3826_v24, %s4259_s17  ;;  %v871_v38 = vsel %vm836_vm1, %v4673_v7, %v4564_v42  ;;  %v4786_v3 = vsel %vm1002_vm2, %v4610_v2, %v4552_v30  ;;  %v875_v35 = vsel %vm836_vm1, %v4699_v61, %v4581_v52  ;;  %v4795_v17 = vmax.f32 %v354_v18, 0.0 }
 0x11f   :  { %v362_v63 = vadd.f32 %v3333_v34, %v4508_v59  ;;  %v889_v34 = vsel %vm836_vm1, %v468_v44, %v4647_v28  ;;  %v3846_v41 = vpack.i.bf16 %v867_v36, %v881_v20  ;;  %v3851_v43 = vpack.i.bf16 %v871_v38, %v885_v21 }
 0x120   :  { %v3335_v15 = vpop.f32.mrf.mxu0  ;;  %3832 = vrot.lane.b32.xlu0 %v3831_v33, %s4258_s16  ;;  %v3866_v33 = vpack.i.bf16 %v4752_v9, %v4767_v39  ;;  %v4801_v30 = vsel %vm1002_vm2, %v4670_v5, %v4591_v57  ;;  %v3871_v16 = vpack.i.bf16 %v4757_v37, %v4786_v3  ;;  %v4808_v19 = vsel %vm1002_vm2, %v462_v46, %v4644_v27 }
 0x121   :  { %v3336_v25 = vadd.f32 %v3335_v15, %v3334_v32  ;;  %v4812_v9 = vsel %vm1002_vm2, %v468_v44, %v4647_v28  ;;  %v4814_v24 = vmax.f32 %v362_v63, 0.0  ;;  %v3856_v60 = vpack.i.bf16 %v875_v35, %v889_v34 }
 0x122   :  { %3837 = vrot.lane.b32.xlu1 %v3836_v13, %s4260_s18  ;;  %v4823_v57 = vsel %vm387_vm0, %v4776_v51, %v4662_v62  ;;  %v4831_v44 = vsel %vm1002_vm2, %v4673_v7, %v4564_v42  ;;  %v4836_v28 = vsel %vm1002_vm2, %v4699_v61, %v4581_v52  ;;  %v4846_v18 = vsel %vm387_vm0, %v4795_v17, %v4654_v50 }
 0x123   :  { %v365_v2 = vadd.f32 %v3336_v25, %v4508_v59  ;;  %v1033_v59 = vsel %vm1002_vm2, %v4627_v10, %v4561_v40  ;;  %v3881_v40 = vpack.i.bf16 %v4831_v44, %v4808_v19  ;;  %v3886_v37 = vpack.i.bf16 %v4836_v28, %v4812_v9 }
 0x124   :  { %3842 = vrot.lane.b32.xlu0 %v3841_v49, %s4259_s17  ;;  %v3876_v27 = vpack.i.bf16 %v1033_v59, %v4801_v30  ;;  %v4849_v42 = vrot.slane %v4795_v17, 1  ;;  %v4854_v7 = vrot.slane %v4776_v51, 1  ;;  %v4857_v61 = vrot.slane %v4795_v17, 2 }
 0x125   :  { %v4825_v46 = vmax.f32 %v365_v2, 0.0  ;;  %v4860_v32 = vrot.slane %v4776_v51, 2  ;;  %v4866_v13 = vsel %vm387_vm0, %v4814_v24, %v4679_v12  ;;  %v1558_v39 = vrot.slane %v4814_v24, 1 }
 0x126   :  { %3847 = vrot.lane.b32.xlu1 %v3846_v41, %s4258_s16  ;;  %v1564_v21 = vrot.slane %v4814_v24, 2  ;;  %v4882_v15 = vsel %vm836_vm1, %v4814_v24, %v4679_v12  ;;  %v4936_v30 = vsel %vm1002_vm2, %v4814_v24, %v4679_v12  ;;  %v431_v34 = vrot.slane %v4627_v10, 7 }
 0x127   :  { %v4871_v36 = vsel %vm387_vm0, %v4825_v46, %v4686_v26  ;;  %v1580_v49 = vrot.slane %v4825_v46, 1  ;;  %v1586_v63 = vrot.slane %v4825_v46, 2  ;;  %v4887_v38 = vsel %vm387_vm0, %v1558_v39, %v4689_v31 }
 0x128   :  { %3852 = vrot.lane.b32.xlu0 %v3851_v43, %s4260_s18  ;;  %v4896_v25 = vsel %vm836_vm1, %v4825_v46, %v4686_v26  ;;  %v4900_v35 = vsel %vm836_vm1, %v1558_v39, %v4689_v31  ;;  %v4906_v41 = vsel %vm387_vm0, %v1564_v21, %v4692_v48  ;;  %v4941_v2 = vsel %vm1002_vm2, %v4825_v46, %v4686_v26 }
 0x129   :  { %v4891_v3 = vsel %vm387_vm0, %v1580_v49, %v4706_v47  ;;  %v4910_v43 = vsel %vm387_vm0, %v1586_v63, %v4709_v45  ;;  %v4919_v19 = vsel %vm836_vm1, %v1580_v49, %v4706_v47  ;;  %v4927_v59 = vsel %vm836_vm1, %v1586_v63, %v4709_v45 }
 0x12a   :  { %3857 = vrot.lane.b32.xlu1 %v3856_v60, %s4259_s17  ;;  %v4923_v60 = vsel %vm836_vm1, %v1564_v21, %v4692_v48  ;;  %v4948_v44 = vsel %vm1002_vm2, %v1558_v39, %v4689_v31  ;;  %v4956_v12 = vsel %vm1002_vm2, %v1564_v21, %v4692_v48  ;;  %v453_v31 = vrot.slane %v4670_v5, 7 }
 0x12b   :  { %v409_v39 = vrot.slane %v4588_v55, 7  ;;  %v4980_v10 = vsel %vm387_vm0, %v431_v34, %v4518_v14  ;;  %v1170_v20 = vrot.slane %v4795_v17, 7  ;;  %v1192_v52 = vrot.slane %v4776_v51, 7 }
 0x12c   :  { %3862 = vrot.lane.b32.xlu0 %v3861_v29, %s4258_s16  ;;  %v4952_v29 = vsel %vm1002_vm2, %v1580_v49, %v4706_v47  ;;  %v1180_v47 = vsel %vm387_vm0, %v4849_v42, %v4657_v56  ;;  %v4984_v5 = vsel %vm387_vm0, %v453_v31, %v4540_v22  ;;  %v4992_v55 = vsel %vm836_vm1, %v453_v31, %v4540_v22 }
 0x12d   :  { %v4997_v49 = vsel %vm387_vm0, %v409_v39, %v4516_v11  ;;  %v5001_v21 = vsel %vm836_vm1, %v409_v39, %v4516_v11  ;;  %v5010_v48 = vsel %vm1002_vm2, %v409_v39, %v4516_v11  ;;  %v5018_v26 = vsel %vm1002_vm2, %v453_v31, %v4540_v22 }
 0x12e   :  { %3867 = vrot.lane.b32.xlu1 %v3866_v33, %s4260_s18  ;;  %v4962_v33 = vsel %vm1002_vm2, %v1586_v63, %v4709_v45  ;;  %v4976_v45 = vsel %vm836_vm1, %v4584_v53, %v4513_v6  ;;  %v5006_v63 = vsel %vm1002_vm2, %v4584_v53, %v4513_v6  ;;  %v1202_v6 = vsel %vm387_vm0, %v4854_v7, %v4665_v0 }
 0x12f   :  { %v1208_v11 = vsel %vm387_vm0, %v4860_v32, %v4676_v8  ;;  %v1571_v53 = vrot.slane %v4825_v46, 7  ;;  %v5033_v22 = vsel %vm387_vm0, %v1170_v20, %v4586_v54  ;;  %v5045_v31 = vsel %vm836_vm1, %v1192_v52, %v4595_v58 }
 0x130   :  { %3872 = vrot.lane.b32.xlu0 %v3871_v16, %s4259_s17  ;;  %v4988_v16 = vsel %vm836_vm1, %v431_v34, %v4518_v14  ;;  %v5057_v46 = vsel %vm1002_vm2, %v1192_v52, %v4595_v58 }
 0x131   :  { %v5081_v28 = vsel %vm1002_vm2, %v1571_v53, %v4640_v23 }
 0x132   :  { %3877 = vrot.lane.b32.xlu1 %v3876_v27, %s4258_s16  ;;  %v5014_v27 = vsel %vm1002_vm2, %v431_v34, %v4518_v14  ;;  %v1549_v14 = vrot.slane %v4814_v24, 7  ;;  %v5037_v34 = vsel %vm387_vm0, %v1192_v52, %v4595_v58  ;;  %v5053_v24 = vsel %vm1002_vm2, %v1170_v20, %v4586_v54 }
 0x133   :  { %v3896_v52 = vpack.i.bf16 %v1180_v47, %v1202_v6  ;;  %v1307_v47 = vsel %vm836_vm1, %v4849_v42, %v4657_v56  ;;  %v1325_v6 = vsel %vm836_vm1, %v4860_v32, %v4676_v8 }
 0x134   :  { %3882 = vrot.lane.b32.xlu0 %v3881_v40, %s4260_s18  ;;  %v5041_v40 = vsel %vm836_vm1, %v1170_v20, %v4586_v54  ;;  %v5061_v39 = vsel %vm387_vm0, %v1549_v14, %v4616_v4  ;;  %v5069_v9 = vsel %vm836_vm1, %v1549_v14, %v4616_v4  ;;  %v5073_v54 = vsel %vm836_vm1, %v1571_v53, %v4640_v23 }
 0x135   :  { %6287 = vst [vmem:[#allocation23_spill] sm:$0xff] %v5041_v40  ;;  %v5065_v40 = vsel %vm387_vm0, %v1571_v53, %v4640_v23  ;;  %6288 = vst [vmem:[#allocation24_spill] sm:$0xff] %v5069_v9  ;;  %v5077_v58 = vsel %vm1002_vm2, %v1549_v14, %v4616_v4  ;;  %v1186_v20 = vsel %vm387_vm0, %v4857_v61, %v4668_v1 }
 0x136   :  { %3887 = vrot.lane.b32.xlu1 %v3886_v37, %s4259_s17  ;;  %v6289_v37 = vpack.i.bf16 %v4846_v18, %v4823_v57  ;;  %v1317_v9 = vsel %vm836_vm1, %v4776_v51, %v4662_v62  ;;  %v3901_v4 = vpack.i.bf16 %v1186_v20, %v1208_v11  ;;  %v1303_v23 = vsel %vm836_vm1, %v4795_v17, %v4654_v50 }
 0x137   :  { %v1321_v57 = vsel %vm836_vm1, %v4854_v7, %v4665_v0  ;;  %v3906_v18 = vpack.i.bf16 %v1303_v23, %v1317_v9  ;;  %v1311_v14 = vsel %vm836_vm1, %v4857_v61, %v4668_v1  ;;  %v1440_v53 = vsel %vm1002_vm2, %v4776_v51, %v4662_v62 }
 0x138   :  { %3892 = vrot.lane.b32.xlu0 %v6289_v37, %s4258_s16  ;;  %v3911_v11 = vpack.i.bf16 %v1307_v47, %v1321_v57  ;;  %v3916_v9 = vpack.i.bf16 %v1311_v14, %v1325_v6  ;;  %v1426_v37 = vsel %vm1002_vm2, %v4795_v17, %v4654_v50  ;;  %v1448_v62 = vsel %vm1002_vm2, %v4860_v32, %v4676_v8  ;;  %v5184_v47 = vld [vmem:[%s6236_s3 + $0xb8] sm:$0xff]   ;;  %v5191_v6 = vld [vmem:[%s6236_s3 + $0xf0] sm:$0xff]  }
 0x139   :  { %v3921_v20 = vpack.i.bf16 %v1426_v37, %v1440_v53  ;;  %v1434_v50 = vsel %vm1002_vm2, %v4857_v61, %v4668_v1  ;;  %v6291_v8 = vpack.i.bf16 %v4887_v38, %v4891_v3  ;;  %v6292_v17 = vpack.i.bf16 %v4906_v41, %v4910_v43  ;;  %v6299_v43 = vld [vmem:[#allocation21_spill] sm:$0xff] }
 0x13a   :  { %3897 = vrot.lane.b32.xlu1 %v3896_v52, %s4260_s18  ;;  %v1444_v52 = vsel %vm1002_vm2, %v4854_v7, %v4665_v0  ;;  %v3931_v0 = vpack.i.bf16 %v1434_v50, %v1448_v62  ;;  %v6293_v1 = vpack.i.bf16 %v4882_v15, %v4896_v25  ;;  %v6295_v7 = vpack.i.bf16 %v4923_v60, %v4927_v59 }
 0x13b   :  { %v6296_v61 = vpack.i.bf16 %v4936_v30, %v4941_v2  ;;  %v6297_v32 = vpack.i.bf16 %v4948_v44, %v4952_v29 }
 0x13c   :  { %3902 = vrot.lane.b32.xlu0 %v3901_v4, %s4259_s17  ;;  %v1430_v4 = vsel %vm1002_vm2, %v4849_v42, %v4657_v56  ;;  %v6290_v56 = vpack.i.bf16 %v4866_v13, %v4871_v36  ;;  %v6294_v42 = vpack.i.bf16 %v4900_v35, %v4919_v19  ;;  %v6298_v13 = vpack.i.bf16 %v4956_v12, %v4962_v33 }
 0x13d   :  { %v3926_v51 = vpack.i.bf16 %v1430_v4, %v1444_v52  ;;  %v5204_v52 = vld [vmem:[%s6236_s3 + $0xb0] sm:$0xff]  }
 0x13e   :  { %3907 = vrot.lane.b32.xlu1 %v3906_v18, %s4258_s16 }
 0x140   :  { %3912 = vrot.lane.b32.xlu0 %v3911_v11, %s4260_s18 }
 0x142   :  { %3917 = vrot.lane.b32.xlu1 %v3916_v9, %s4259_s17 }
 0x144   :  { %3922 = vrot.lane.b32.xlu0 %v3921_v20, %s4258_s16 }
 0x146   :  { %3927 = vrot.lane.b32.xlu1 %v3926_v51, %s4260_s18 }
 0x148   :  { %3932 = vrot.lane.b32.xlu0 %v3931_v0, %s4259_s17 }
 0x14a   :  { %3937 = vrot.lane.b32.xlu1 %v6290_v56, %s4258_s16 }
 0x14c   :  { %3942 = vrot.lane.b32.xlu0 %v6291_v8, %s4260_s18 }
 0x14e   :  { %3947 = vrot.lane.b32.xlu1 %v6292_v17, %s4259_s17 }
 0x150   :  { %3952 = vrot.lane.b32.xlu0 %v6293_v1, %s4258_s16 }
 0x152   :  { %3957 = vrot.lane.b32.xlu1 %v6294_v42, %s4260_s18  ;;  %v5223_v42 = vld [vmem:[%s6236_s3 + $0xa8] sm:$0xff]  }
 0x154   :  { %3962 = vrot.lane.b32.xlu0 %v6295_v7, %s4259_s17 }
 0x156   :  { %3967 = vrot.lane.b32.xlu1 %v6296_v61, %s4258_s16 }
 0x158   :  { %3972 = vrot.lane.b32.xlu0 %v6297_v32, %s4260_s18 }
 0x15a   :  { %3977 = vrot.lane.b32.xlu1 %v6298_v13, %s4259_s17 }
 0x184   :  { %v3803_v36 = vpop.permute.xlu0 %3802 }
 0x185   :  { %v3805_v15 = vunpack.i.h.bf16 %v3803_v36  ;;  %v3804_v38 = vunpack.i.l.bf16 %v3803_v36 }
 0x186   :  { %v3813_v3 = vpop.permute.xlu1 %3812 }
 0x187   :  { %v474_v30 = vsel %vm473_vm3, %v6299_v43, %v3805_v15  ;;  %v3815_v2 = vunpack.i.h.bf16 %v3813_v3  ;;  %v3814_v19 = vunpack.i.l.bf16 %v3813_v3  ;;  %v479_v60 = vsel %vm473_vm3, %v4997_v49, %v3804_v38  ;;  %v5241_v38 = vld [vmem:[%s6236_s3 + $0xa0] sm:$0xff]   ;;  %v5250_v43 = vld [vmem:[%s6236_s3 + $0xd8] sm:$0xff]  }
 0x188   :  { %v3808_v25 = vpop.permute.xlu0 %3807 }
 0x189   :  { %v3810_v35 = vunpack.i.h.bf16 %v3808_v25  ;;  %v3809_v41 = vunpack.i.l.bf16 %v3808_v25 }
 0x18b   :  { %v476_v59 = vsel %vm475_vm4, %v474_v30, %v3810_v35  ;;  %v480_v44 = vsel %vm475_vm4, %v479_v60, %v3809_v41  ;;  %v5258_v60 = vld [vmem:[%s6236_s3 + $0x98] sm:$0xff]  }
 0x18c   :  { %v5176_v29 = vpop.permute.xlu1 %3817  ;;  %v481_v12 = vsel %vm477_vm5, %v480_v44, %v3814_v19  ;;  %v478_v33 = vsel %vm477_vm5, %v476_v59, %v3815_v2 }
 0x18d   :  { %v3819_v23 = vunpack.i.l.bf16 %v5176_v29  ;;  %v489_v57 = vpack.c.bf16 %v481_v12, %v481_v12  ;;  %v488_v18 = vpack.c.bf16 %v478_v33, %v478_v33  ;;  %v5265_v12 = vld [vmem:[%s6236_s3 + $0xd0] sm:$0xff]  }
 0x18e   :  { %v5186_v49 = vpop.permute.xlu0 %3822 }
 0x18f   :  { %v485_v11 = vsel %vm473_vm3, %v4984_v5, %v3819_v23  ;;  %v3824_v14 = vunpack.i.l.bf16 %v5186_v49  ;;  %787 = vmatprep.mubr.bf16.mxu1 %v489_v57  ;;  %v5210_v5 = vld [vmem:[%s6236_s3 + $0xe8] sm:$0xff]  }
 0x190   :  { %v5196_v53 = vpop.permute.xlu1 %3827  ;;  %788 = vmatmul.mubr.bf16.vlgmr.msra.gmra.mxu1 %v488_v18  ;;  %v6300_v23 = vld [vmem:[#allocation6_spill] sm:$0xff]  ;;  %v3820_v18 = vunpack.i.h.bf16 %v5176_v29 }
 0x191   :  { %v486_v9 = vsel %vm475_vm4, %v485_v11, %v3824_v14  ;;  %v3829_v37 = vunpack.i.l.bf16 %v5196_v53  ;;  %3360 = vmatpush3.bf16.msra.mxu1 %v5184_v47 }
 0x192   :  { %v3833_v20 = vpop.permute.xlu0 %3832  ;;  %3361 = vmatprep.subr.bf16.mxu1 %v5191_v6 }
 0x193   :  { %v3835_v4 = vunpack.i.h.bf16 %v3833_v20  ;;  %v3834_v62 = vunpack.i.l.bf16 %v3833_v20  ;;  %v487_v51 = vsel %vm477_vm5, %v486_v9, %v3829_v37  ;;  %v6301_v37 = vld [vmem:[#allocation7_spill] sm:$0xff] }
 0x194   :  { %v3838_v50 = vpop.permute.xlu1 %3837  ;;  %v5213_v0 = vpack.c.bf16 %v487_v51, %v487_v51  ;;  %v5277_v20 = vld [vmem:[%s6236_s3 + $0x90] sm:$0xff]  }
 0x195   :  { %v893_v56 = vsel %vm473_vm3, %v4976_v45, %v3835_v4  ;;  %v896_v8 = vsel %vm473_vm3, %v5001_v21, %v3834_v62  ;;  %v3840_v17 = vunpack.i.h.bf16 %v3838_v50  ;;  %v3839_v1 = vunpack.i.l.bf16 %v3838_v50  ;;  %3362 = vmatpush3.bf16.msra.mxu1 %v5204_v52  ;;  %v5230_v45 = vld [vmem:[%s6236_s3 + $0xe0] sm:$0xff]  }
 0x196   :  { %v3843_v7 = vpop.permute.xlu0 %3842  ;;  %827 = vmatprep.mubr.bf16.mxu1 %v5213_v0  ;;  %3363 = vmatprep.subr.bf16.mxu1 %v5210_v5  ;;  %v3825_v50 = vunpack.i.h.bf16 %v5186_v49 }
 0x197   :  { %v894_v21 = vsel %vm475_vm4, %v893_v56, %v3840_v17  ;;  %v897_v61 = vsel %vm475_vm4, %v896_v8, %v3839_v1  ;;  %v3845_v32 = vunpack.i.h.bf16 %v3843_v7  ;;  %v3844_v13 = vunpack.i.l.bf16 %v3843_v7  ;;  %v6302_v8 = vld [vmem:[#allocation8_spill] sm:$0xff]  ;;  %v6303_v1 = vld [vmem:[#allocation9_spill] sm:$0xff] }
 0x198   :  { %v5234_v36 = vpop.permute.xlu1 %3847  ;;  %v5299_v7 = vld [vmem:[%s6236_s3 + $0x88] sm:$0xff]  }
 0x199   :  { %v895_v15 = vsel %vm477_vm5, %v894_v21, %v3845_v32  ;;  %3364 = vmatpush3.bf16.msra.mxu1 %v5223_v42  ;;  %v898_v3 = vsel %vm477_vm5, %v897_v61, %v3844_v13  ;;  %v3849_v59 = vunpack.i.l.bf16 %v5234_v36  ;;  %v3830_v61 = vunpack.i.h.bf16 %v5196_v53  ;;  %v6304_v13 = vld [vmem:[#allocation10_spill] sm:$0xff] }
 0x19a   :  { %v905_v25 = vpack.c.bf16 %v895_v15, %v895_v15  ;;  %v5244_v35 = vpop.permute.xlu0 %3852  ;;  %3365 = vmatprep.subr.bf16.mxu1 %v5230_v45  ;;  %v906_v41 = vpack.c.bf16 %v898_v3, %v898_v3 }
 0x19b   :  { %v3854_v11 = vunpack.i.l.bf16 %v5244_v35  ;;  %v902_v4 = vsel %vm473_vm3, %v4992_v55, %v3849_v59  ;;  %v482_v55 = vsel %vm473_vm3, %v4980_v10, %v3820_v18  ;;  %v5306_v10 = vld [vmem:[%s6236_s3 + $0xc0] sm:$0xff]  }
 0x19c   :  { %v913_v30 = vrot.slane %v905_v25, 1  ;;  %v5252_v2 = vpop.permute.xlu1 %3857  ;;  %v914_v19 = vrot.slane %v906_v41, 1  ;;  %v483_v32 = vsel %vm475_vm4, %v482_v55, %v3825_v50  ;;  %v6305_v25 = vld [vmem:[#allocation11_spill] sm:$0xff]  ;;  %v5317_v41 = vld [vmem:[%s6236_s3 + $0x80] sm:$0xff]  }
 0x19d   :  { %3366 = vmatpush3.bf16.msra.mxu1 %v5241_v38  ;;  %v3859_v56 = vunpack.i.l.bf16 %v5252_v2  ;;  %v903_v17 = vsel %vm475_vm4, %v902_v4, %v3854_v11  ;;  %v484_v53 = vsel %vm477_vm5, %v483_v32, %v3830_v61  ;;  %v6306_v59 = vld [vmem:[#allocation12_spill] sm:$0xff]  ;;  %v6308_v11 = vld [vmem:[#allocation22_spill] sm:$0xff] }
 0x19e   :  { %v3863_v44 = vpop.permute.xlu0 %3862  ;;  %953 = vmatprep.mubr.bf16.mxu0 %v914_v19  ;;  %3367 = vmatprep.subr.bf16.mxu1 %v5250_v43  ;;  %v5324_v18 = vpack.c.bf16 %v484_v53, %v484_v53  ;;  %v6309_v4 = vld [vmem:[#allocation14_spill] sm:$0xff] }
 0x19f   :  { %v3864_v33 = vunpack.i.l.bf16 %v3863_v44  ;;  %954 = vmatmul.mubr.bf16.vlgmr.msra.gmra.mxu0 %v913_v30  ;;  %v904_v3 = vsel %vm477_vm5, %v903_v17, %v3859_v56  ;;  %v3865_v19 = vunpack.i.h.bf16 %v3863_v44  ;;  %v6313_v56 = vld [vmem:[#allocation18_spill] sm:$0xff]  ;;  %v6315_v17 = vld [vmem:[#allocation20_spill] sm:$0xff] }
 0x1a0   :  { %3426 = vmatpush3.bf16.msra.mxu0 %v6300_v23  ;;  %v3868_v57 = vpop.permute.xlu1 %3867  ;;  %v908_v30 = vpack.c.bf16 %v904_v3, %v904_v3  ;;  %v5381_v53 = vld [vmem:[%s6236_s3 + $0x30] sm:$0xff]  }
 0x1a1   :  { %v1062_v14 = vsel %vm473_vm3, %v5010_v48, %v3864_v33  ;;  %v3869_v9 = vunpack.i.l.bf16 %v3868_v57  ;;  %3368 = vmatpush3.bf16.msra.mxu1 %v5258_v60  ;;  %3427 = vmatprep.subr.bf16.mxu0 %v6301_v37  ;;  %v5285_v48 = vld [vmem:[%s6236_s3 + $0xc8] sm:$0xff]   ;;  %v1059_v37 = vsel %vm473_vm3, %v5006_v63, %v3865_v19 }
 0x1a2   :  { %v3873_v62 = vpop.permute.xlu0 %3872  ;;  %3369 = vmatprep.subr.bf16.mxu1 %v5265_v12  ;;  %v6307_v33 = vld [vmem:[#allocation13_spill] sm:$0xff] }
 0x1a3   :  { %v1063_v29 = vsel %vm475_vm4, %v1062_v14, %v3869_v9  ;;  %v3874_v51 = vunpack.i.l.bf16 %v3873_v62  ;;  %v3870_v14 = vunpack.i.h.bf16 %v3868_v57  ;;  %v5327_v9 = vrot.slane %v908_v30, 1  ;;  %v6312_v63 = vld [vmem:[#allocation17_spill] sm:$0xff] }
 0x1a4   :  { %3428 = vmatpush3.bf16.msra.mxu0 %v6302_v8  ;;  %v3875_v44 = vunpack.i.h.bf16 %v3873_v62  ;;  %v6314_v62 = vld [vmem:[#allocation19_spill] sm:$0xff]  ;;  %v5347_v55 = vpop.permute.xlu1 %3877  ;;  %v5397_v19 = vld [vmem:[%s6236_s3 + $0x28] sm:$0xff]  }
 0x1a5   :  { %3370 = vmatpush3.bf16.msra.mxu1 %v5277_v20  ;;  %3429 = vmatprep.subr.bf16.mxu0 %v6303_v1  ;;  %v1064_v49 = vsel %vm477_vm5, %v1063_v29, %v3874_v51  ;;  %v6310_v29 = vld [vmem:[#allocation15_spill] sm:$0xff]  ;;  %v1060_v57 = vsel %vm475_vm4, %v1059_v37, %v3870_v14  ;;  %v6311_v51 = vld [vmem:[#allocation16_spill] sm:$0xff]  ;;  %v3850_v1 = vunpack.i.h.bf16 %v5234_v36  ;;  %v3879_v61 = vunpack.i.l.bf16 %v5347_v55 }
 0x1a6   :  { %3371 = vmatprep.subr.bf16.mxu1 %v5285_v48  ;;  %v1072_v21 = vpack.c.bf16 %v1064_v49, %v1064_v49  ;;  %v1061_v50 = vsel %vm477_vm5, %v1060_v57, %v3875_v44  ;;  %v5354_v32 = vpop.permute.xlu0 %3882  ;;  %v5419_v44 = vld [vmem:[%s6236_s3 + $0x58] sm:$0xff]  }
 0x1a7   :  { %v1071_v8 = vpack.c.bf16 %v1061_v50, %v1061_v50  ;;  %v899_v36 = vsel %vm473_vm3, %v4988_v16, %v3850_v1  ;;  %v3860_v16 = vunpack.i.h.bf16 %v5252_v2  ;;  %v5431_v50 = vld [vmem:[%s6236_s3 + $0x18] sm:$0xff]   ;;  %v3880_v1 = vunpack.i.h.bf16 %v5347_v55 }
 0x1a8   :  { %3430 = vmatpush3.bf16.msra.mxu0 %v6304_v13  ;;  %v1080_v15 = vrot.slane %v1072_v21, 2  ;;  %v6316_v21 = vld [vmem:[#allocation5_spill] sm:$0xff]  ;;  %v3855_v13 = vunpack.i.h.bf16 %v5244_v35  ;;  %v5363_v3 = vpop.permute.xlu1 %3887  ;;  %v1068_v35 = vsel %vm473_vm3, %v5018_v26, %v3879_v61  ;;  %v5468_v55 = vld [vmem:[%s6236_s3 + $0x38] sm:$0xff]  }
 0x1a9   :  { %3372 = vmatpush3.bf16.msra.mxu1 %v5299_v7  ;;  %3431 = vmatprep.subr.bf16.mxu0 %v6305_v25  ;;  %v1079_v49 = vrot.slane %v1071_v8, 2  ;;  %v5369_v25 = vld [vmem:[%s6236_s3 + $0x70] sm:$0xff]   ;;  %v5389_v26 = vld [vmem:[%s6236_s3 + $0x68] sm:$0xff]  }
 0x1aa   :  { %1119 = vmatprep.mubr.bf16.mxu0 %v1080_v15  ;;  %3373 = vmatprep.subr.bf16.mxu1 %v5306_v10  ;;  %v3884_v15 = vunpack.i.l.bf16 %v5354_v32  ;;  %v5439_v8 = vld [vmem:[%s6236_s3 + $0x50] sm:$0xff]  }
 0x1ac   :  { %3432 = vmatpush3.bf16.msra.mxu0 %v6306_v59  ;;  %v1069_v30 = vsel %vm475_vm4, %v1068_v35, %v3884_v15 }
 0x1ad   :  { %3374 = vmatpush3.bf16.msra.mxu1 %v5317_v41  ;;  %3433 = vmatprep.subr.bf16.mxu0 %v6307_v33  ;;  %v5405_v33 = vld [vmem:[%s6236_s3 + $0x60] sm:$0xff]  }
 0x1ae   :  { %3403 = vmatprep.subr.bf16.mxu1 %v6308_v11 }
 0x1b0   :  { %828 = vmatmul.mubr.bf16.vlgmr.msra.gmra.mxu1 %v5324_v18  ;;  %3434 = vmatpush3.bf16.msra.mxu0 %v6309_v4  ;;  %v5412_v4 = vld [vmem:[%s6236_s3 + $0x20] sm:$0xff]  }
 0x1b1   :  { %3404 = vmatpush3.bf16.msra.mxu1 %v5184_v47  ;;  %993 = vmatprep.mubr.bf16.mxu1 %v5327_v9 }
 0x1b2   :  { %3435 = vmatprep.subr.bf16.mxu0 %v6310_v29  ;;  %3405 = vmatprep.subr.bf16.mxu1 %v5191_v6 }
 0x1b4   :  { %3436 = vmatpush3.bf16.msra.mxu0 %v6311_v51 }
 0x1b5   :  { %3406 = vmatpush3.bf16.msra.mxu1 %v5204_v52  ;;  %3437 = vmatprep.subr.bf16.mxu0 %v6312_v63 }
 0x1b6   :  { %3407 = vmatprep.subr.bf16.mxu1 %v5210_v5 }
 0x1b8   :  { %3438 = vmatpush3.bf16.msra.mxu0 %v6313_v56 }
 0x1b9   :  { %3408 = vmatpush3.bf16.msra.mxu1 %v5223_v42  ;;  %3439 = vmatprep.subr.bf16.mxu0 %v6314_v62 }
 0x1ba   :  { %3409 = vmatprep.subr.bf16.mxu1 %v5230_v45 }
 0x1bc   :  { %3440 = vmatpush3.bf16.msra.mxu0 %v6315_v17 }
 0x1bd   :  { %3410 = vmatpush3.bf16.msra.mxu1 %v5241_v38  ;;  %3469 = vmatprep.subr.bf16.mxu0 %v6316_v21  ;;  %v3890_v21 = vunpack.i.h.bf16 %v5363_v3 }
 0x1be   :  { %3411 = vmatprep.subr.bf16.mxu1 %v5250_v43 }
 0x1bf   :  { %1120 = vmatmul.mubr.bf16.vlgmr.msra.gmra.mxu0 %v1079_v49  ;;  %v5477_v49 = vpop.permute.xlu1 %3897 }
 0x1c0   :  { %3470 = vmatpush3.bf16.msra.mxu0 %v6300_v23  ;;  %1252 = vmatprep.mubr.bf16.mxu0 %v5213_v0  ;;  %v900_v0 = vsel %vm475_vm4, %v899_v36, %v3855_v13  ;;  %v3889_v23 = vunpack.i.l.bf16 %v5363_v3 }
 0x1c1   :  { %3412 = vmatpush3.bf16.msra.mxu1 %v5258_v60  ;;  %3471 = vmatprep.subr.bf16.mxu0 %v5369_v25  ;;  %v901_v2 = vsel %vm477_vm5, %v900_v0, %v3860_v16  ;;  %v5516_v0 = vld [vmem:[%s6236_s3 + $0x10] sm:$0xff]  }
 0x1c2   :  { %3413 = vmatprep.subr.bf16.mxu1 %v5265_v12  ;;  %v1070_v59 = vsel %vm477_vm5, %v1069_v30, %v3889_v23  ;;  %v907_v14 = vpack.c.bf16 %v901_v2, %v901_v2  ;;  %v5530_v23 = vld [vmem:[%s6236_s3 + $0x8] sm:$0xff]   ;;  %v5541_v2 = vld [vmem:[%s6236_s3] sm:$0xff]  }
 0x1c3   :  { %v1074_v37 = vpack.c.bf16 %v1070_v59, %v1070_v59  ;;  %v5536_v30 = vpop.permute.xlu1 %3907 }
 0x1c4   :  { %3472 = vmatpush3.bf16.msra.mxu0 %v5381_v53  ;;  %v5422_v29 = vrot.slane %v907_v14, 1  ;;  %v3909_v59 = vunpack.i.l.bf16 %v5536_v30 }
 0x1c5   :  { %3414 = vmatpush3.bf16.msra.mxu1 %v5277_v20  ;;  %3473 = vmatprep.subr.bf16.mxu0 %v5389_v26  ;;  %v5425_v57 = vrot.slane %v1074_v37, 2 }
 0x1c6   :  { %3415 = vmatprep.subr.bf16.mxu1 %v5285_v48 }
 0x1c8   :  { %3474 = vmatpush3.bf16.msra.mxu0 %v5397_v19 }
 0x1c9   :  { %3416 = vmatpush3.bf16.msra.mxu1 %v5299_v7  ;;  %3475 = vmatprep.subr.bf16.mxu0 %v5405_v33 }
 0x1ca   :  { %3417 = vmatprep.subr.bf16.mxu1 %v5306_v10 }
 0x1cc   :  { %3476 = vmatpush3.bf16.msra.mxu0 %v5412_v4 }
 0x1cd   :  { %3418 = vmatpush3.bf16.msra.mxu1 %v5317_v41  ;;  %3477 = vmatprep.subr.bf16.mxu0 %v5419_v44 }
 0x1ce   :  { %3447 = vmatprep.subr.bf16.mxu1 %v6308_v11 }
 0x1d0   :  { %994 = vmatmul.mubr.bf16.vlgmr.msra.gmra.mxu1 %v5422_v29  ;;  %3478 = vmatpush3.bf16.msra.mxu0 %v5431_v50 }
 0x1d1   :  { %3448 = vmatpush3.bf16.msra.mxu1 %v5184_v47  ;;  %1159 = vmatprep.mubr.bf16.mxu1 %v5425_v57 }
 0x1d2   :  { %3479 = vmatprep.subr.bf16.mxu0 %v5439_v8  ;;  %3449 = vmatprep.subr.bf16.mxu1 %v5191_v6 }
 0x1d4   :  { %3480 = vmatpush3.bf16.msra.mxu0 %v6311_v51  ;;  %v5457_v51 = vld [vmem:[%s6236_s3 + $0x78] sm:$0xff]  }
 0x1d5   :  { %3450 = vmatpush3.bf16.msra.mxu1 %v5204_v52  ;;  %3481 = vmatprep.subr.bf16.mxu0 %v6312_v63  ;;  %v5461_v63 = vpop.permute.xlu0 %3892 }
 0x1d6   :  { %3451 = vmatprep.subr.bf16.mxu1 %v5210_v5 }
 0x1d8   :  { %3482 = vmatpush3.bf16.msra.mxu0 %v6313_v56  ;;  %v3885_v56 = vunpack.i.h.bf16 %v5354_v32 }
 0x1d9   :  { %3452 = vmatpush3.bf16.msra.mxu1 %v5223_v42  ;;  %3483 = vmatprep.subr.bf16.mxu0 %v6314_v62  ;;  %v5484_v32 = vpop.permute.xlu0 %3902 }
 0x1da   :  { %3453 = vmatprep.subr.bf16.mxu1 %v5230_v45  ;;  %v3904_v36 = vunpack.i.l.bf16 %v5484_v32 }
 0x1dc   :  { %3484 = vmatpush3.bf16.msra.mxu0 %v6315_v17  ;;  %v1065_v17 = vsel %vm473_vm3, %v5014_v27, %v3880_v1  ;;  %v5555_v1 = vpop.permute.xlu1 %3917 }
 0x1dd   :  { %3454 = vmatpush3.bf16.msra.mxu1 %v5241_v38  ;;  %3513 = vmatprep.subr.bf16.mxu0 %v5457_v51  ;;  %v1066_v61 = vsel %vm475_vm4, %v1065_v17, %v3885_v56  ;;  %v5547_v14 = vpop.permute.xlu0 %3912  ;;  %v1332_v56 = vsel %vm473_vm3, %v5045_v31, %v3909_v59  ;;  %v3919_v17 = vunpack.i.l.bf16 %v5555_v1  ;;  %v3905_v31 = vunpack.i.h.bf16 %v5484_v32  ;;  %v6317_v59 = vld [vmem:[#allocation23_spill] sm:$0xff] }
 0x1de   :  { %3455 = vmatprep.subr.bf16.mxu1 %v5250_v43  ;;  %v1067_v13 = vsel %vm477_vm5, %v1066_v61, %v3890_v21  ;;  %v3914_v37 = vunpack.i.l.bf16 %v5547_v14 }
 0x1df   :  { %1253 = vmatmul.mubr.bf16.vlgmr.msra.gmra.mxu0 %v5324_v18  ;;  %v3894_v18 = vunpack.i.l.bf16 %v5461_v63  ;;  %v1073_v3 = vpack.c.bf16 %v1067_v13, %v1067_v13 }
 0x1e0   :  { %3514 = vmatpush3.bf16.msra.mxu0 %v5468_v55  ;;  %1375 = vmatprep.mubr.bf16.mxu0 %v5327_v9  ;;  %v3899_v9 = vunpack.i.l.bf16 %v5477_v49 }
 0x1e1   :  { %3456 = vmatpush3.bf16.msra.mxu1 %v5258_v60  ;;  %3515 = vmatprep.subr.bf16.mxu0 %v5369_v25  ;;  %v1215_v27 = vsel %vm473_vm3, %v5037_v34, %v3894_v18  ;;  %v5502_v35 = vrot.slane %v1073_v3, 2  ;;  %v5611_v13 = vpop.permute.xlu0 %3922  ;;  %v5618_v3 = vpop.permute.xlu1 %3927 }
 0x1e2   :  { %3457 = vmatprep.subr.bf16.mxu1 %v5265_v12  ;;  %v1216_v15 = vsel %vm475_vm4, %v1215_v27, %v3899_v9  ;;  %v5587_v9 = vld [vmem:[%s6236_s3 + $0xf8] sm:$0xff]   ;;  %v5607_v27 = vld [vmem:[%s6236_s3 + $0x40] sm:$0xff]  }
 0x1e3   :  { %v1217_v34 = vsel %vm477_vm5, %v1216_v15, %v3904_v36  ;;  %v3910_v36 = vunpack.i.h.bf16 %v5536_v30  ;;  %v3924_v15 = vunpack.i.l.bf16 %v5611_v13 }
 0x1e4   :  { %3516 = vmatpush3.bf16.msra.mxu0 %v5381_v53  ;;  %v5505_v16 = vpack.c.bf16 %v1217_v34, %v1217_v34  ;;  %v3915_v34 = vunpack.i.h.bf16 %v5547_v14  ;;  %v3920_v14 = vunpack.i.h.bf16 %v5555_v1 }
 0x1e5   :  { %3458 = vmatpush3.bf16.msra.mxu1 %v5277_v20  ;;  %3517 = vmatprep.subr.bf16.mxu0 %v5389_v26  ;;  %v1329_v30 = vsel %vm473_vm3, %v6317_v59, %v3910_v36 }
 0x1e6   :  { %3459 = vmatprep.subr.bf16.mxu1 %v5285_v48 }
 0x1e8   :  { %3518 = vmatpush3.bf16.msra.mxu0 %v5397_v19 }
 0x1e9   :  { %3460 = vmatpush3.bf16.msra.mxu1 %v5299_v7  ;;  %3519 = vmatprep.subr.bf16.mxu0 %v5405_v33 }
 0x1ea   :  { %3461 = vmatprep.subr.bf16.mxu1 %v5306_v10 }
 0x1ec   :  { %3520 = vmatpush3.bf16.msra.mxu0 %v5412_v4 }
 0x1ed   :  { %3462 = vmatpush3.bf16.msra.mxu1 %v5317_v41  ;;  %3521 = vmatprep.subr.bf16.mxu0 %v5419_v44 }
 0x1ee   :  { %3491 = vmatprep.subr.bf16.mxu1 %v6308_v11  ;;  %v5523_v11 = vld [vmem:[%s6236_s3 + $0x48] sm:$0xff]  }
 0x1f0   :  { %1160 = vmatmul.mubr.bf16.vlgmr.msra.gmra.mxu1 %v5502_v35  ;;  %3522 = vmatpush3.bf16.msra.mxu0 %v5431_v50 }
 0x1f1   :  { %3492 = vmatpush3.bf16.msra.mxu1 %v5184_v47  ;;  %1292 = vmatprep.mubr.bf16.mxu1 %v5505_v16 }
 0x1f2   :  { %3523 = vmatprep.subr.bf16.mxu0 %v5439_v8  ;;  %3493 = vmatprep.subr.bf16.mxu1 %v5191_v6 }
 0x1f4   :  { %3524 = vmatpush3.bf16.msra.mxu0 %v5516_v0 }
 0x1f5   :  { %3494 = vmatpush3.bf16.msra.mxu1 %v5204_v52  ;;  %3525 = vmatprep.subr.bf16.mxu0 %v5523_v11 }
 0x1f6   :  { %3495 = vmatprep.subr.bf16.mxu1 %v5210_v5 }
 0x1f8   :  { %3526 = vmatpush3.bf16.msra.mxu0 %v5530_v23 }
 0x1f9   :  { %3496 = vmatpush3.bf16.msra.mxu1 %v5223_v42  ;;  %3527 = vmatprep.subr.bf16.mxu0 %v6314_v62  ;;  %v3895_v62 = vunpack.i.h.bf16 %v5461_v63  ;;  %v1333_v63 = vsel %vm475_vm4, %v1332_v56, %v3914_v37  ;;  %v5628_v37 = vpop.permute.xlu0 %3932 }
 0x1fa   :  { %3497 = vmatprep.subr.bf16.mxu1 %v5230_v45  ;;  %v3934_v56 = vunpack.i.l.bf16 %v5628_v37 }
 0x1fc   :  { %3528 = vmatpush3.bf16.msra.mxu0 %v5541_v2 }
 0x1fd   :  { %3498 = vmatpush3.bf16.msra.mxu1 %v5241_v38  ;;  %3557 = vmatprep.subr.bf16.mxu0 %v5457_v51  ;;  %v5687_v36 = vpop.permute.xlu0 %3942 }
 0x1fe   :  { %3499 = vmatprep.subr.bf16.mxu1 %v5250_v43 }
 0x1ff   :  { %1376 = vmatmul.mubr.bf16.vlgmr.msra.gmra.mxu0 %v5422_v29  ;;  %v3900_v29 = vunpack.i.h.bf16 %v5477_v49  ;;  %v1334_v49 = vsel %vm477_vm5, %v1333_v63, %v3919_v17 }
 0x200   :  { %3558 = vmatpush3.bf16.msra.mxu0 %v5468_v55  ;;  %1498 = vmatprep.mubr.bf16.mxu0 %v5425_v57  ;;  %v1212_v57 = vsel %vm473_vm3, %v5033_v22, %v3895_v62  ;;  %v1336_v21 = vpack.c.bf16 %v1334_v49, %v1334_v49  ;;  %v3929_v62 = vunpack.i.l.bf16 %v5618_v3  ;;  %v5676_v49 = vpop.permute.xlu1 %3937 }
 0x201   :  { %3500 = vmatpush3.bf16.msra.mxu1 %v5258_v60  ;;  %3559 = vmatprep.subr.bf16.mxu0 %v5369_v25  ;;  %v1213_v18 = vsel %vm475_vm4, %v1212_v57, %v3900_v29 }
 0x202   :  { %3501 = vmatprep.subr.bf16.mxu1 %v5265_v12  ;;  %v1214_v22 = vsel %vm477_vm5, %v1213_v18, %v3905_v31  ;;  %v5590_v32 = vrot.slane %v1336_v21, 1  ;;  %v3925_v18 = vunpack.i.h.bf16 %v5611_v13  ;;  %v3939_v13 = vunpack.i.l.bf16 %v5676_v49 }
 0x203   :  { %v5582_v61 = vpack.c.bf16 %v1214_v22, %v1214_v22  ;;  %v3930_v22 = vunpack.i.h.bf16 %v5618_v3 }
 0x204   :  { %3560 = vmatpush3.bf16.msra.mxu0 %v5381_v53  ;;  %v1452_v21 = vsel %vm473_vm3, %v5053_v24, %v3925_v18  ;;  %v5694_v3 = vpop.permute.xlu1 %3947  ;;  %v1594_v24 = vsel %vm473_vm3, %v5065_v40, %v3939_v13 }
 0x205   :  { %3502 = vmatpush3.bf16.msra.mxu1 %v5277_v20  ;;  %3561 = vmatprep.subr.bf16.mxu0 %v5389_v26  ;;  %v3949_v59 = vunpack.i.l.bf16 %v5694_v3 }
 0x206   :  { %3503 = vmatprep.subr.bf16.mxu1 %v5285_v48 }
 0x208   :  { %3562 = vmatpush3.bf16.msra.mxu0 %v5397_v19 }
 0x209   :  { %3504 = vmatpush3.bf16.msra.mxu1 %v5299_v7  ;;  %3563 = vmatprep.subr.bf16.mxu0 %v5405_v33 }
 0x20a   :  { %3505 = vmatprep.subr.bf16.mxu1 %v5306_v10 }
 0x20c   :  { %3564 = vmatpush3.bf16.msra.mxu0 %v5412_v4 }
 0x20d   :  { %3506 = vmatpush3.bf16.msra.mxu1 %v5317_v41  ;;  %3565 = vmatprep.subr.bf16.mxu0 %v5419_v44 }
 0x20e   :  { %3535 = vmatprep.subr.bf16.mxu1 %v5587_v9 }
 0x210   :  { %1293 = vmatmul.mubr.bf16.vlgmr.msra.gmra.mxu1 %v5582_v61  ;;  %3566 = vmatpush3.bf16.msra.mxu0 %v5431_v50 }
 0x211   :  { %3536 = vmatpush3.bf16.msra.mxu1 %v5184_v47  ;;  %1415 = vmatprep.mubr.bf16.mxu1 %v5590_v32 }
 0x212   :  { %3567 = vmatprep.subr.bf16.mxu0 %v5439_v8  ;;  %3537 = vmatprep.subr.bf16.mxu1 %v5191_v6 }
 0x214   :  { %3568 = vmatpush3.bf16.msra.mxu0 %v5516_v0 }
 0x215   :  { %3538 = vmatpush3.bf16.msra.mxu1 %v5204_v52  ;;  %3569 = vmatprep.subr.bf16.mxu0 %v5523_v11 }
 0x216   :  { %3539 = vmatprep.subr.bf16.mxu1 %v5210_v5 }
 0x218   :  { %3570 = vmatpush3.bf16.msra.mxu0 %v5530_v23 }
 0x219   :  { %3540 = vmatpush3.bf16.msra.mxu1 %v5223_v42  ;;  %3571 = vmatprep.subr.bf16.mxu0 %v5607_v27 }
 0x21a   :  { %3541 = vmatprep.subr.bf16.mxu1 %v5230_v45 }
 0x21c   :  { %3572 = vmatpush3.bf16.msra.mxu0 %v5541_v2 }
 0x21d   :  { %3542 = vmatpush3.bf16.msra.mxu1 %v5241_v38  ;;  %3601 = vmatprep.subr.bf16.mxu0 %v5457_v51 }
 0x21e   :  { %3543 = vmatprep.subr.bf16.mxu1 %v5250_v43 }
 0x21f   :  { %1499 = vmatmul.mubr.bf16.vlgmr.msra.gmra.mxu0 %v5502_v35  ;;  %v1455_v35 = vsel %vm473_vm3, %v5057_v46, %v3924_v15  ;;  %v1453_v15 = vsel %vm475_vm4, %v1452_v21, %v3930_v22  ;;  %v3940_v22 = vunpack.i.h.bf16 %v5676_v49 }
 0x220   :  { %3602 = vmatpush3.bf16.msra.mxu0 %v5468_v55  ;;  %1631 = vmatprep.mubr.bf16.mxu0 %v5505_v16  ;;  %v1330_v16 = vsel %vm475_vm4, %v1329_v30, %v3915_v34  ;;  %v1456_v29 = vsel %vm475_vm4, %v1455_v35, %v3929_v62 }
 0x221   :  { %3544 = vmatpush3.bf16.msra.mxu1 %v5258_v60  ;;  %3603 = vmatprep.subr.bf16.mxu0 %v5369_v25  ;;  %v1331_v46 = vsel %vm477_vm5, %v1330_v16, %v3920_v14  ;;  %v1457_v1 = vsel %vm477_vm5, %v1456_v29, %v3934_v56 }
 0x222   :  { %3545 = vmatprep.subr.bf16.mxu1 %v5265_v12  ;;  %v1335_v17 = vpack.c.bf16 %v1331_v46, %v1331_v46  ;;  %v1459_v57 = vpack.c.bf16 %v1457_v1, %v1457_v1  ;;  %v5730_v1 = vpop.permute.xlu0 %3952 }
 0x224   :  { %3604 = vmatpush3.bf16.msra.mxu0 %v5381_v53  ;;  %v5652_v63 = vrot.slane %v1335_v17, 1  ;;  %v5655_v31 = vrot.slane %v1459_v57, 2  ;;  %v3954_v17 = vunpack.i.l.bf16 %v5730_v1  ;;  %v5736_v57 = vpop.permute.xlu1 %3957 }
 0x225   :  { %3546 = vmatpush3.bf16.msra.mxu1 %v5277_v20  ;;  %3605 = vmatprep.subr.bf16.mxu0 %v5389_v26  ;;  %v3959_v21 = vunpack.i.l.bf16 %v5736_v57 }
 0x226   :  { %3547 = vmatprep.subr.bf16.mxu1 %v5285_v48  ;;  %v5744_v13 = vpop.permute.xlu0 %3962 }
 0x227   :  { %v3964_v49 = vunpack.i.l.bf16 %v5744_v13 }
 0x228   :  { %3606 = vmatpush3.bf16.msra.mxu0 %v5397_v19 }
 0x229   :  { %3548 = vmatpush3.bf16.msra.mxu1 %v5299_v7  ;;  %3607 = vmatprep.subr.bf16.mxu0 %v5405_v33 }
 0x22a   :  { %3549 = vmatprep.subr.bf16.mxu1 %v5306_v10 }
 0x22c   :  { %3608 = vmatpush3.bf16.msra.mxu0 %v5412_v4 }
 0x22d   :  { %3550 = vmatpush3.bf16.msra.mxu1 %v5317_v41  ;;  %3609 = vmatprep.subr.bf16.mxu0 %v5419_v44 }
 0x22e   :  { %3579 = vmatprep.subr.bf16.mxu1 %v5587_v9 }
 0x230   :  { %1416 = vmatmul.mubr.bf16.vlgmr.msra.gmra.mxu1 %v5652_v63  ;;  %3610 = vmatpush3.bf16.msra.mxu0 %v5431_v50 }
 0x231   :  { %3580 = vmatpush3.bf16.msra.mxu1 %v5184_v47  ;;  %1538 = vmatprep.mubr.bf16.mxu1 %v5655_v31 }
 0x232   :  { %3611 = vmatprep.subr.bf16.mxu0 %v5439_v8  ;;  %3581 = vmatprep.subr.bf16.mxu1 %v5191_v6 }
 0x234   :  { %3612 = vmatpush3.bf16.msra.mxu0 %v5516_v0 }
 0x235   :  { %3582 = vmatpush3.bf16.msra.mxu1 %v5204_v52  ;;  %3613 = vmatprep.subr.bf16.mxu0 %v5523_v11 }
 0x236   :  { %3583 = vmatprep.subr.bf16.mxu1 %v5210_v5 }
 0x238   :  { %3614 = vmatpush3.bf16.msra.mxu0 %v5530_v23 }
 0x239   :  { %3584 = vmatpush3.bf16.msra.mxu1 %v5223_v42  ;;  %3615 = vmatprep.subr.bf16.mxu0 %v5607_v27 }
 0x23a   :  { %3585 = vmatprep.subr.bf16.mxu1 %v5230_v45 }
 0x23c   :  { %3616 = vmatpush3.bf16.msra.mxu0 %v5541_v2 }
 0x23d   :  { %3586 = vmatpush3.bf16.msra.mxu1 %v5241_v38  ;;  %3645 = vmatprep.subr.bf16.mxu0 %v5457_v51 }
 0x23e   :  { %3587 = vmatprep.subr.bf16.mxu1 %v5250_v43 }
 0x23f   :  { %1632 = vmatmul.mubr.bf16.vlgmr.msra.gmra.mxu0 %v5582_v61  ;;  %v3935_v61 = vunpack.i.h.bf16 %v5628_v37 }
 0x240   :  { %3646 = vmatpush3.bf16.msra.mxu0 %v5468_v55  ;;  %1754 = vmatprep.mubr.bf16.mxu0 %v5590_v32  ;;  %v3944_v32 = vunpack.i.l.bf16 %v5687_v36 }
 0x241   :  { %3588 = vmatpush3.bf16.msra.mxu1 %v5258_v60  ;;  %3647 = vmatprep.subr.bf16.mxu0 %v5369_v25  ;;  %v1454_v34 = vsel %vm477_vm5, %v1453_v15, %v3935_v61  ;;  %v1711_v61 = vsel %vm473_vm3, %v5073_v54, %v3954_v17  ;;  %v1591_v15 = vsel %vm473_vm3, %v5061_v39, %v3940_v22  ;;  %v3950_v54 = vunpack.i.h.bf16 %v5694_v3  ;;  %v5777_v3 = vld [vmem:[%s6237_s4] ss:$0 sm:$0xff] }
 0x242   :  { %3589 = vmatprep.subr.bf16.mxu1 %v5265_v12  ;;  %v1595_v30 = vsel %vm475_vm4, %v1594_v24, %v3944_v32  ;;  %v1458_v62 = vpack.c.bf16 %v1454_v34, %v1454_v34  ;;  %v1712_v32 = vsel %vm475_vm4, %v1711_v61, %v3959_v21 }
 0x243   :  { %v1596_v40 = vsel %vm477_vm5, %v1595_v30, %v3949_v59 }
 0x244   :  { %3648 = vmatpush3.bf16.msra.mxu0 %v5381_v53  ;;  %v5712_v37 = vrot.slane %v1458_v62, 2  ;;  %v1598_v35 = vpack.c.bf16 %v1596_v40, %v1596_v40 }
 0x245   :  { %3590 = vmatpush3.bf16.msra.mxu1 %v5277_v20  ;;  %3649 = vmatprep.subr.bf16.mxu0 %v5389_v26 }
 0x246   :  { %3591 = vmatprep.subr.bf16.mxu1 %v5285_v48 }
 0x248   :  { %3650 = vmatpush3.bf16.msra.mxu0 %v5397_v19 }
 0x249   :  { %3592 = vmatpush3.bf16.msra.mxu1 %v5299_v7  ;;  %3651 = vmatprep.subr.bf16.mxu0 %v5405_v33 }
 0x24a   :  { %3593 = vmatprep.subr.bf16.mxu1 %v5306_v10 }
 0x24c   :  { %3652 = vmatpush3.bf16.msra.mxu0 %v5412_v4 }
 0x24d   :  { %3594 = vmatpush3.bf16.msra.mxu1 %v5317_v41  ;;  %3653 = vmatprep.subr.bf16.mxu0 %v5419_v44 }
 0x24e   :  { %3623 = vmatprep.subr.bf16.mxu1 %v5587_v9 }
 0x250   :  { %1539 = vmatmul.mubr.bf16.vlgmr.msra.gmra.mxu1 %v5712_v37  ;;  %3654 = vmatpush3.bf16.msra.mxu0 %v5431_v50  ;;  %v3353_v14 = vpop.f32.mrf.mxu1 }
 0x251   :  { %3624 = vmatpush3.bf16.msra.mxu1 %v5184_v47  ;;  %1671 = vmatprep.mubr.bf16.mxu1 %v1598_v35  ;;  %v6318_v35 = vld [vmem:[#allocation24_spill] sm:$0xff] }
 0x252   :  { %v3354_v16 = vpop.f32.mrf.mxu1  ;;  %3655 = vmatprep.subr.bf16.mxu0 %v5439_v8  ;;  %3625 = vmatprep.subr.bf16.mxu1 %v5191_v6 }
 0x253   :  { %v5720_v56 = vadd.f32 %v3354_v16, %v3353_v14 }
 0x254   :  { %3656 = vmatpush3.bf16.msra.mxu0 %v5516_v0  ;;  %v3356_v29 = vpop.f32.mrf.mxu1 }
 0x255   :  { %3626 = vmatpush3.bf16.msra.mxu1 %v5204_v52  ;;  %3657 = vmatprep.subr.bf16.mxu0 %v5523_v11 }
 0x256   :  { %v3357_v46 = vpop.f32.mrf.mxu1  ;;  %3627 = vmatprep.subr.bf16.mxu1 %v5210_v5 }
 0x257   :  { %v3965_v46 = vunpack.i.h.bf16 %v5744_v13 }
 0x258   :  { %3658 = vmatpush3.bf16.msra.mxu0 %v5530_v23 }
 0x259   :  { %3628 = vmatpush3.bf16.msra.mxu1 %v5223_v42  ;;  %3659 = vmatprep.subr.bf16.mxu0 %v5607_v27 }
 0x25a   :  { %3629 = vmatprep.subr.bf16.mxu1 %v5230_v45 }
 0x25c   :  { %3660 = vmatpush3.bf16.msra.mxu0 %v5541_v2 }
 0x25d   :  { %3630 = vmatpush3.bf16.msra.mxu1 %v5241_v38  ;;  %3689 = vmatprep.subr.bf16.mxu0 %v5457_v51 }
 0x25e   :  { %3631 = vmatprep.subr.bf16.mxu1 %v5250_v43 }
 0x25f   :  { %1755 = vmatmul.mubr.bf16.vlgmr.msra.gmra.mxu0 %v5652_v63  ;;  %v3397_v18 = vpop.f32.mrf.mxu0 }
 0x260   :  { %3690 = vmatpush3.bf16.msra.mxu0 %v5468_v55  ;;  %1877 = vmatprep.mubr.bf16.mxu0 %v5655_v31  ;;  %v3945_v31 = vunpack.i.h.bf16 %v5687_v36 }
 0x261   :  { %3632 = vmatpush3.bf16.msra.mxu1 %v5258_v60  ;;  %v3398_v51 = vpop.f32.mrf.mxu0  ;;  %3691 = vmatprep.subr.bf16.mxu0 %v5369_v25 }
 0x262   :  { %v5750_v63 = vadd.f32 %v3398_v51, %v3397_v18  ;;  %3633 = vmatprep.subr.bf16.mxu1 %v5265_v12  ;;  %v1592_v36 = vsel %vm475_vm4, %v1591_v15, %v3945_v31 }
 0x263   :  { %v3400_v55 = vpop.f32.mrf.mxu0  ;;  %v1593_v39 = vsel %vm477_vm5, %v1592_v36, %v3950_v54 }
 0x264   :  { %3692 = vmatpush3.bf16.msra.mxu0 %v5381_v53  ;;  %v1713_v53 = vsel %vm477_vm5, %v1712_v32, %v3964_v49  ;;  %v956_v49 = vadd.f32 %v5750_v63, %v5777_v3 }
 0x265   :  { %3634 = vmatpush3.bf16.msra.mxu1 %v5277_v20  ;;  %v3401_v25 = vpop.f32.mrf.mxu0  ;;  %3693 = vmatprep.subr.bf16.mxu0 %v5389_v26  ;;  %v1715_v24 = vpack.c.bf16 %v1713_v53, %v1713_v53  ;;  %v1597_v26 = vpack.c.bf16 %v1593_v39, %v1593_v39 }
 0x266   :  { %3635 = vmatprep.subr.bf16.mxu1 %v5285_v48 }
 0x268   :  { %3694 = vmatpush3.bf16.msra.mxu0 %v5397_v19  ;;  %v1719_v19 = vrot.slane %v1715_v24, 1 }
 0x269   :  { %3636 = vmatpush3.bf16.msra.mxu1 %v5299_v7  ;;  %3695 = vmatprep.subr.bf16.mxu0 %v5405_v33 }
 0x26a   :  { %3637 = vmatprep.subr.bf16.mxu1 %v5306_v10 }
 0x26c   :  { %3696 = vmatpush3.bf16.msra.mxu0 %v5412_v4 }
 0x26d   :  { %3638 = vmatpush3.bf16.msra.mxu1 %v5317_v41  ;;  %3697 = vmatprep.subr.bf16.mxu0 %v5419_v44  ;;  %v790_v44 = vadd.f32 %v5720_v56, %v5777_v3 }
 0x26e   :  { %3667 = vmatprep.subr.bf16.mxu1 %v5587_v9 }
 0x270   :  { %v3375_v33 = vpop.f32.mrf.mxu1  ;;  %1672 = vmatmul.mubr.bf16.vlgmr.msra.gmra.mxu1 %v1597_v26  ;;  %3698 = vmatpush3.bf16.msra.mxu0 %v5431_v50  ;;  %v4066_v26 = vld [vmem:[%s6238_s5 + $0x30] sm:$0xff]  }
 0x271   :  { %3668 = vmatpush3.bf16.msra.mxu1 %v5184_v47  ;;  %1794 = vmatprep.mubr.bf16.mxu1 %v1719_v19  ;;  %v4067_v19 = vld [vmem:[%s6238_s5 + $0x68] sm:$0xff]  }
 0x272   :  { %v3376_v4 = vpop.f32.mrf.mxu1  ;;  %3699 = vmatprep.subr.bf16.mxu0 %v5439_v8  ;;  %3669 = vmatprep.subr.bf16.mxu1 %v5191_v6  ;;  %v3968_v8 = vpop.permute.xlu1 %3967 }
 0x273   :  { %v3377_v34 = vadd.f32 %v3376_v4, %v3375_v33  ;;  %v3969_v62 = vunpack.i.l.bf16 %v3968_v8  ;;  %v4068_v33 = vld [vmem:[%s6238_s5 + $0x28] sm:$0xff]  }
 0x274   :  { %v3378_v59 = vpop.f32.mrf.mxu1  ;;  %3700 = vmatpush3.bf16.msra.mxu0 %v5516_v0  ;;  %v3955_v0 = vunpack.i.h.bf16 %v5730_v1 }
 0x275   :  { %v5786_v30 = vadd.f32 %v3377_v34, %v790_v44  ;;  %3670 = vmatpush3.bf16.msra.mxu1 %v5204_v52  ;;  %3701 = vmatprep.subr.bf16.mxu0 %v5523_v11  ;;  %v3973_v11 = vpop.permute.xlu0 %3972  ;;  %v4069_v44 = vld [vmem:[%s6238_s5 + $0x60] sm:$0xff]  }
 0x276   :  { %v3379_v50 = vpop.f32.mrf.mxu1  ;;  %3671 = vmatprep.subr.bf16.mxu1 %v5210_v5  ;;  %v3974_v14 = vunpack.i.l.bf16 %v3973_v11  ;;  %v3978_v16 = vpop.permute.xlu1 %3977 }
 0x277   :  { %v3979_v17 = vunpack.i.l.bf16 %v3978_v16 }
 0x278   :  { %3702 = vmatpush3.bf16.msra.mxu0 %v5530_v23  ;;  %v3960_v23 = vunpack.i.h.bf16 %v5736_v57 }
 0x279   :  { %3672 = vmatpush3.bf16.msra.mxu1 %v5223_v42  ;;  %3703 = vmatprep.subr.bf16.mxu0 %v5607_v27  ;;  %v1708_v27 = vsel %vm473_vm3, %v6318_v35, %v3955_v0  ;;  %v4071_v0 = vld [vmem:[%s6238_s5 + $0x58] sm:$0xff]   ;;  %v4075_v35 = vld [vmem:[%s6238_s5 + $0x48] sm:$0xff]  }
 0x27a   :  { %3673 = vmatprep.subr.bf16.mxu1 %v5230_v45 }
 0x27c   :  { %3704 = vmatpush3.bf16.msra.mxu0 %v5541_v2  ;;  %v1834_v2 = vsel %vm473_vm3, %v5081_v28, %v3969_v62 }
 0x27d   :  { %3674 = vmatpush3.bf16.msra.mxu1 %v5241_v38  ;;  %v1835_v57 = vsel %vm475_vm4, %v1834_v2, %v3974_v14 }
 0x27e   :  { %3675 = vmatprep.subr.bf16.mxu1 %v5250_v43  ;;  %v1836_v28 = vsel %vm477_vm5, %v1835_v57, %v3979_v17 }
 0x27f   :  { %v3441_v40 = vpop.f32.mrf.mxu0  ;;  %1878 = vmatmul.mubr.bf16.vlgmr.msra.gmra.mxu0 %v5712_v37  ;;  %v1709_v37 = vsel %vm475_vm4, %v1708_v27, %v3960_v23  ;;  %v1838_v13 = vpack.c.bf16 %v1836_v28, %v1836_v28  ;;  %v4074_v23 = vld [vmem:[%s6238_s5 + $0x10] sm:$0xff]   ;;  %v4076_v27 = vld [vmem:[%s6238_s5 + $0x8] sm:$0xff]  }
 0x280   :  { %v1710_v22 = vsel %vm477_vm5, %v1709_v37, %v3965_v46 }
 0x281   :  { %v3442_v56 = vpop.f32.mrf.mxu0  ;;  %3676 = vmatpush3.bf16.msra.mxu1 %v5258_v60  ;;  %v1714_v21 = vpack.c.bf16 %v1710_v22, %v1710_v22  ;;  %v1842_v61 = vrot.slane %v1838_v13, 2 }
 0x282   :  { %v3443_v29 = vadd.f32 %v3442_v56, %v3441_v40  ;;  %3677 = vmatprep.subr.bf16.mxu1 %v5265_v12  ;;  %v4073_v40 = vld [vmem:[%s6238_s5 + $0x50] sm:$0xff]   ;;  %v4077_v56 = vld [vmem:[%s6238_s5 + $0x40] sm:$0xff]  }
 0x283   :  { %v3444_v1 = vpop.f32.mrf.mxu0  ;;  %v1718_v51 = vrot.slane %v1714_v21, 1  ;;  %v4261_v21 = vmov 0.0  }
 0x284   :  { %v1122_v53 = vadd.f32 %v3443_v29, %v5777_v3  ;;  %v4078_v29 = vld [vmem:[%s6238_s5] sm:$0xff]  }
 0x285   :  { %v3445_v18 = vpop.f32.mrf.mxu0  ;;  %3678 = vmatpush3.bf16.msra.mxu1 %v5277_v20 }
 0x286   :  { %3679 = vmatprep.subr.bf16.mxu1 %v5285_v48 }
 0x289   :  { %3680 = vmatpush3.bf16.msra.mxu1 %v5299_v7 }
 0x28a   :  { %3681 = vmatprep.subr.bf16.mxu1 %v5306_v10 }
 0x28d   :  { %3682 = vmatpush3.bf16.msra.mxu1 %v5317_v41 }
 0x28e   :  { %3711 = vmatprep.subr.bf16.mxu1 %v5587_v9  ;;  %v3975_v9 = vunpack.i.h.bf16 %v3973_v11  ;;  %v4072_v11 = vld [vmem:[%s6238_s5 + $0x18] sm:$0xff]  }
 0x290   :  { %v3419_v55 = vpop.f32.mrf.mxu1  ;;  %1795 = vmatmul.mubr.bf16.vlgmr.msra.gmra.mxu1 %v1718_v51 }
 0x291   :  { %3712 = vmatpush3.bf16.msra.mxu1 %v5184_v47  ;;  %1917 = vmatprep.mubr.bf16.mxu1 %v1842_v61  ;;  %v3970_v47 = vunpack.i.h.bf16 %v3968_v8  ;;  %v4070_v8 = vld [vmem:[%s6238_s5 + $0x20] sm:$0xff]  }
 0x292   :  { %v3420_v31 = vpop.f32.mrf.mxu1  ;;  %3713 = vmatprep.subr.bf16.mxu1 %v5191_v6 }
 0x293   :  { %v3421_v15 = vadd.f32 %v3420_v31, %v3419_v55  ;;  %v1831_v63 = vsel %vm473_vm3, %v5077_v58, %v3970_v47 }
 0x294   :  { %v3422_v32 = vpop.f32.mrf.mxu1 }
 0x295   :  { %v5822_v25 = vadd.f32 %v3421_v15, %v956_v49  ;;  %3714 = vmatpush3.bf16.msra.mxu1 %v5204_v52  ;;  %v3980_v52 = vunpack.i.h.bf16 %v3978_v16 }
 0x296   :  { %v3423_v54 = vpop.f32.mrf.mxu1  ;;  %3715 = vmatprep.subr.bf16.mxu1 %v5210_v5 }
 0x297   :  { %v1001_v18 = vmax.f32 %v5822_v25, 0.0 }
 0x299   :  { %3716 = vmatpush3.bf16.msra.mxu1 %v5223_v42  ;;  %v1832_v42 = vsel %vm475_vm4, %v1831_v63, %v3975_v9  ;;  %v4083_v9 = vld [vmem:[%s6238_s5 + $0xf8] sm:$0xff]  }
 0x29a   :  { %3717 = vmatprep.subr.bf16.mxu1 %v5230_v45  ;;  %v4084_v63 = vld [vmem:[%s6238_s5 + $0xb8] sm:$0xff]  }
 0x29d   :  { %3718 = vmatpush3.bf16.msra.mxu1 %v5241_v38  ;;  %v1833_v38 = vsel %vm477_vm5, %v1832_v42, %v3980_v52  ;;  %v4086_v52 = vld [vmem:[%s6238_s5 + $0xb0] sm:$0xff]   ;;  %v4087_v42 = vld [vmem:[%s6238_s5 + $0xe8] sm:$0xff]  }
 0x29e   :  { %3719 = vmatprep.subr.bf16.mxu1 %v5250_v43  ;;  %v1837_v43 = vpack.c.bf16 %v1833_v38, %v1833_v38 }
 0x29f   :  { %v3485_v6 = vpop.f32.mrf.mxu0 }
 0x2a0   :  { %v1841_v58 = vrot.slane %v1837_v43, 2  ;;  %v4088_v43 = vld [vmem:[%s6238_s5 + $0xa8] sm:$0xff]  }
 0x2a1   :  { %v3486_v36 = vpop.f32.mrf.mxu0  ;;  %3720 = vmatpush3.bf16.msra.mxu1 %v5258_v60 }
 0x2a2   :  { %3721 = vmatprep.subr.bf16.mxu1 %v5265_v12  ;;  %v3487_v14 = vadd.f32 %v3486_v36, %v3485_v6  ;;  %v4085_v36 = vld [vmem:[%s6238_s5 + $0xf0] sm:$0xff]  }
 0x2a3   :  { %v3488_v5 = vpop.f32.mrf.mxu0 }
 0x2a4   :  { %v1255_v46 = vadd.f32 %v3487_v14, %v5777_v3 }
 0x2a5   :  { %v3489_v45 = vpop.f32.mrf.mxu0  ;;  %3722 = vmatpush3.bf16.msra.mxu1 %v5277_v20 }
 0x2a6   :  { %3723 = vmatprep.subr.bf16.mxu1 %v5285_v48 }
 0x2a9   :  { %3724 = vmatpush3.bf16.msra.mxu1 %v5299_v7  ;;  %v4063_v7 = vld [vmem:[%s6238_s5 + $0x78] sm:$0xff]  }
 0x2aa   :  { %3725 = vmatprep.subr.bf16.mxu1 %v5306_v10  ;;  %v4064_v10 = vld [vmem:[%s6238_s5 + $0x38] sm:$0xff]   ;;  %3733 = vmatprep.subr.bf16.mxu0 %v4063_v7  ;;  %v4094_v7 = vld [vmem:[%s6238_s5 + $0x90] sm:$0xff]  }
 0x2ab   :  { %3734 = vmatpush3.bf16.msra.mxu0 %v4064_v10  ;;  %v4095_v10 = vld [vmem:[%s6238_s5 + $0xc8] sm:$0xff]  }
 0x2ad   :  { %3726 = vmatpush3.bf16.msra.mxu1 %v5317_v41  ;;  %v4065_v41 = vld [vmem:[%s6238_s5 + $0x70] sm:$0xff]  }
 0x2ae   :  { %3735 = vmatprep.subr.bf16.mxu0 %v4065_v41  ;;  %3755 = vmatprep.subr.bf16.mxu1 %v4083_v9 }
 0x2af   :  { %3736 = vmatpush3.bf16.msra.mxu0 %v4066_v26 }
 0x2b0   :  { %v3463_v60 = vpop.f32.mrf.mxu1  ;;  %1918 = vmatmul.mubr.bf16.vlgmr.msra.gmra.mxu1 %v1841_v58  ;;  %3737 = vmatprep.subr.bf16.mxu0 %v4067_v19  ;;  %v4096_v19 = vld [vmem:[%s6238_s5 + $0x88] sm:$0xff]  }
 0x2b1   :  { %3756 = vmatpush3.bf16.msra.mxu1 %v4084_v63 }
 0x2b2   :  { %v3464_v12 = vpop.f32.mrf.mxu1  ;;  %3757 = vmatprep.subr.bf16.mxu1 %v4085_v36 }
 0x2b3   :  { %v3465_v39 = vadd.f32 %v3464_v12, %v3463_v60  ;;  %3738 = vmatpush3.bf16.msra.mxu0 %v4068_v33  ;;  %v4089_v60 = vld [vmem:[%s6238_s5 + $0xe0] sm:$0xff]  }
 0x2b4   :  { %v3466_v24 = vpop.f32.mrf.mxu1  ;;  %3739 = vmatprep.subr.bf16.mxu0 %v4069_v44 }
 0x2b5   :  { %v5842_v20 = vadd.f32 %v3465_v39, %v1122_v53  ;;  %3758 = vmatpush3.bf16.msra.mxu1 %v4086_v52  ;;  %v4090_v53 = vld [vmem:[%s6238_s5 + $0xa0] sm:$0xff]   ;;  %v4091_v39 = vld [vmem:[%s6238_s5 + $0xd8] sm:$0xff]  }
 0x2b6   :  { %v3467_v48 = vpop.f32.mrf.mxu1  ;;  %3759 = vmatprep.subr.bf16.mxu1 %v4087_v42  ;;  %v4092_v24 = vld [vmem:[%s6238_s5 + $0x98] sm:$0xff]   ;;  %v4082_v42 = vld [vmem:[%s6238_s5 + $0x100] sm:$0xff]  }
 0x2b7   :  { %3740 = vmatpush3.bf16.msra.mxu0 %v4070_v8  ;;  %v4093_v48 = vld [vmem:[%s6238_s5 + $0xd0] sm:$0xff]  }
 0x2b8   :  { %3741 = vmatprep.subr.bf16.mxu0 %v4071_v0 }
 0x2b9   :  { %3760 = vmatpush3.bf16.msra.mxu1 %v4088_v43 }
 0x2ba   :  { %3761 = vmatprep.subr.bf16.mxu1 %v4089_v60 }
 0x2bb   :  { %3742 = vmatpush3.bf16.msra.mxu0 %v4072_v11 }
 0x2bc   :  { %3743 = vmatprep.subr.bf16.mxu0 %v4073_v40 }
 0x2bd   :  { %3762 = vmatpush3.bf16.msra.mxu1 %v4090_v53 }
 0x2be   :  { %3763 = vmatprep.subr.bf16.mxu1 %v4091_v39 }
 0x2bf   :  { %v3529_v4 = vpop.f32.mrf.mxu0  ;;  %3744 = vmatpush3.bf16.msra.mxu0 %v4074_v23 }
 0x2c0   :  { %3745 = vmatprep.subr.bf16.mxu0 %v4075_v35 }
 0x2c1   :  { %v3530_v34 = vpop.f32.mrf.mxu0  ;;  %3764 = vmatpush3.bf16.msra.mxu1 %v4092_v24 }
 0x2c2   :  { %v3531_v59 = vadd.f32 %v3530_v34, %v3529_v4  ;;  %3765 = vmatprep.subr.bf16.mxu1 %v4093_v48 }
 0x2c3   :  { %v3532_v50 = vpop.f32.mrf.mxu0  ;;  %3746 = vmatpush3.bf16.msra.mxu0 %v4076_v27 }
 0x2c4   :  { %3747 = vmatprep.subr.bf16.mxu0 %v4077_v56  ;;  %v1378_v32 = vadd.f32 %v3531_v59, %v5777_v3 }
 0x2c5   :  { %v3533_v62 = vpop.f32.mrf.mxu0  ;;  %3766 = vmatpush3.bf16.msra.mxu1 %v4094_v7  ;;  %v4101_v7 = vld [vmem:[%s6240_s7 + $0x64] ss:$16 sps:$4 sm:$0xff]  }
 0x2c6   :  { %3767 = vmatprep.subr.bf16.mxu1 %v4095_v10 }
 0x2c7   :  { %3748 = vmatpush3.bf16.msra.mxu0 %v4078_v29 }
 0x2c8   :  { %3782 = vmatprep.subr.bf16.mxu0 %v4261_v21 }
 0x2c9   :  { %3768 = vmatpush3.bf16.msra.mxu1 %v4096_v19 }
 0x2d0   :  { %v3507_v16 = vpop.f32.mrf.mxu1 }
 0x2d2   :  { %v3508_v2 = vpop.f32.mrf.mxu1 }
 0x2d3   :  { %v3509_v1 = vadd.f32 %v3508_v2, %v3507_v16 }
 0x2d4   :  { %v3510_v37 = vpop.f32.mrf.mxu1 }
 0x2d5   :  { %v1295_v17 = vadd.f32 %v3509_v1, %v1255_v46  ;;  %v835_v37 = vmax.f32 %v5786_v30, 0.0  ;;  %v4097_v30 = vld [vmem:[%s6238_s5 + $0xc0] sm:$0xff]  }
 0x2d6   :  { %v3511_v57 = vpop.f32.mrf.mxu1  ;;  %3769 = vmatprep.subr.bf16.mxu1 %v4097_v30 }
 0x2d7   :  { %v1300_v22 = vmax.f32 %v1295_v17, 0.0  ;;  %v1167_v17 = vmax.f32 %v5842_v20, 0.0  ;;  %v4098_v20 = vld [vmem:[%s6238_s5 + $0x80] sm:$0xff]  }
 0x2d8   :  { %3770 = vmatpush3.bf16.msra.mxu1 %v4098_v20 }
 0x2d9   :  { %v3981_v28 = vpack.i.bf16 %v1001_v18, %v1300_v22  ;;  %2500 = vmatprep.subr.bf16.mxu1 %v4101_v7  ;;  %v4147_v7 = vld [vmem:[%s6242_s9 + $0x30] ss:$8 sps:$4 sm:$0xff]  }
 0x2db   :  { %3982 = vrot.lane.b32.xlu0 %v3981_v28, %s4260_s18 }
 0x2df   :  { %v3573_v13 = vpop.f32.mrf.mxu0 }
 0x2e1   :  { %v3574_v51 = vpop.f32.mrf.mxu0 }
 0x2e2   :  { %v3575_v61 = vadd.f32 %v3574_v51, %v3573_v13 }
 0x2e3   :  { %v3576_v55 = vpop.f32.mrf.mxu0 }
 0x2e4   :  { %v1501_v33 = vadd.f32 %v3575_v61, %v5777_v3 }
 0x2e5   :  { %v3577_v31 = vpop.f32.mrf.mxu0 }
 0x2e6   :  { %v4079_v31 = vld [vmem:[%s6238_s5 + $0x118] sm:$0xff]  }
 0x2f0   :  { %v3551_v49 = vpop.f32.mrf.mxu1 }
 0x2f2   :  { %v3552_v15 = vpop.f32.mrf.mxu1 }
 0x2f3   :  { %v3553_v54 = vadd.f32 %v3552_v15, %v3551_v49 }
 0x2f4   :  { %v3554_v47 = vpop.f32.mrf.mxu1 }
 0x2f5   :  { %v5897_v6 = vadd.f32 %v3553_v54, %v1378_v32 }
 0x2f6   :  { %v3555_v25 = vpop.f32.mrf.mxu1 }
 0x2f7   :  { %v4080_v25 = vld [vmem:[%s6238_s5 + $0x110] sm:$0xff]  }
 0x2ff   :  { %v3617_v5 = vpop.f32.mrf.mxu0 }
 0x301   :  { %v3618_v45 = vpop.f32.mrf.mxu0 }
 0x302   :  { %v3619_v38 = vadd.f32 %v3618_v45, %v3617_v5  ;;  %v4081_v5 = vld [vmem:[%s6238_s5 + $0x108] sm:$0xff]  }
 0x303   :  { %v3620_v58 = vpop.f32.mrf.mxu0 }
 0x304   :  { %v1634_v23 = vadd.f32 %v3619_v38, %v5777_v3 }
 0x305   :  { %v3621_v12 = vpop.f32.mrf.mxu0 }
 0x310   :  { %v3595_v41 = vpop.f32.mrf.mxu1 }
 0x312   :  { %v3596_v26 = vpop.f32.mrf.mxu1 }
 0x313   :  { %v3597_v4 = vadd.f32 %v3596_v26, %v3595_v41  ;;  %v1423_v41 = vmax.f32 %v5897_v6, 0.0  ;;  %v4105_v6 = vld [vmem:[%s6240_s7 + $0x40] ss:$16 sps:$4 sm:$0xff]  }
 0x314   :  { %v3598_v44 = vpop.f32.mrf.mxu1 }
 0x315   :  { %v1541_v34 = vadd.f32 %v3597_v4, %v1501_v33 }
 0x316   :  { %v3599_v59 = vpop.f32.mrf.mxu1 }
 0x317   :  { %v1546_v63 = vmax.f32 %v1541_v34, 0.0 }
 0x31f   :  { %v3661_v50 = vpop.f32.mrf.mxu0 }
 0x321   :  { %v3662_v8 = vpop.f32.mrf.mxu0 }
 0x322   :  { %v3663_v22 = vadd.f32 %v3662_v8, %v3661_v50  ;;  %v4099_v50 = vld [vmem:[%s6240_s7 + $0x60] ss:$16 sps:$4 sm:$0xff]  }
 0x323   :  { %v3664_v0 = vpop.f32.mrf.mxu0 }
 0x324   :  { %v1757_v15 = vadd.f32 %v3663_v22, %v5777_v3  ;;  %v4107_v0 = vld [vmem:[%s6240_s7 + $0x44] ss:$16 sps:$4 sm:$0xff]  }
 0x325   :  { %v3665_v62 = vpop.f32.mrf.mxu0 }
 0x326   :  { %v4108_v62 = vld [vmem:[%s6240_s7 + $0x48] ss:$16 sps:$4 sm:$0xff]  }
 0x330   :  { %v3639_v11 = vpop.f32.mrf.mxu1 }
 0x332   :  { %v3640_v40 = vpop.f32.mrf.mxu1 }
 0x333   :  { %v3641_v35 = vadd.f32 %v3640_v40, %v3639_v11  ;;  %v4110_v11 = vld [vmem:[%s6240_s7 + $0x4c] ss:$16 sps:$4 sm:$0xff]  }
 0x334   :  { %v3642_v27 = vpop.f32.mrf.mxu1 }
 0x335   :  { %v5943_v14 = vadd.f32 %v3641_v35, %v1634_v23 }
 0x336   :  { %v3643_v16 = vpop.f32.mrf.mxu1 }
 0x337   :  { %v1679_v26 = vmax.f32 %v5943_v14, 0.0  ;;  %v4111_v14 = vld [vmem:[%s6240_s7 + $0x20] ss:$16 sps:$4 sm:$0xff]   ;;  %v4113_v16 = vld [vmem:[%s6240_s7 + $0x24] ss:$16 sps:$4 sm:$0xff]  }
 0x33f   :  { %v3705_v56 = vpop.f32.mrf.mxu0 }
 0x341   :  { %v3706_v2 = vpop.f32.mrf.mxu0 }
 0x342   :  { %v3707_v45 = vadd.f32 %v3706_v2, %v3705_v56  ;;  %v4114_v56 = vld [vmem:[%s6240_s7 + $0x28] ss:$16 sps:$4 sm:$0xff]   ;;  %v4116_v2 = vld [vmem:[%s6240_s7 + $0x2c] ss:$16 sps:$4 sm:$0xff]  }
 0x343   :  { %v3708_v29 = vpop.f32.mrf.mxu0 }
 0x344   :  { %v1880_v58 = vadd.f32 %v3707_v45, %v5777_v3  ;;  %v4104_v3 = vld [vmem:[%s6240_s7 + $0x6c] ss:$16 sps:$4 sm:$0xff]   ;;  %v4119_v29 = vld [vmem:[%s6240_s7 + $0x4] ss:$16 sps:$4 sm:$0xff]  }
 0x345   :  { %v3709_v46 = vpop.f32.mrf.mxu0  ;;  %v4137_v45 = vld [vmem:[%s6242_s9 + $0x54] ss:$8 sps:$4 sm:$0xff]  }
 0x346   :  { %v4122_v46 = vld [vmem:[%s6240_s7 + $0xc] ss:$16 sps:$4 sm:$0xff]  }
 0x34d   :  { %v3983_v1 = vpop.permute.xlu0 %3982 }
 0x34e   :  { %v3985_v57 = vunpack.i.h.bf16 %v3983_v1  ;;  %v3984_v18 = vunpack.i.l.bf16 %v3983_v1  ;;  %v4117_v1 = vld [vmem:[%s6240_s7] ss:$16 sps:$4 sm:$0xff]  }
 0x350   :  { %v1942_v28 = vsel %vm475_vm4, %v835_v37, %v3985_v57  ;;  %v3683_v13 = vpop.f32.mrf.mxu1  ;;  %v1943_v51 = vsel %vm475_vm4, %v1167_v17, %v3984_v18  ;;  %v4120_v37 = vld [vmem:[%s6240_s7 + $0x8] ss:$16 sps:$4 sm:$0xff]   ;;  %v4125_v17 = vld [vmem:[%s6242_s9 + $0x74] ss:$8 sps:$4 sm:$0xff]   ;;  %v4263_v57 = vmov 0  }
 0x351   :  { %v1946_v61 = vpack.c.bf16 %v1942_v28, %v1942_v28  ;;  %v1947_v55 = vpack.c.bf16 %v1943_v51, %v1943_v51  ;;  %v4128_v18 = vld [vmem:[%s6242_s9 + $0x174] ss:$8 sps:$4 sm:$0xff]  }
 0x352   :  { %v3684_v49 = vpop.f32.mrf.mxu1 }
 0x353   :  { %v3685_v32 = vadd.f32 %v3684_v49, %v3683_v13  ;;  %2281 = vmatprep.mubr.bf16.mxu0 %v1947_v55 }
 0x354   :  { %v3686_v54 = vpop.f32.mrf.mxu1  ;;  %2282 = vmatmul.mubr.bf16.vlgmr.msra.gmra.mxu0 %v1946_v61  ;;  %v3152_v61 = vld [vmem:[%s6239_s6] ss:$0 sm:$0xff] }
 0x355   :  { %v1797_v47 = vadd.f32 %v3685_v32, %v1757_v15  ;;  %3783 = vmatpush3.bf16.msra.mxu0 %v4079_v31  ;;  %3790 = vmatprep.mubr.msk.bf16.mxu0 %vm4262_vm6, %v4261_v21 }
 0x356   :  { %v3687_v9 = vpop.f32.mrf.mxu1  ;;  %3784 = vmatprep.subr.bf16.mxu0 %v4261_v21 }
 0x357   :  { %v1802_v36 = vmax.f32 %v1797_v47, 0.0  ;;  %v4126_v9 = vld [vmem:[%s6242_s9 + $0x170] ss:$8 sps:$4 sm:$0xff]  }
 0x359   :  { %v3986_v52 = vpack.i.bf16 %v1546_v63, %v1802_v36  ;;  %3785 = vmatpush3.bf16.msra.mxu0 %v4080_v25  ;;  %v4123_v25 = vld [vmem:[%s6242_s9 + $0x70] ss:$8 sps:$4 sm:$0xff]   ;;  %v4131_v36 = vld [vmem:[%s6242_s9 + $0x64] ss:$8 sps:$4 sm:$0xff]  }
 0x35a   :  { %3786 = vmatprep.subr.bf16.mxu0 %v4261_v21 }
 0x35b   :  { %3987 = vrot.lane.b32.xlu1 %v3986_v52, %s4260_s18  ;;  %v4134_v52 = vld [vmem:[%s6242_s9 + $0x164] ss:$8 sps:$4 sm:$0xff]  }
 0x35d   :  { %3787 = vmatpush3.bf16.msra.mxu0 %v4081_v5  ;;  %v4129_v5 = vld [vmem:[%s6242_s9 + $0x60] ss:$8 sps:$4 sm:$0xff]  }
 0x35e   :  { %3788 = vmatprep.subr.bf16.mxu0 %v4261_v21  ;;  %v4102_v21 = vld [vmem:[%s6240_s7 + $0x68] ss:$16 sps:$4 sm:$0xff]  }
 0x361   :  { %3789 = vmatpush3.bf16.msra.mxu0 %v4082_v42  ;;  %v4132_v42 = vld [vmem:[%s6242_s9 + $0x160] ss:$8 sps:$4 sm:$0xff]  }
 0x362   :  { %2541 = vmatprep.subr.bf16.mxu0 %v4104_v3  ;;  %v4155_v3 = vld [vmem:[%s6242_s9 + $0x24] ss:$8 sps:$4 sm:$0xff]  }
 0x370   :  { %v3727_v38 = vpop.f32.mrf.mxu1 }
 0x372   :  { %v3728_v43 = vpop.f32.mrf.mxu1 }
 0x373   :  { %v3729_v60 = vadd.f32 %v3728_v43, %v3727_v38  ;;  %v4140_v38 = vld [vmem:[%s6242_s9 + $0x154] ss:$8 sps:$4 sm:$0xff]   ;;  %v4135_v43 = vld [vmem:[%s6242_s9 + $0x50] ss:$8 sps:$4 sm:$0xff]  }
 0x374   :  { %v3730_v12 = vpop.f32.mrf.mxu1 }
 0x375   :  { %v1920_v53 = vadd.f32 %v3729_v60, %v1880_v58  ;;  %v4138_v58 = vld [vmem:[%s6242_s9 + $0x150] ss:$8 sps:$4 sm:$0xff]   ;;  %v4143_v60 = vld [vmem:[%s6242_s9 + $0x44] ss:$8 sps:$4 sm:$0xff]  }
 0x376   :  { %v3731_v39 = vpop.f32.mrf.mxu1  ;;  %v4146_v12 = vld [vmem:[%s6242_s9 + $0x144] ss:$8 sps:$4 sm:$0xff]  }
 0x377   :  { %v1925_v24 = vmax.f32 %v1920_v53, 0.0  ;;  %v4141_v53 = vld [vmem:[%s6242_s9 + $0x40] ss:$8 sps:$4 sm:$0xff]  }
 0x378   :  { %v4144_v39 = vld [vmem:[%s6242_s9 + $0x140] ss:$8 sps:$4 sm:$0xff]  }
 0x379   :  { %v1950_v48 = vpack.c.bf16 %v1925_v24, %v1925_v24  ;;  %v4149_v24 = vld [vmem:[%s6242_s9 + $0x34] ss:$8 sps:$4 sm:$0xff]  }
 0x37b   :  { %3791 = vmatmul.mubr.msk.bf16.vlgmr.msra.gmra.mxu0 %vm475_vm4, %v1950_v48  ;;  %v4152_v48 = vld [vmem:[%s6242_s9 + $0x134] ss:$8 sps:$4 sm:$0xff]  }
 0x37c   :  { %2542 = vmatpush1.bf16.msra.mxu0 %v4102_v21  ;;  %2565 = vmatprep.mubr.bf16.mxu0 %v4263_v57  ;;  %v4150_v21 = vld [vmem:[%s6242_s9 + $0x130] ss:$8 sps:$4 sm:$0xff]  }
 0x37d   :  { %2543 = vmatprep.subr.bf16.mxu0 %v4110_v11  ;;  %v4174_v11 = vld [vmem:[%s6242_s9 + $0x1f0] ss:$8 sps:$4 sm:$0xff]  }
 0x380   :  { %2544 = vmatpush1.bf16.msra.mxu0 %v4108_v62  ;;  %v4171_v62 = vld [vmem:[%s6242_s9 + $0xf0] ss:$8 sps:$4 sm:$0xff]  }
 0x381   :  { %2545 = vmatprep.subr.bf16.mxu0 %v4116_v2  ;;  %v4186_v2 = vld [vmem:[%s6242_s9 + $0x1d0] ss:$8 sps:$4 sm:$0xff]  }
 0x384   :  { %2546 = vmatpush1.bf16.msra.mxu0 %v4114_v56  ;;  %v4183_v56 = vld [vmem:[%s6242_s9 + $0xd0] ss:$8 sps:$4 sm:$0xff]  }
 0x385   :  { %2547 = vmatprep.subr.bf16.mxu0 %v4122_v46  ;;  %v4194_v46 = vld [vmem:[%s6242_s9 + $0x1c4] ss:$8 sps:$4 sm:$0xff]  }
 0x388   :  { %2548 = vmatpush1.bf16.msra.mxu0 %v4120_v37  ;;  %v4192_v37 = vld [vmem:[%s6242_s9 + $0x1c0] ss:$8 sps:$4 sm:$0xff]  }
 0x389   :  { %3019 = vmatprep.subr.bf16.mxu0 %v4128_v18  ;;  %v4195_v18 = vld [vmem:[%s6242_s9 + $0xb0] ss:$8 sps:$4 sm:$0xff]  }
 0x3cd   :  { %v3988_v10 = vpop.permute.xlu1 %3987 }
 0x3ce   :  { %v3990_v19 = vunpack.i.h.bf16 %v3988_v10  ;;  %v3989_v33 = vunpack.i.l.bf16 %v3988_v10  ;;  %v4158_v10 = vld [vmem:[%s6242_s9 + $0x124] ss:$8 sps:$4 sm:$0xff]  }
 0x3d0   :  { %v1944_v4 = vsel %vm475_vm4, %v1423_v41, %v3990_v19  ;;  %v1945_v44 = vsel %vm475_vm4, %v1679_v26, %v3989_v33  ;;  %v4153_v41 = vld [vmem:[%s6242_s9 + $0x20] ss:$8 sps:$4 sm:$0xff]   ;;  %v4161_v19 = vld [vmem:[%s6242_s9 + $0x14] ss:$8 sps:$4 sm:$0xff]  }
 0x3d1   :  { %v1948_v34 = vpack.c.bf16 %v1944_v4, %v1944_v4  ;;  %v1949_v59 = vpack.c.bf16 %v1945_v44, %v1945_v44  ;;  %v4156_v26 = vld [vmem:[%s6242_s9 + $0x120] ss:$8 sps:$4 sm:$0xff]   ;;  %v4164_v33 = vld [vmem:[%s6242_s9 + $0x114] ss:$8 sps:$4 sm:$0xff]   ;;  %v4159_v4 = vld [vmem:[%s6242_s9 + $0x10] ss:$8 sps:$4 sm:$0xff]  }
 0x3d2   :  { %v4162_v44 = vld [vmem:[%s6242_s9 + $0x110] ss:$8 sps:$4 sm:$0xff]  }
 0x3d3   :  { %2321 = vmatprep.mubr.bf16.mxu1 %v1949_v59  ;;  %v4170_v59 = vld [vmem:[%s6242_s9 + $0x104] ss:$8 sps:$4 sm:$0xff]  }
 0x3d4   :  { %2322 = vmatmul.mubr.bf16.vlgmr.msra.gmra.mxu1 %v1948_v34  ;;  %v4167_v34 = vld [vmem:[%s6242_s9 + $0x4] ss:$8 sps:$4 sm:$0xff]  }
 0x3d5   :  { %2501 = vmatpush1.bf16.msra.mxu1 %v4099_v50  ;;  %2524 = vmatprep.mubr.bf16.mxu1 %v4263_v57  ;;  %v4165_v50 = vld [vmem:[%s6242_s9] ss:$8 sps:$4 sm:$0xff]   ;;  %v4200_v57 = vld [vmem:[%s6242_s9 + $0x1b4] ss:$8 sps:$4 sm:$0xff]  }
 0x3d6   :  { %2502 = vmatprep.subr.bf16.mxu1 %v4107_v0  ;;  %v4176_v0 = vld [vmem:[%s6242_s9 + $0x1f4] ss:$8 sps:$4 sm:$0xff]  }
 0x3d9   :  { %2503 = vmatpush1.bf16.msra.mxu1 %v4105_v6  ;;  %v4173_v6 = vld [vmem:[%s6242_s9 + $0xf4] ss:$8 sps:$4 sm:$0xff]  }
 0x3da   :  { %2504 = vmatprep.subr.bf16.mxu1 %v4113_v16  ;;  %v4188_v16 = vld [vmem:[%s6242_s9 + $0x1d4] ss:$8 sps:$4 sm:$0xff]  }
 0x3dd   :  { %2505 = vmatpush1.bf16.msra.mxu1 %v4111_v14  ;;  %v4185_v14 = vld [vmem:[%s6242_s9 + $0xd4] ss:$8 sps:$4 sm:$0xff]  }
 0x3de   :  { %2506 = vmatprep.subr.bf16.mxu1 %v4119_v29  ;;  %v4191_v29 = vld [vmem:[%s6242_s9 + $0xc4] ss:$8 sps:$4 sm:$0xff]  }
 0x3e1   :  { %2507 = vmatpush1.bf16.msra.mxu1 %v4117_v1  ;;  %v4189_v1 = vld [vmem:[%s6242_s9 + $0xc0] ss:$8 sps:$4 sm:$0xff]  }
 0x3e2   :  { %2978 = vmatprep.subr.bf16.mxu1 %v4125_v17  ;;  %v4197_v17 = vld [vmem:[%s6242_s9 + $0xb4] ss:$8 sps:$4 sm:$0xff]  }
 0x414   :  { %v3749_v8 = vpop.f32.mrf.mxu0 }
 0x416   :  { %v3750_v40 = vpop.f32.mrf.mxu0 }
 0x417   :  { %v3751_v23 = vadd.f32 %v3750_v40, %v3749_v8  ;;  %v4168_v8 = vld [vmem:[%s6242_s9 + $0x100] ss:$8 sps:$4 sm:$0xff]   ;;  %v4179_v40 = vld [vmem:[%s6242_s9 + $0xe4] ss:$8 sps:$4 sm:$0xff]  }
 0x418   :  { %v3752_v35 = vpop.f32.mrf.mxu0 }
 0x419   :  { %v2284_v30 = vadd.f32 %v3751_v23, %v3152_v61  ;;  %v4182_v23 = vld [vmem:[%s6242_s9 + $0x1e4] ss:$8 sps:$4 sm:$0xff]   ;;  %v4177_v35 = vld [vmem:[%s6242_s9 + $0xe0] ss:$8 sps:$4 sm:$0xff]  }
 0x41a   :  { %v3753_v27 = vpop.f32.mrf.mxu0  ;;  %v4204_v61 = vld [vmem:[%s6242_s9 + $0x1a0] ss:$8 sps:$4 sm:$0xff]  }
 0x41b   :  { %v4180_v27 = vld [vmem:[%s6242_s9 + $0x1e0] ss:$8 sps:$4 sm:$0xff]  }
 0x43b   :  { %v2363_v22 = vpop.f32.mrf.mxu0 }
 0x43d   :  { %v3792_v28 = vpop.f32.mrf.mxu0 }
 0x43e   :  { %v4203_v28 = vld [vmem:[%s6242_s9 + $0xa4] ss:$8 sps:$4 sm:$0xff]  }
 0x43f   :  { %v2366_v13 = vpop.f32.mrf.mxu0 }
 0x440   :  { %v4206_v13 = vld [vmem:[%s6242_s9 + $0x1a4] ss:$8 sps:$4 sm:$0xff]  }
 0x441   :  { %v3793_v51 = vpop.f32.mrf.mxu0 }
 0x442   :  { %v4201_v51 = vld [vmem:[%s6242_s9 + $0xa0] ss:$8 sps:$4 sm:$0xff]  }
 0x494   :  { %v3771_v55 = vpop.f32.mrf.mxu1 }
 0x496   :  { %v3772_v31 = vpop.f32.mrf.mxu1 }
 0x497   :  { %v3773_v20 = vadd.f32 %v3772_v31, %v3771_v55  ;;  %v4207_v55 = vld [vmem:[%s6242_s9 + $0x90] ss:$8 sps:$4 sm:$0xff]   ;;  %v4209_v31 = vld [vmem:[%s6242_s9 + $0x94] ss:$8 sps:$4 sm:$0xff]  }
 0x498   :  { %v3774_v49 = vpop.f32.mrf.mxu1 }
 0x499   :  { %v2324_v15 = vadd.f32 %v3773_v20, %v2284_v30  ;;  %v4210_v30 = vld [vmem:[%s6242_s9 + $0x190] ss:$8 sps:$4 sm:$0xff]   ;;  %v4212_v20 = vld [vmem:[%s6242_s9 + $0x194] ss:$8 sps:$4 sm:$0xff]   ;;  %v4215_v49 = vld [vmem:[%s6242_s9 + $0x84] ss:$8 sps:$4 sm:$0xff]  }
 0x49a   :  { %v3775_v32 = vpop.f32.mrf.mxu1 }
 0x49b   :  { %v2364_v54 = vadd.f32 %v2363_v22, %v2324_v15  ;;  %v4198_v22 = vld [vmem:[%s6242_s9 + $0x1b0] ss:$8 sps:$4 sm:$0xff]   ;;  %v4218_v15 = vld [vmem:[%s6242_s9 + $0x184] ss:$8 sps:$4 sm:$0xff]   ;;  %v4213_v32 = vld [vmem:[%s6242_s9 + $0x80] ss:$8 sps:$4 sm:$0xff]  }
 0x49d   :  { %v2369_v47 = vmax.f32 %v2364_v54, 0.0  ;;  %v4216_v54 = vld [vmem:[%s6242_s9 + $0x180] ss:$8 sps:$4 sm:$0xff]  }
 0x49f   :  { %v2370_v63 = vpack.c.bf16 %v2369_v47, %v2369_v47  ;;  %v2389_v47 = vlaneseq }
 0x4a1   :  { %3206 = vmatmul.mubr.msk.bf16.vlgmr.msra.gmra.mxu1 %vm475_vm4, %v2370_v63  ;;  %3207 = vmatmul.mubr.msk.bf16.vlgmr.msra.gmra.mxu0 %vm475_vm4, %v2370_v63 }
 0x4a2   :  { %2979 = vmatpush1.bf16.msra.mxu1 %v4123_v25  ;;  %3020 = vmatpush1.bf16.msra.mxu0 %v4126_v9  ;;  %v2390_v25 = vshrl.u32 %v2389_v47, 7 }
 0x4a3   :  { %2980 = vmatprep.subr.bf16.mxu1 %v4131_v36  ;;  %3021 = vmatprep.subr.bf16.mxu0 %v4134_v52  ;;  %v2387_v36 = vld [vmem:[%s6241_s8] sm:$0xf] }
 0x4a4   :  { %v2391_v9 = vsub.s32 0, %v2390_v25  ;;  %v2399_v63 = vsub.s32 2, %v2390_v25  ;;  %v2395_v52 = vsub.s32 1, %v2390_v25 }
 0x4a6   :  { %2981 = vmatpush1.bf16.msra.mxu1 %v4129_v5  ;;  %3022 = vmatpush1.bf16.msra.mxu0 %v4132_v42  ;;  %v2403_v5 = vsub.s32 3, %v2390_v25  ;;  %v2392_v42 = vrot.slane %v2387_v36, %v2391_v9 }
 0x4a7   :  { %2982 = vmatprep.subr.bf16.mxu1 %v4137_v45  ;;  %3023 = vmatprep.subr.bf16.mxu0 %v4140_v38  ;;  %v2400_v45 = vrot.slane %v2387_v36, %v2399_v63  ;;  %v2396_v38 = vrot.slane %v2387_v36, %v2395_v52 }
 0x4aa   :  { %2983 = vmatpush1.bf16.msra.mxu1 %v4135_v43  ;;  %3024 = vmatpush1.bf16.msra.mxu0 %v4138_v58  ;;  %v2404_v43 = vrot.slane %v2387_v36, %v2403_v5 }
 0x4ab   :  { %2984 = vmatprep.subr.bf16.mxu1 %v4143_v60  ;;  %3025 = vmatprep.subr.bf16.mxu0 %v4146_v12 }
 0x4ae   :  { %2985 = vmatpush1.bf16.msra.mxu1 %v4141_v53  ;;  %3026 = vmatpush1.bf16.msra.mxu0 %v4144_v39 }
 0x4af   :  { %2986 = vmatprep.subr.bf16.mxu1 %v4149_v24  ;;  %3027 = vmatprep.subr.bf16.mxu0 %v4152_v48 }
 0x4b2   :  { %2987 = vmatpush1.bf16.msra.mxu1 %v4147_v7  ;;  %3028 = vmatpush1.bf16.msra.mxu0 %v4150_v21 }
 0x4b3   :  { %2988 = vmatprep.subr.bf16.mxu1 %v4155_v3  ;;  %3029 = vmatprep.subr.bf16.mxu0 %v4158_v10 }
 0x4b6   :  { %2989 = vmatpush1.bf16.msra.mxu1 %v4153_v41  ;;  %3030 = vmatpush1.bf16.msra.mxu0 %v4156_v26 }
 0x4b7   :  { %2990 = vmatprep.subr.bf16.mxu1 %v4161_v19  ;;  %3031 = vmatprep.subr.bf16.mxu0 %v4164_v33 }
 0x4ba   :  { %2991 = vmatpush1.bf16.msra.mxu1 %v4159_v4  ;;  %3032 = vmatpush1.bf16.msra.mxu0 %v4162_v44 }
 0x4bb   :  { %2992 = vmatprep.subr.bf16.mxu1 %v4167_v34  ;;  %3033 = vmatprep.subr.bf16.mxu0 %v4170_v59 }
 0x4be   :  { %2993 = vmatpush1.bf16.msra.mxu1 %v4165_v50  ;;  %3034 = vmatpush1.bf16.msra.mxu0 %v4168_v8  ;;  %v2646_v8 = vld [vmem:[%s6243_s10] sm:$0x3]  ;;  %s4236_s10 = scalar_lea.vmem %s3079_s25, 64 }
 0x4bf   :  { %2994 = vmatprep.subr.bf16.mxu1 %v4173_v6  ;;  %3035 = vmatprep.subr.bf16.mxu0 %v4176_v0  ;;  %v2651_v6 = vrot.slane %v2646_v8, %v2391_v9  ;;  %v2655_v0 = vrot.slane %v2646_v8, %v2395_v52  ;;  %p4237_p0 = scmp.ne.s32.totalorder %s3079_s25, %s4236_s10  ;;  %p4242_p2 = scmp.lt.s32.totalorder %s4236_s10, %s4236_s10 }
 0x4c1   :  { %p4243_p3 = por %p4242_p2, %p4241_p1 }
 0x4c2   :  { %2995 = vmatpush2.bf16.msra.mxu1 %v4171_v62  ;;  %3036 = vmatpush2.bf16.msra.mxu0 %v4174_v11 }
 0x4c3   :  { %2996 = vmatprep.subr.bf16.mxu1 %v4179_v40  ;;  %3037 = vmatprep.subr.bf16.mxu0 %v4182_v23  ;;  %p4244_p4 = pnand %p4243_p3, %p4237_p0 }
 0x4c6   :  { %2997 = vmatpush2.bf16.msra.mxu1 %v4177_v35  ;;  %3038 = vmatpush2.bf16.msra.mxu0 %v4180_v27 }
 0x4c7   :  { %2998 = vmatprep.subr.bf16.mxu1 %v4185_v14  ;;  %3039 = vmatprep.subr.bf16.mxu0 %v4188_v16 }
 0x4ca   :  { %2999 = vmatpush2.bf16.msra.mxu1 %v4183_v56  ;;  %3040 = vmatpush2.bf16.msra.mxu0 %v4186_v2 }
 0x4cb   :  { %3000 = vmatprep.subr.bf16.mxu1 %v4191_v29  ;;  %3041 = vmatprep.subr.bf16.mxu0 %v4194_v46 }
 0x4ce   :  { %3001 = vmatpush2.bf16.msra.mxu1 %v4189_v1  ;;  %3042 = vmatpush2.bf16.msra.mxu0 %v4192_v37 }
 0x4cf   :  { %3002 = vmatprep.subr.bf16.mxu1 %v4197_v17  ;;  %3043 = vmatprep.subr.bf16.mxu0 %v4200_v57 }
 0x4d2   :  { %3003 = vmatpush2.bf16.msra.mxu1 %v4195_v18  ;;  %3044 = vmatpush2.bf16.msra.mxu0 %v4198_v22 }
 0x4d3   :  { %3004 = vmatprep.subr.bf16.mxu1 %v4203_v28  ;;  %3045 = vmatprep.subr.bf16.mxu0 %v4206_v13 }
 0x4d6   :  { %3005 = vmatpush2.bf16.msra.mxu1 %v4201_v51  ;;  %3046 = vmatpush2.bf16.msra.mxu0 %v4204_v61 }
 0x4d7   :  { %3006 = vmatprep.subr.bf16.mxu1 %v4209_v31  ;;  %3047 = vmatprep.subr.bf16.mxu0 %v4212_v20 }
 0x4da   :  { %3007 = vmatpush2.bf16.msra.mxu1 %v4207_v55  ;;  %3048 = vmatpush2.bf16.msra.mxu0 %v4210_v30 }
 0x4db   :  { %3008 = vmatprep.subr.bf16.mxu1 %v4215_v49  ;;  %3049 = vmatprep.subr.bf16.mxu0 %v4218_v15 }
 0x4de   :  { %3009 = vmatpush2.bf16.msra.mxu1 %v4213_v32  ;;  %3050 = vmatpush2.bf16.msra.mxu0 %v4216_v54 }
 0x561   :  { %v2526_v58 = vpop.f32.mrf.mxu1  ;;  %v2567_v60 = vpop.f32.mrf.mxu0 }
 0x562   :  { %v2527_v12 = vadd.f32 %v2526_v58, %v2392_v42  ;;  %v2568_v53 = vadd.f32 %v2567_v60, %v2400_v45 }
 0x563   :  { %v2528_v39 = vpop.f32.mrf.mxu1  ;;  %v2569_v24 = vpop.f32.mrf.mxu0 }
 0x564   :  { %v2529_v48 = vadd.f32 %v2528_v39, %v2396_v38  ;;  %v2570_v7 = vadd.f32 %v2569_v24, %v2404_v43  ;;  %v2574_v21 = vmax.f32 %v2527_v12, 0.0  ;;  %v2576_v3 = vmax.f32 %v2568_v53, 0.0 }
 0x565   :  { %v2530_v10 = vpop.f32.mrf.mxu1  ;;  %v2571_v41 = vpop.f32.mrf.mxu0 }
 0x566   :  { %v2575_v26 = vmax.f32 %v2529_v48, 0.0  ;;  %v2577_v19 = vmax.f32 %v2570_v7, 0.0  ;;  %v2578_v59 = vpack.c.bf16 %v2574_v21, %v2574_v21  ;;  %v2580_v50 = vpack.c.bf16 %v2576_v3, %v2576_v3 }
 0x567   :  { %v2531_v33 = vpop.f32.mrf.mxu1  ;;  %v2572_v4 = vpop.f32.mrf.mxu0 }
 0x568   :  { %v2579_v44 = vpack.c.bf16 %v2575_v26, %v2575_v26  ;;  %v2581_v34 = vpack.c.bf16 %v2577_v19, %v2577_v19 }
 0x56a   :  { %3010 = vmatprep.mubr.bf16.mxu1 %v2579_v44  ;;  %3051 = vmatprep.mubr.bf16.mxu0 %v2581_v34 }
 0x56b   :  { %3011 = vmatmul.mubr.bf16.vlgmr.msra.gmra.mxu1 %v2578_v59  ;;  %3052 = vmatmul.mubr.bf16.vlgmr.msra.gmra.mxu0 %v2580_v50 }
 0x62b   :  { %v3012_v62 = vpop.f32.mrf.mxu1  ;;  %v3053_v11 = vpop.f32.mrf.mxu0 }
 0x62c   :  { %v3013_v40 = vadd.f32 %v3012_v62, %v2651_v6 }
 0x62d   :  { %v3014_v23 = vpop.f32.mrf.mxu1  ;;  %v3055_v35 = vpop.f32.mrf.mxu0 }
 0x62e   :  { %v3015_v27 = vadd.f32 %v3014_v23, %v2655_v0  ;;  %v3054_v56 = vadd.f32 %v3053_v11, %v3013_v40 }
 0x62f   :  { %v3016_v14 = vpop.f32.mrf.mxu1  ;;  %v3057_v16 = vpop.f32.mrf.mxu0 }
 0x630   :  { %v3056_v2 = vadd.f32 %v3055_v35, %v3015_v27 }
 0x631   :  { %v3017_v29 = vpop.f32.mrf.mxu1  ;;  %v3058_v46 = vpop.f32.mrf.mxu0 }
 0x632   :  { %v3062_v1 = vcombine.low %v3054_v56, %v3056_v2 }
 0x634   :  { %3272 = vst.sshfl [vmem:[#allocation2] sm:$0x33 pattern:$0x76325410] %v3062_v1 }
 0x635   :  { %4247 = shalt.err (!%p4244_p4)
}
 0x636   :  { %3081 = dma.vmem_to_hbm [thread:$0]  %s3079_s25, 64, %s6244_s11, [#allocation3]  }
 0x637   :  { %4256 = dma.done.wait [#allocation3], 64  }
 0x638   :  { %4257 = vsyncadd [#allocation3], 4294967232 }
 0x639   :  { %3085 = vsyncpa [#allocation3], 1 }

</bundles_post_ra>
